<compile_context>
chip_gen: v7x
topology: tpu7x:2x2x1
jax: 0.10.0
libtpu: 0.0.40
codegen_flags: <defaults>
</compile_context>

<pallas_src>
import functools
import math

import jax
import jax.numpy as jnp
import numpy as np
from jax import lax
from jax.experimental import pallas as pl
from jax.experimental.pallas import tpu as pltpu

_COMPUTE_DTYPE = jnp.bfloat16  # MXU input dtype; accumulation stays f32.


# ------------------------------ Fused kernel (per batch block) ------------------------------
def fused_imiter_kernel(h_ref, wqkv_ref, bqkv_ref, wtk_ref, wik_ref, wtv_ref, wiv_ref,
                        bimit_ref, ctx_ref, ssek_ref, ssev_ref, *,
                        batch_block, num_heads, head_dim, tp1, ip1):
    H = num_heads * head_dim
    S = tp1 + ip1
    cdt = _COMPUTE_DTYPE

    # Fused Q/K/V projection over all batch_block*S rows: one fat MXU pass (N = 3H).
    # NOTE: 1/sqrt(head_dim) is already folded into the q columns of Wqkv / bqkv.
    x = h_ref[...].reshape(batch_block * S, H).astype(cdt)
    qkv = jnp.dot(x, wqkv_ref[...], preferred_element_type=jnp.float32) + bqkv_ref[...]
    q_all = qkv[:, :H]
    k_all = qkv[:, H:2 * H]
    v_all = qkv[:, 2 * H:]

    bk_vec = bimit_ref[:, 0:1]   # [S,1] imitation key bias (text rows then image rows)
    bv_vec = bimit_ref[:, 1:2]   # [S,1] imitation value bias

    sse_k = jnp.zeros((1, 1), jnp.float32)
    sse_v = jnp.zeros((1, 1), jnp.float32)

    for b in range(batch_block):
        rows = slice(b * S, (b + 1) * S)
        q_b = q_all[rows]
        k_b = k_all[rows]
        v_b = v_all[rows]

        k_text, k_img = k_b[:tp1], k_b[tp1:]
        v_text, v_img = v_b[:tp1], v_b[tp1:]

        # Imitation linears: only the two real block products (the dense [S,S]
        # formulation is half structural zeros), applied once on the full
        # [., H] tensors — head-independent, bias broadcasts over H.
        pred_k_text = (jnp.dot(wtk_ref[...], k_img.astype(cdt),
                               preferred_element_type=jnp.float32) + bk_vec[:tp1])
        pred_k_img = (jnp.dot(wik_ref[...], k_text.astype(cdt),
                              preferred_element_type=jnp.float32) + bk_vec[tp1:])
        pred_v_text = (jnp.dot(wtv_ref[...], v_img.astype(cdt),
                               preferred_element_type=jnp.float32) + bv_vec[:tp1])
        pred_v_img = (jnp.dot(wiv_ref[...], v_text.astype(cdt),
                              preferred_element_type=jnp.float32) + bv_vec[tp1:])

        # Partial sums of squared error for the MSE imitation loss.
        dkt = pred_k_text - k_text
        dki = pred_k_img - k_img
        dvt = pred_v_text - v_text
        dvi = pred_v_img - v_img
        sse_k = sse_k + jnp.sum(dkt * dkt, keepdims=True) + jnp.sum(dki * dki, keepdims=True)
        sse_v = sse_v + jnp.sum(dvt * dvt, keepdims=True) + jnp.sum(dvi * dvi, keepdims=True)

        imit_k = jnp.concatenate([pred_k_text, pred_k_img], axis=0).astype(cdt)  # [S, H]
        imit_v = jnp.concatenate([pred_v_text, pred_v_img], axis=0).astype(cdt)  # [S, H]
        q_c = q_b.astype(cdt)

        # Per-head attention (heads = contiguous head_dim-wide column blocks).
        # Each head's context is stored immediately -> no trailing concatenate
        # and no long-lived ctx_parts list.
        for h in range(num_heads):
            lo = h * head_dim
            hi = lo + head_dim
            q_h = q_c[:, lo:hi]
            k_h = imit_k[:, lo:hi]
            v_h = imit_v[:, lo:hi]

            # scores = (q_h / sqrt(hd)) @ k_h^T   (scale already folded into q)
            scores = lax.dot_general(q_h, k_h, (((1,), (1,)), ((), ())),
                                     preferred_element_type=jnp.float32)
            m = jnp.max(scores, axis=-1, keepdims=True)
            e = jnp.exp(scores - m)
            denom = jnp.sum(e, axis=-1, keepdims=True)
            probs = (e * pl.reciprocal(denom, approx=True)).astype(cdt)
            # nn.Dropout on probs is identity in eval mode (inference); no RNG here.
            ctx_h = jnp.dot(probs, v_h, preferred_element_type=jnp.float32)
            ctx_ref[b, :, lo:hi] = ctx_h.astype(ctx_ref.dtype)

    ssek_ref[0] = sse_k
    ssev_ref[0] = sse_v


# ------------------------------- One-time weight packing -------------------------------
def pack_imiter_params(params, *, num_heads, weight_dtype=_COMPUTE_DTYPE):
    """Pack weights once, outside the per-call path (jit-constant thereafter)."""
    H = params["Wq"].shape[0]
    head_dim = H // num_heads
    scale = 1.0 / math.sqrt(head_dim)
    # Fold the 1/sqrt(head_dim) attention scale into the query projection (+ bias).
    wqkv = jnp.concatenate([params["Wq"].T * scale, params["Wk"].T, params["Wv"].T],
                           axis=1).astype(weight_dtype)                           # [H, 3H]
    bqkv = jnp.concatenate([params["bq"] * scale, params["bk"], params["bv"]]
                           )[None, :].astype(jnp.float32)                         # [1, 3H]
    b_imit = jnp.stack(
        [jnp.concatenate([params["b_text_key"], params["b_image_key"]]),
         jnp.concatenate([params["b_text_value"], params["b_image_value"]])],
        axis=1).astype(jnp.float32)                                               # [S, 2]
    return {
        "wqkv": wqkv, "bqkv": bqkv, "b_imit": b_imit,
        "wtk": params["W_text_key"].astype(weight_dtype),     # [Tp1, Ip1]
        "wik": params["W_image_key"].astype(weight_dtype),    # [Ip1, Tp1]
        "wtv": params["W_text_value"].astype(weight_dtype),   # [Tp1, Ip1]
        "wiv": params["W_image_value"].astype(weight_dtype),  # [Ip1, Tp1]
    }


def _choose_batch_block(B, S, target_rows=512):
    """Fatten the MXU M dimension while keeping >= 2 grid steps (v7x megacore)."""
    best = 1
    for bb in range(1, B + 1):
        if B % bb:
            continue
        if B // bb < 2 and B >= 2:
            continue
        best = bb
        if bb * S >= target_rows:
            break
    return best


# ------------------------------------ Wrapper ------------------------------------
def imiter_forward(hidden, packed, *, num_heads, text_seq_len, image_seq_len,
                   batch_block=None, out_dtype=None):
    B, S, H = hidden.shape
    head_dim = H // num_heads
    tp1, ip1 = text_seq_len + 1, image_seq_len + 1
    assert S == tp1 + ip1
    # out_dtype=jnp.bfloat16 halves the [B,S,H] HBM writeback (useful on v5e).
    out_dtype = hidden.dtype if out_dtype is None else out_dtype
    bb = _choose_batch_block(B, S) if batch_block is None else batch_block
    assert B % bb == 0
    n_blocks = B // bb

    kernel = functools.partial(fused_imiter_kernel, batch_block=bb,
                               num_heads=num_heads, head_dim=head_dim,
                               tp1=tp1, ip1=ip1)

    per_batch_in = pl.BlockSpec((bb, S, H), lambda i: (i, 0, 0))
    per_batch_out = pl.BlockSpec((bb, S, H), lambda i: (i, 0, 0))
    sse_spec = pl.BlockSpec((1, 1, 1), lambda i: (i, 0, 0))

    def run(single_buffer_weights):
        def invariant_spec(shape):
            idx = lambda i, _n=len(shape): (0,) * _n
            if single_buffer_weights:
                # Grid-invariant operands: a 2nd pipeline buffer only doubles VMEM.
                return pl.BlockSpec(shape, idx, pipeline_mode=pl.Buffered(1))
            return pl.BlockSpec(shape, idx)

        # Size the scoped-VMEM request from the actual resident buffers.
        w_bytes = sum(int(packed[k].size) * packed[k].dtype.itemsize
                      for k in ("wqkv", "wtk", "wik", "wtv", "wiv"))
        w_bytes *= 1 if single_buffer_weights else 2
        io_bytes = 2 * bb * S * H * (hidden.dtype.itemsize + jnp.dtype(out_dtype).itemsize)
        tmp_bytes = 10 * bb * S * H * 4 + 2 * S * S * 4      # rough in-kernel temporaries
        vmem_limit = int(min(max(2 * (w_bytes + io_bytes + tmp_bytes),
                                 32 * 1024 * 1024), 64 * 1024 * 1024))

        return pl.pallas_call(
            kernel,
            out_shape=(jax.ShapeDtypeStruct((B, S, H), out_dtype),
                       jax.ShapeDtypeStruct((n_blocks, 1, 1), jnp.float32),
                       jax.ShapeDtypeStruct((n_blocks, 1, 1), jnp.float32)),
            grid_spec=pltpu.PrefetchScalarGridSpec(
                num_scalar_prefetch=0,
                grid=(n_blocks,),
                in_specs=[per_batch_in,
                          invariant_spec((H, 3 * H)),
                          invariant_spec((1, 3 * H)),
                          invariant_spec((tp1, ip1)),
                          invariant_spec((ip1, tp1)),
                          invariant_spec((tp1, ip1)),
                          invariant_spec((ip1, tp1)),
                          invariant_spec((S, 2))],
                out_specs=[per_batch_out, sse_spec, sse_spec],
            ),
            compiler_params=pltpu.CompilerParams(
                dimension_semantics=("parallel",),
                vmem_limit_bytes=vmem_limit),
        )(hidden, packed["wqkv"], packed["bqkv"],
          packed["wtk"], packed["wik"], packed["wtv"], packed["wiv"],
          packed["b_imit"])

    try:
        ctx, sse_k, sse_v = run(single_buffer_weights=True)
    except Exception:
        # TODO(synk): pipeline_mode=pl.Buffered(1) not supported on this jax build;
        # fall back to default double-buffering of the grid-invariant weights.
        ctx, sse_k, sse_v = run(single_buffer_weights=False)

    # MSE over [B, nh, S, hd] == sum over all B*S*H elements / (B*S*H), for k and v.
    imitation_loss = (jnp.sum(sse_k) + jnp.sum(sse_v)) / (B * S * H)
    return ctx, imitation_loss


# -------------------------- Pure-JAX reference (checking) ------------------------
def imiter_forward_ref(hidden, params, *, num_heads, text_seq_len, image_seq_len):
    B, S, H = hidden.shape
    nh = num_heads
    hd = H // nh
    Tp1 = text_seq_len + 1

    q = hidden @ params["Wq"].T + params["bq"]
    k = hidden @ params["Wk"].T + params["bk"]
    v = hidden @ params["Wv"].T + params["bv"]

    def split_heads(x):
        return x.reshape(B, S, nh, hd).transpose(0, 2, 1, 3)

    q4, k4, v4 = split_heads(q), split_heads(k), split_heads(v)

    def imitate(x4, w_text, b_text, w_image, b_image):
        text_m, image_m = x4[:, :, :Tp1, :], x4[:, :, Tp1:, :]
        pred_text = jnp.einsum('ti,bhid->bhtd', w_text, image_m) + b_text[None, None, :, None]
        pred_image = jnp.einsum('it,bhtd->bhid', w_image, text_m) + b_image[None, None, :, None]
        return jnp.concatenate([pred_text, pred_image], axis=2)

    imit_k = imitate(k4, params["W_text_key"], params["b_text_key"],
                     params["W_image_key"], params["b_image_key"])
    imit_v = imitate(v4, params["W_text_value"], params["b_text_value"],
                     params["W_image_value"], params["b_image_value"])

    loss = jnp.mean((imit_k - k4) ** 2) + jnp.mean((imit_v - v4) ** 2)

    scale = 1.0 / math.sqrt(hd)
    scores = jnp.einsum('bhqd,bhkd->bhqk', q4, imit_k) * scale
    probs = jax.nn.softmax(scores, axis=-1)
    ctx = jnp.einsum('bhqk,bhkd->bhqd', probs, imit_v)
    ctx = ctx.transpose(0, 2, 1, 3).reshape(B, S, H)
    return ctx, loss


# ------------------------------------- Main --------------------------------------
if __name__ == "__main__":
    # Small config consistent with the module's __init__
    B = 2
    hidden_size = 32
    num_heads = 4
    max_position_embeddings = 8      # text_seq_len
    image_size, patch_size = 16, 4   # image_seq_len = (16/4)^2 = 16
    text_seq_len = max_position_embeddings
    image_seq_len = (image_size // patch_size) ** 2
    Tp1, Ip1 = text_seq_len + 1, image_seq_len + 1
    S = Tp1 + Ip1                    # 9 + 17 = 26

    root = jax.random.PRNGKey(0)
    keys = jax.random.split(root, 16)

    def init(key, shape):
        return 0.02 * jax.random.normal(key, shape, jnp.float32)

    params = {
        "Wq": init(keys[0], (hidden_size, hidden_size)),
        "bq": init(keys[1], (hidden_size,)),
        "Wk": init(keys[2], (hidden_size, hidden_size)),
        "bk": init(keys[3], (hidden_size,)),
        "Wv": init(keys[4], (hidden_size, hidden_size)),
        "bv": init(keys[5], (hidden_size,)),
        "W_text_key": init(keys[6], (Tp1, Ip1)),      # imitate_text_key: Linear(Ip1 -> Tp1)
        "b_text_key": init(keys[7], (Tp1,)),
        "W_image_key": init(keys[8], (Ip1, Tp1)),     # imitate_image_key: Linear(Tp1 -> Ip1)
        "b_image_key": init(keys[9], (Ip1,)),
        "W_text_value": init(keys[10], (Tp1, Ip1)),
        "b_text_value": init(keys[11], (Tp1,)),
        "W_image_value": init(keys[12], (Ip1, Tp1)),
        "b_image_value": init(keys[13], (Ip1,)),
    }

    hidden_states = jax.random.normal(keys[14], (B, S, hidden_size), jnp.float32)

    packed = pack_imiter_params(params, num_heads=num_heads)  # one-time weight packing
    ctx, loss = imiter_forward(hidden_states, packed,
                               num_heads=num_heads,
                               text_seq_len=text_seq_len,
                               image_seq_len=image_seq_len)
    jax.block_until_ready((ctx, loss))

    ctx_ref, loss_ref = imiter_forward_ref(hidden_states, params,
                                           num_heads=num_heads,
                                           text_seq_len=text_seq_len,
                                           image_seq_len=image_seq_len)
    # Tolerance covers bf16 weight/activation quantization on the MXU inputs and
    # the EUP approximate reciprocal in the softmax (f32 reference).
    np.testing.assert_allclose(np.asarray(ctx), np.asarray(ctx_ref), rtol=2e-2, atol=1e-3)
    np.testing.assert_allclose(np.asarray(loss), np.asarray(loss_ref), rtol=2e-2, atol=1e-4)

    print("KERNEL_OK")
</pallas_src>

<mosaic_0001>
module attributes {stable_mosaic.version = 11 : i64} {
  func.func @fused_imiter_kernel(%arg0: i32, %arg1: memref<1x26x32xf32, #tpu.memory_space<vmem>>, %arg2: memref<32x96xbf16, #tpu.memory_space<vmem>>, %arg3: memref<1x96xf32, #tpu.memory_space<vmem>>, %arg4: memref<9x17xbf16, #tpu.memory_space<vmem>>, %arg5: memref<17x9xbf16, #tpu.memory_space<vmem>>, %arg6: memref<9x17xbf16, #tpu.memory_space<vmem>>, %arg7: memref<17x9xbf16, #tpu.memory_space<vmem>>, %arg8: memref<26x2xf32, #tpu.memory_space<vmem>>, %arg9: memref<1x26x32xf32, #tpu.memory_space<vmem>>, %arg10: memref<1x1x1xf32, #tpu.memory_space<vmem>>, %arg11: memref<1x1x1xf32, #tpu.memory_space<vmem>>) attributes {dimension_semantics = [#tpu.dimension_semantics<parallel>], iteration_bounds = array<i64: 2>, scalar_prefetch = 0 : i64, scratch_operands = 0 : i64, tpu.core_type = #tpu.core_type<tc>, window_params = [{transform_indices = @transform_0, window_bounds = array<i64: 1, 26, 32>}, {pipeline_mode = #tpu.pipeline_mode<synchronous>, transform_indices = @transform_1, window_bounds = array<i64: 32, 96>}, {pipeline_mode = #tpu.pipeline_mode<synchronous>, transform_indices = @transform_2, window_bounds = array<i64: 1, 96>}, {pipeline_mode = #tpu.pipeline_mode<synchronous>, transform_indices = @transform_3, window_bounds = array<i64: 9, 17>}, {pipeline_mode = #tpu.pipeline_mode<synchronous>, transform_indices = @transform_4, window_bounds = array<i64: 17, 9>}, {pipeline_mode = #tpu.pipeline_mode<synchronous>, transform_indices = @transform_5, window_bounds = array<i64: 9, 17>}, {pipeline_mode = #tpu.pipeline_mode<synchronous>, transform_indices = @transform_6, window_bounds = array<i64: 17, 9>}, {pipeline_mode = #tpu.pipeline_mode<synchronous>, transform_indices = @transform_7, window_bounds = array<i64: 26, 2>}, {transform_indices = @transform_8, window_bounds = array<i64: 1, 26, 32>}, {transform_indices = @transform_9, window_bounds = array<i64: 1, 1, 1>}, {transform_indices = @transform_10, window_bounds = array<i64: 1, 1, 1>}]} {
    %c0 = arith.constant 0 : index
    %c0_0 = arith.constant 0 : index
    %c0_1 = arith.constant 0 : index
    %0 = vector.load %arg1[%c0, %c0_0, %c0_1] : memref<1x26x32xf32, #tpu.memory_space<vmem>>, vector<1x26x32xf32>
    %1 = vector.shape_cast %0 : vector<1x26x32xf32> to vector<26x32xf32>
    %2 = arith.truncf %1 : vector<26x32xf32> to vector<26x32xbf16>
    %c0_2 = arith.constant 0 : index
    %c0_3 = arith.constant 0 : index
    %3 = vector.load %arg2[%c0_2, %c0_3] : memref<32x96xbf16, #tpu.memory_space<vmem>>, vector<32x96xbf16>
    %cst = arith.constant dense<0.000000e+00> : vector<26x96xf32>
    %4 = tpu.matmul %2, %3, %cst {dimension_numbers = #tpu.dot_dimension_numbers<[1], [0], [0], [1], [0, 0, 1, 1], [], []>} : vector<26x32xbf16>, vector<32x96xbf16>, vector<26x96xf32> -> vector<26x96xf32>
    %c0_4 = arith.constant 0 : index
    %c0_5 = arith.constant 0 : index
    %5 = vector.load %arg3[%c0_4, %c0_5] : memref<1x96xf32, #tpu.memory_space<vmem>>, vector<1x96xf32>
    %6 = vector.broadcast %5 : vector<1x96xf32> to vector<26x96xf32>
    %7 = arith.addf %4, %6 : vector<26x96xf32>
    %8 = vector.extract_strided_slice %7 {offsets = [0, 0], sizes = [26, 32], strides = [1, 1]} : vector<26x96xf32> to vector<26x32xf32>
    %9 = vector.extract_strided_slice %7 {offsets = [0, 32], sizes = [26, 32], strides = [1, 1]} : vector<26x96xf32> to vector<26x32xf32>
    %10 = vector.extract_strided_slice %7 {offsets = [0, 64], sizes = [26, 32], strides = [1, 1]} : vector<26x96xf32> to vector<26x32xf32>
    %c0_6 = arith.constant 0 : index
    %c0_7 = arith.constant 0 : index
    %11 = vector.load %arg8[%c0_6, %c0_7] : memref<26x2xf32, #tpu.memory_space<vmem>>, vector<26x1xf32>
    %c0_8 = arith.constant 0 : index
    %c1 = arith.constant 1 : index
    %12 = vector.load %arg8[%c0_8, %c1] : memref<26x2xf32, #tpu.memory_space<vmem>>, vector<26x1xf32>
    %cst_9 = arith.constant 0.000000e+00 : f32
    %13 = vector.broadcast %cst_9 : f32 to vector<1x1xf32>
    %cst_10 = arith.constant 0.000000e+00 : f32
    %14 = vector.broadcast %cst_10 : f32 to vector<1x1xf32>
    %15 = vector.extract_strided_slice %9 {offsets = [0, 0], sizes = [9, 32], strides = [1, 1]} : vector<26x32xf32> to vector<9x32xf32>
    %16 = vector.extract_strided_slice %9 {offsets = [9, 0], sizes = [17, 32], strides = [1, 1]} : vector<26x32xf32> to vector<17x32xf32>
    %17 = vector.extract_strided_slice %10 {offsets = [0, 0], sizes = [9, 32], strides = [1, 1]} : vector<26x32xf32> to vector<9x32xf32>
    %18 = vector.extract_strided_slice %10 {offsets = [9, 0], sizes = [17, 32], strides = [1, 1]} : vector<26x32xf32> to vector<17x32xf32>
    %c0_11 = arith.constant 0 : index
    %c0_12 = arith.constant 0 : index
    %19 = vector.load %arg4[%c0_11, %c0_12] : memref<9x17xbf16, #tpu.memory_space<vmem>>, vector<9x17xbf16>
    %20 = arith.truncf %16 : vector<17x32xf32> to vector<17x32xbf16>
    %cst_13 = arith.constant dense<0.000000e+00> : vector<9x32xf32>
    %21 = tpu.matmul %19, %20, %cst_13 {dimension_numbers = #tpu.dot_dimension_numbers<[1], [0], [0], [1], [0, 0, 1, 1], [], []>} : vector<9x17xbf16>, vector<17x32xbf16>, vector<9x32xf32> -> vector<9x32xf32>
    %22 = vector.extract_strided_slice %11 {offsets = [0, 0], sizes = [9, 1], strides = [1, 1]} : vector<26x1xf32> to vector<9x1xf32>
    %23 = vector.broadcast %22 : vector<9x1xf32> to vector<9x32xf32>
    %24 = arith.addf %21, %23 : vector<9x32xf32>
    %c0_14 = arith.constant 0 : index
    %c0_15 = arith.constant 0 : index
    %25 = vector.load %arg5[%c0_14, %c0_15] : memref<17x9xbf16, #tpu.memory_space<vmem>>, vector<17x9xbf16>
    %26 = arith.truncf %15 : vector<9x32xf32> to vector<9x32xbf16>
    %cst_16 = arith.constant dense<0.000000e+00> : vector<17x32xf32>
    %27 = tpu.matmul %25, %26, %cst_16 {dimension_numbers = #tpu.dot_dimension_numbers<[1], [0], [0], [1], [0, 0, 1, 1], [], []>} : vector<17x9xbf16>, vector<9x32xbf16>, vector<17x32xf32> -> vector<17x32xf32>
    %28 = vector.extract_strided_slice %11 {offsets = [9, 0], sizes = [17, 1], strides = [1, 1]} : vector<26x1xf32> to vector<17x1xf32>
    %29 = vector.broadcast %28 : vector<17x1xf32> to vector<17x32xf32>
    %30 = arith.addf %27, %29 : vector<17x32xf32>
    %c0_17 = arith.constant 0 : index
    %c0_18 = arith.constant 0 : index
    %31 = vector.load %arg6[%c0_17, %c0_18] : memref<9x17xbf16, #tpu.memory_space<vmem>>, vector<9x17xbf16>
    %32 = arith.truncf %18 : vector<17x32xf32> to vector<17x32xbf16>
    %cst_19 = arith.constant dense<0.000000e+00> : vector<9x32xf32>
    %33 = tpu.matmul %31, %32, %cst_19 {dimension_numbers = #tpu.dot_dimension_numbers<[1], [0], [0], [1], [0, 0, 1, 1], [], []>} : vector<9x17xbf16>, vector<17x32xbf16>, vector<9x32xf32> -> vector<9x32xf32>
    %34 = vector.extract_strided_slice %12 {offsets = [0, 0], sizes = [9, 1], strides = [1, 1]} : vector<26x1xf32> to vector<9x1xf32>
    %35 = vector.broadcast %34 : vector<9x1xf32> to vector<9x32xf32>
    %36 = arith.addf %33, %35 : vector<9x32xf32>
    %c0_20 = arith.constant 0 : index
    %c0_21 = arith.constant 0 : index
    %37 = vector.load %arg7[%c0_20, %c0_21] : memref<17x9xbf16, #tpu.memory_space<vmem>>, vector<17x9xbf16>
    %38 = arith.truncf %17 : vector<9x32xf32> to vector<9x32xbf16>
    %cst_22 = arith.constant dense<0.000000e+00> : vector<17x32xf32>
    %39 = tpu.matmul %37, %38, %cst_22 {dimension_numbers = #tpu.dot_dimension_numbers<[1], [0], [0], [1], [0, 0, 1, 1], [], []>} : vector<17x9xbf16>, vector<9x32xbf16>, vector<17x32xf32> -> vector<17x32xf32>
    %40 = vector.extract_strided_slice %12 {offsets = [9, 0], sizes = [17, 1], strides = [1, 1]} : vector<26x1xf32> to vector<17x1xf32>
    %41 = vector.broadcast %40 : vector<17x1xf32> to vector<17x32xf32>
    %42 = arith.addf %39, %41 : vector<17x32xf32>
    %43 = arith.subf %24, %15 : vector<9x32xf32>
    %44 = arith.subf %30, %16 : vector<17x32xf32>
    %45 = arith.subf %36, %17 : vector<9x32xf32>
    %46 = arith.subf %42, %18 : vector<17x32xf32>
    %47 = arith.mulf %43, %43 : vector<9x32xf32>
    %48 = vector.shape_cast %47 : vector<9x32xf32> to vector<1x9x32xf32>
    %cst_23 = arith.constant dense<0.000000e+00> : vector<1xf32>
    %49 = vector.multi_reduction <add>, %48, %cst_23 [1, 2] : vector<1x9x32xf32> to vector<1xf32>
    %50 = vector.shape_cast %49 : vector<1xf32> to vector<1x1x1xf32>
    %51 = vector.extract %50[0, 0, 0] : f32 from vector<1x1x1xf32>
    %52 = vector.broadcast %51 : f32 to vector<1x1xf32>
    %53 = arith.addf %13, %52 : vector<1x1xf32>
    %54 = arith.mulf %44, %44 : vector<17x32xf32>
    %55 = vector.shape_cast %54 : vector<17x32xf32> to vector<1x17x32xf32>
    %cst_24 = arith.constant dense<0.000000e+00> : vector<1xf32>
    %56 = vector.multi_reduction <add>, %55, %cst_24 [1, 2] : vector<1x17x32xf32> to vector<1xf32>
    %57 = vector.shape_cast %56 : vector<1xf32> to vector<1x1x1xf32>
    %58 = vector.extract %57[0, 0, 0] : f32 from vector<1x1x1xf32>
    %59 = vector.broadcast %58 : f32 to vector<1x1xf32>
    %60 = arith.addf %53, %59 : vector<1x1xf32>
    %61 = arith.mulf %45, %45 : vector<9x32xf32>
    %62 = vector.shape_cast %61 : vector<9x32xf32> to vector<1x9x32xf32>
    %cst_25 = arith.constant dense<0.000000e+00> : vector<1xf32>
    %63 = vector.multi_reduction <add>, %62, %cst_25 [1, 2] : vector<1x9x32xf32> to vector<1xf32>
    %64 = vector.shape_cast %63 : vector<1xf32> to vector<1x1x1xf32>
    %65 = vector.extract %64[0, 0, 0] : f32 from vector<1x1x1xf32>
    %66 = vector.broadcast %65 : f32 to vector<1x1xf32>
    %67 = arith.addf %14, %66 : vector<1x1xf32>
    %68 = arith.mulf %46, %46 : vector<17x32xf32>
    %69 = vector.shape_cast %68 : vector<17x32xf32> to vector<1x17x32xf32>
    %cst_26 = arith.constant dense<0.000000e+00> : vector<1xf32>
    %70 = vector.multi_reduction <add>, %69, %cst_26 [1, 2] : vector<1x17x32xf32> to vector<1xf32>
    %71 = vector.shape_cast %70 : vector<1xf32> to vector<1x1x1xf32>
    %72 = vector.extract %71[0, 0, 0] : f32 from vector<1x1x1xf32>
    %73 = vector.broadcast %72 : f32 to vector<1x1xf32>
    %74 = arith.addf %67, %73 : vector<1x1xf32>
    %75 = tpu.concatenate %24, %30 in 0 : vector<9x32xf32>, vector<17x32xf32> -> vector<26x32xf32>
    %76 = arith.truncf %75 : vector<26x32xf32> to vector<26x32xbf16>
    %77 = tpu.concatenate %36, %42 in 0 : vector<9x32xf32>, vector<17x32xf32> -> vector<26x32xf32>
    %78 = arith.truncf %77 : vector<26x32xf32> to vector<26x32xbf16>
    %79 = arith.truncf %8 : vector<26x32xf32> to vector<26x32xbf16>
    %80 = vector.extract_strided_slice %79 {offsets = [0, 0], sizes = [26, 8], strides = [1, 1]} : vector<26x32xbf16> to vector<26x8xbf16>
    %81 = vector.extract_strided_slice %76 {offsets = [0, 0], sizes = [26, 8], strides = [1, 1]} : vector<26x32xbf16> to vector<26x8xbf16>
    %82 = vector.extract_strided_slice %78 {offsets = [0, 0], sizes = [26, 8], strides = [1, 1]} : vector<26x32xbf16> to vector<26x8xbf16>
    %cst_27 = arith.constant dense<0.000000e+00> : vector<26x26xf32>
    %83 = tpu.matmul %80, %81, %cst_27 {dimension_numbers = #tpu.dot_dimension_numbers<[1], [1], [0], [0], [0, 0, 1, 0], [], []>} : vector<26x8xbf16>, vector<26x8xbf16>, vector<26x26xf32> -> vector<26x26xf32>
    %cst_28 = arith.constant dense<0xFF800000> : vector<26xf32>
    %84 = vector.multi_reduction <maximumf>, %83, %cst_28 [1] : vector<26x26xf32> to vector<26xf32>
    %85 = vector.shape_cast %84 : vector<26xf32> to vector<26x1xf32>
    %86 = vector.broadcast %85 : vector<26x1xf32> to vector<26x26xf32>
    %87 = arith.subf %83, %86 : vector<26x26xf32>
    %88 = math.exp %87 : vector<26x26xf32>
    %cst_29 = arith.constant dense<0.000000e+00> : vector<26xf32>
    %89 = vector.multi_reduction <add>, %88, %cst_29 [1] : vector<26x26xf32> to vector<26xf32>
    %90 = vector.shape_cast %89 : vector<26xf32> to vector<26x1xf32>
    %91 = tpu.reciprocal %90 {approx = true} : vector<26x1xf32> -> vector<26x1xf32>
    %92 = vector.broadcast %91 : vector<26x1xf32> to vector<26x26xf32>
    %93 = arith.mulf %88, %92 : vector<26x26xf32>
    %94 = arith.truncf %93 : vector<26x26xf32> to vector<26x26xbf16>
    %cst_30 = arith.constant dense<0.000000e+00> : vector<26x8xf32>
    %95 = tpu.matmul %94, %82, %cst_30 {dimension_numbers = #tpu.dot_dimension_numbers<[1], [0], [0], [1], [0, 0, 1, 1], [], []>} : vector<26x26xbf16>, vector<26x8xbf16>, vector<26x8xf32> -> vector<26x8xf32>
    %c0_31 = arith.constant 0 : index
    %c0_32 = arith.constant 0 : index
    %c0_33 = arith.constant 0 : index
    %96 = vector.load %arg9[%c0_31, %c0_32, %c0_33] : memref<1x26x32xf32, #tpu.memory_space<vmem>>, vector<1x26x8xf32>
    %97 = vector.shape_cast %96 : vector<1x26x8xf32> to vector<26x8xf32>
    %98 = vector.shape_cast %95 : vector<26x8xf32> to vector<1x26x8xf32>
    tpu.vector_store %arg9[%c0_31, %c0_32, %c0_33], %98 {strides = array<i32>} : memref<1x26x32xf32, #tpu.memory_space<vmem>>, vector<1x26x8xf32>,
    %99 = vector.extract_strided_slice %79 {offsets = [0, 8], sizes = [26, 8], strides = [1, 1]} : vector<26x32xbf16> to vector<26x8xbf16>
    %100 = vector.extract_strided_slice %76 {offsets = [0, 8], sizes = [26, 8], strides = [1, 1]} : vector<26x32xbf16> to vector<26x8xbf16>
    %101 = vector.extract_strided_slice %78 {offsets = [0, 8], sizes = [26, 8], strides = [1, 1]} : vector<26x32xbf16> to vector<26x8xbf16>
    %cst_34 = arith.constant dense<0.000000e+00> : vector<26x26xf32>
    %102 = tpu.matmul %99, %100, %cst_34 {dimension_numbers = #tpu.dot_dimension_numbers<[1], [1], [0], [0], [0, 0, 1, 0], [], []>} : vector<26x8xbf16>, vector<26x8xbf16>, vector<26x26xf32> -> vector<26x26xf32>
    %cst_35 = arith.constant dense<0xFF800000> : vector<26xf32>
    %103 = vector.multi_reduction <maximumf>, %102, %cst_35 [1] : vector<26x26xf32> to vector<26xf32>
    %104 = vector.shape_cast %103 : vector<26xf32> to vector<26x1xf32>
    %105 = vector.broadcast %104 : vector<26x1xf32> to vector<26x26xf32>
    %106 = arith.subf %102, %105 : vector<26x26xf32>
    %107 = math.exp %106 : vector<26x26xf32>
    %cst_36 = arith.constant dense<0.000000e+00> : vector<26xf32>
    %108 = vector.multi_reduction <add>, %107, %cst_36 [1] : vector<26x26xf32> to vector<26xf32>
    %109 = vector.shape_cast %108 : vector<26xf32> to vector<26x1xf32>
    %110 = tpu.reciprocal %109 {approx = true} : vector<26x1xf32> -> vector<26x1xf32>
    %111 = vector.broadcast %110 : vector<26x1xf32> to vector<26x26xf32>
    %112 = arith.mulf %107, %111 : vector<26x26xf32>
    %113 = arith.truncf %112 : vector<26x26xf32> to vector<26x26xbf16>
    %cst_37 = arith.constant dense<0.000000e+00> : vector<26x8xf32>
    %114 = tpu.matmul %113, %101, %cst_37 {dimension_numbers = #tpu.dot_dimension_numbers<[1], [0], [0], [1], [0, 0, 1, 1], [], []>} : vector<26x26xbf16>, vector<26x8xbf16>, vector<26x8xf32> -> vector<26x8xf32>
    %c0_38 = arith.constant 0 : index
    %c0_39 = arith.constant 0 : index
    %c8 = arith.constant 8 : index
    %115 = vector.load %arg9[%c0_38, %c0_39, %c8] : memref<1x26x32xf32, #tpu.memory_space<vmem>>, vector<1x26x8xf32>
    %116 = vector.shape_cast %115 : vector<1x26x8xf32> to vector<26x8xf32>
    %117 = vector.shape_cast %114 : vector<26x8xf32> to vector<1x26x8xf32>
    tpu.vector_store %arg9[%c0_38, %c0_39, %c8], %117 {strides = array<i32>} : memref<1x26x32xf32, #tpu.memory_space<vmem>>, vector<1x26x8xf32>,
    %118 = vector.extract_strided_slice %79 {offsets = [0, 16], sizes = [26, 8], strides = [1, 1]} : vector<26x32xbf16> to vector<26x8xbf16>
    %119 = vector.extract_strided_slice %76 {offsets = [0, 16], sizes = [26, 8], strides = [1, 1]} : vector<26x32xbf16> to vector<26x8xbf16>
    %120 = vector.extract_strided_slice %78 {offsets = [0, 16], sizes = [26, 8], strides = [1, 1]} : vector<26x32xbf16> to vector<26x8xbf16>
    %cst_40 = arith.constant dense<0.000000e+00> : vector<26x26xf32>
    %121 = tpu.matmul %118, %119, %cst_40 {dimension_numbers = #tpu.dot_dimension_numbers<[1], [1], [0], [0], [0, 0, 1, 0], [], []>} : vector<26x8xbf16>, vector<26x8xbf16>, vector<26x26xf32> -> vector<26x26xf32>
    %cst_41 = arith.constant dense<0xFF800000> : vector<26xf32>
    %122 = vector.multi_reduction <maximumf>, %121, %cst_41 [1] : vector<26x26xf32> to vector<26xf32>
    %123 = vector.shape_cast %122 : vector<26xf32> to vector<26x1xf32>
    %124 = vector.broadcast %123 : vector<26x1xf32> to vector<26x26xf32>
    %125 = arith.subf %121, %124 : vector<26x26xf32>
    %126 = math.exp %125 : vector<26x26xf32>
    %cst_42 = arith.constant dense<0.000000e+00> : vector<26xf32>
    %127 = vector.multi_reduction <add>, %126, %cst_42 [1] : vector<26x26xf32> to vector<26xf32>
    %128 = vector.shape_cast %127 : vector<26xf32> to vector<26x1xf32>
    %129 = tpu.reciprocal %128 {approx = true} : vector<26x1xf32> -> vector<26x1xf32>
    %130 = vector.broadcast %129 : vector<26x1xf32> to vector<26x26xf32>
    %131 = arith.mulf %126, %130 : vector<26x26xf32>
    %132 = arith.truncf %131 : vector<26x26xf32> to vector<26x26xbf16>
    %cst_43 = arith.constant dense<0.000000e+00> : vector<26x8xf32>
    %133 = tpu.matmul %132, %120, %cst_43 {dimension_numbers = #tpu.dot_dimension_numbers<[1], [0], [0], [1], [0, 0, 1, 1], [], []>} : vector<26x26xbf16>, vector<26x8xbf16>, vector<26x8xf32> -> vector<26x8xf32>
    %c0_44 = arith.constant 0 : index
    %c0_45 = arith.constant 0 : index
    %c16 = arith.constant 16 : index
    %134 = vector.load %arg9[%c0_44, %c0_45, %c16] : memref<1x26x32xf32, #tpu.memory_space<vmem>>, vector<1x26x8xf32>
    %135 = vector.shape_cast %134 : vector<1x26x8xf32> to vector<26x8xf32>
    %136 = vector.shape_cast %133 : vector<26x8xf32> to vector<1x26x8xf32>
    tpu.vector_store %arg9[%c0_44, %c0_45, %c16], %136 {strides = array<i32>} : memref<1x26x32xf32, #tpu.memory_space<vmem>>, vector<1x26x8xf32>,
    %137 = vector.extract_strided_slice %79 {offsets = [0, 24], sizes = [26, 8], strides = [1, 1]} : vector<26x32xbf16> to vector<26x8xbf16>
    %138 = vector.extract_strided_slice %76 {offsets = [0, 24], sizes = [26, 8], strides = [1, 1]} : vector<26x32xbf16> to vector<26x8xbf16>
    %139 = vector.extract_strided_slice %78 {offsets = [0, 24], sizes = [26, 8], strides = [1, 1]} : vector<26x32xbf16> to vector<26x8xbf16>
    %cst_46 = arith.constant dense<0.000000e+00> : vector<26x26xf32>
    %140 = tpu.matmul %137, %138, %cst_46 {dimension_numbers = #tpu.dot_dimension_numbers<[1], [1], [0], [0], [0, 0, 1, 0], [], []>} : vector<26x8xbf16>, vector<26x8xbf16>, vector<26x26xf32> -> vector<26x26xf32>
    %cst_47 = arith.constant dense<0xFF800000> : vector<26xf32>
    %141 = vector.multi_reduction <maximumf>, %140, %cst_47 [1] : vector<26x26xf32> to vector<26xf32>
    %142 = vector.shape_cast %141 : vector<26xf32> to vector<26x1xf32>
    %143 = vector.broadcast %142 : vector<26x1xf32> to vector<26x26xf32>
    %144 = arith.subf %140, %143 : vector<26x26xf32>
    %145 = math.exp %144 : vector<26x26xf32>
    %cst_48 = arith.constant dense<0.000000e+00> : vector<26xf32>
    %146 = vector.multi_reduction <add>, %145, %cst_48 [1] : vector<26x26xf32> to vector<26xf32>
    %147 = vector.shape_cast %146 : vector<26xf32> to vector<26x1xf32>
    %148 = tpu.reciprocal %147 {approx = true} : vector<26x1xf32> -> vector<26x1xf32>
    %149 = vector.broadcast %148 : vector<26x1xf32> to vector<26x26xf32>
    %150 = arith.mulf %145, %149 : vector<26x26xf32>
    %151 = arith.truncf %150 : vector<26x26xf32> to vector<26x26xbf16>
    %cst_49 = arith.constant dense<0.000000e+00> : vector<26x8xf32>
    %152 = tpu.matmul %151, %139, %cst_49 {dimension_numbers = #tpu.dot_dimension_numbers<[1], [0], [0], [1], [0, 0, 1, 1], [], []>} : vector<26x26xbf16>, vector<26x8xbf16>, vector<26x8xf32> -> vector<26x8xf32>
    %c0_50 = arith.constant 0 : index
    %c0_51 = arith.constant 0 : index
    %c24 = arith.constant 24 : index
    %153 = vector.load %arg9[%c0_50, %c0_51, %c24] : memref<1x26x32xf32, #tpu.memory_space<vmem>>, vector<1x26x8xf32>
    %154 = vector.shape_cast %153 : vector<1x26x8xf32> to vector<26x8xf32>
    %155 = vector.shape_cast %152 : vector<26x8xf32> to vector<1x26x8xf32>
    tpu.vector_store %arg9[%c0_50, %c0_51, %c24], %155 {strides = array<i32>} : memref<1x26x32xf32, #tpu.memory_space<vmem>>, vector<1x26x8xf32>,
    %c0_52 = arith.constant 0 : index
    %c0_53 = arith.constant 0 : index
    %c0_54 = arith.constant 0 : index
    %156 = vector.load %arg10[%c0_52, %c0_53, %c0_54] : memref<1x1x1xf32, #tpu.memory_space<vmem>>, vector<1x1x1xf32>
    %157 = vector.shape_cast %156 : vector<1x1x1xf32> to vector<1x1xf32>
    %158 = vector.shape_cast %60 : vector<1x1xf32> to vector<1x1x1xf32>
    tpu.vector_store %arg10[%c0_52, %c0_53, %c0_54], %158 {strides = array<i32>} : memref<1x1x1xf32, #tpu.memory_space<vmem>>, vector<1x1x1xf32>,
    %c0_55 = arith.constant 0 : index
    %c0_56 = arith.constant 0 : index
    %c0_57 = arith.constant 0 : index
    %159 = vector.load %arg11[%c0_55, %c0_56, %c0_57] : memref<1x1x1xf32, #tpu.memory_space<vmem>>, vector<1x1x1xf32>
    %160 = vector.shape_cast %159 : vector<1x1x1xf32> to vector<1x1xf32>
    %161 = vector.shape_cast %74 : vector<1x1xf32> to vector<1x1x1xf32>
    tpu.vector_store %arg11[%c0_55, %c0_56, %c0_57], %161 {strides = array<i32>} : memref<1x1x1xf32, #tpu.memory_space<vmem>>, vector<1x1x1xf32>,
    return
  }
  func.func @transform_0(%arg0: i32) -> (i32, i32, i32) {
    %c0_i32 = arith.constant 0 : i32
    %c0_i32_0 = arith.constant 0 : i32
    %c0_i32_1 = arith.constant 0 : i32
    return %arg0, %c0_i32, %c0_i32_0 : i32, i32, i32
  }
  func.func @transform_1(%arg0: i32) -> (i32, i32) {
    %c0_i32 = arith.constant 0 : i32
    %c0_i32_0 = arith.constant 0 : i32
    %c0_i32_1 = arith.constant 0 : i32
    return %c0_i32, %c0_i32_0 : i32, i32
  }
  func.func @transform_2(%arg0: i32) -> (i32, i32) {
    %c0_i32 = arith.constant 0 : i32
    %c0_i32_0 = arith.constant 0 : i32
    %c0_i32_1 = arith.constant 0 : i32
    return %c0_i32, %c0_i32_0 : i32, i32
  }
  func.func @transform_3(%arg0: i32) -> (i32, i32) {
    %c0_i32 = arith.constant 0 : i32
    %c0_i32_0 = arith.constant 0 : i32
    %c0_i32_1 = arith.constant 0 : i32
    return %c0_i32, %c0_i32_0 : i32, i32
  }
  func.func @transform_4(%arg0: i32) -> (i32, i32) {
    %c0_i32 = arith.constant 0 : i32
    %c0_i32_0 = arith.constant 0 : i32
    %c0_i32_1 = arith.constant 0 : i32
    return %c0_i32, %c0_i32_0 : i32, i32
  }
  func.func @transform_5(%arg0: i32) -> (i32, i32) {
    %c0_i32 = arith.constant 0 : i32
    %c0_i32_0 = arith.constant 0 : i32
    %c0_i32_1 = arith.constant 0 : i32
    return %c0_i32, %c0_i32_0 : i32, i32
  }
  func.func @transform_6(%arg0: i32) -> (i32, i32) {
    %c0_i32 = arith.constant 0 : i32
    %c0_i32_0 = arith.constant 0 : i32
    %c0_i32_1 = arith.constant 0 : i32
    return %c0_i32, %c0_i32_0 : i32, i32
  }
  func.func @transform_7(%arg0: i32) -> (i32, i32) {
    %c0_i32 = arith.constant 0 : i32
    %c0_i32_0 = arith.constant 0 : i32
    %c0_i32_1 = arith.constant 0 : i32
    return %c0_i32, %c0_i32_0 : i32, i32
  }
  func.func @transform_8(%arg0: i32) -> (i32, i32, i32) {
    %c0_i32 = arith.constant 0 : i32
    %c0_i32_0 = arith.constant 0 : i32
    %c0_i32_1 = arith.constant 0 : i32
    return %arg0, %c0_i32, %c0_i32_0 : i32, i32, i32
  }
  func.func @transform_9(%arg0: i32) -> (i32, i32, i32) {
    %c0_i32 = arith.constant 0 : i32
    %c0_i32_0 = arith.constant 0 : i32
    %c0_i32_1 = arith.constant 0 : i32
    return %arg0, %c0_i32, %c0_i32_0 : i32, i32, i32
  }
  func.func @transform_10(%arg0: i32) -> (i32, i32, i32) {
    %c0_i32 = arith.constant 0 : i32
    %c0_i32_0 = arith.constant 0 : i32
    %c0_i32_1 = arith.constant 0 : i32
    return %arg0, %c0_i32, %c0_i32_0 : i32, i32, i32
  }
}

module attributes {stable_mosaic.version = 11 : i64} {
  func.func @fused_imiter_kernel(%arg0: i32, %arg1: memref<1x26x32xf32, #tpu.memory_space<vmem>>, %arg2: memref<32x96xbf16, #tpu.memory_space<vmem>>, %arg3: memref<1x96xf32, #tpu.memory_space<vmem>>, %arg4: memref<9x17xbf16, #tpu.memory_space<vmem>>, %arg5: memref<17x9xbf16, #tpu.memory_space<vmem>>, %arg6: memref<9x17xbf16, #tpu.memory_space<vmem>>, %arg7: memref<17x9xbf16, #tpu.memory_space<vmem>>, %arg8: memref<26x2xf32, #tpu.memory_space<vmem>>, %arg9: memref<1x26x32xf32, #tpu.memory_space<vmem>>, %arg10: memref<1x1x1xf32, #tpu.memory_space<vmem>>, %arg11: memref<1x1x1xf32, #tpu.memory_space<vmem>>) attributes {dimension_semantics = [#tpu.dimension_semantics<parallel>], iteration_bounds = array<i64: 2>, scalar_prefetch = 0 : i64, scratch_operands = 0 : i64, tpu.core_type = #tpu.core_type<tc>, window_params = [{transform_indices = @transform_0, window_bounds = array<i64: 1, 26, 32>}, {pipeline_mode = #tpu.pipeline_mode<synchronous>, transform_indices = @transform_1, window_bounds = array<i64: 32, 96>}, {pipeline_mode = #tpu.pipeline_mode<synchronous>, transform_indices = @transform_2, window_bounds = array<i64: 1, 96>}, {pipeline_mode = #tpu.pipeline_mode<synchronous>, transform_indices = @transform_3, window_bounds = array<i64: 9, 17>}, {pipeline_mode = #tpu.pipeline_mode<synchronous>, transform_indices = @transform_4, window_bounds = array<i64: 17, 9>}, {pipeline_mode = #tpu.pipeline_mode<synchronous>, transform_indices = @transform_5, window_bounds = array<i64: 9, 17>}, {pipeline_mode = #tpu.pipeline_mode<synchronous>, transform_indices = @transform_6, window_bounds = array<i64: 17, 9>}, {pipeline_mode = #tpu.pipeline_mode<synchronous>, transform_indices = @transform_7, window_bounds = array<i64: 26, 2>}, {transform_indices = @transform_8, window_bounds = array<i64: 1, 26, 32>}, {transform_indices = @transform_9, window_bounds = array<i64: 1, 1, 1>}, {transform_indices = @transform_10, window_bounds = array<i64: 1, 1, 1>}]} {
    %c0 = arith.constant 0 : index
    %c0_0 = arith.constant 0 : index
    %c0_1 = arith.constant 0 : index
    %0 = vector.load %arg1[%c0, %c0_0, %c0_1] : memref<1x26x32xf32, #tpu.memory_space<vmem>>, vector<1x26x32xf32>
    %1 = vector.shape_cast %0 : vector<1x26x32xf32> to vector<26x32xf32>
    %2 = arith.truncf %1 : vector<26x32xf32> to vector<26x32xbf16>
    %c0_2 = arith.constant 0 : index
    %c0_3 = arith.constant 0 : index
    %3 = vector.load %arg2[%c0_2, %c0_3] : memref<32x96xbf16, #tpu.memory_space<vmem>>, vector<32x96xbf16>
    %cst = arith.constant dense<0.000000e+00> : vector<26x96xf32>
    %4 = tpu.matmul %2, %3, %cst {dimension_numbers = #tpu.dot_dimension_numbers<[1], [0], [0], [1], [0, 0, 1, 1], [], []>} : vector<26x32xbf16>, vector<32x96xbf16>, vector<26x96xf32> -> vector<26x96xf32>
    %c0_4 = arith.constant 0 : index
    %c0_5 = arith.constant 0 : index
    %5 = vector.load %arg3[%c0_4, %c0_5] : memref<1x96xf32, #tpu.memory_space<vmem>>, vector<1x96xf32>
    %6 = vector.broadcast %5 : vector<1x96xf32> to vector<26x96xf32>
    %7 = arith.addf %4, %6 : vector<26x96xf32>
    %8 = vector.extract_strided_slice %7 {offsets = [0, 0], sizes = [26, 32], strides = [1, 1]} : vector<26x96xf32> to vector<26x32xf32>
    %9 = vector.extract_strided_slice %7 {offsets = [0, 32], sizes = [26, 32], strides = [1, 1]} : vector<26x96xf32> to vector<26x32xf32>
    %10 = vector.extract_strided_slice %7 {offsets = [0, 64], sizes = [26, 32], strides = [1, 1]} : vector<26x96xf32> to vector<26x32xf32>
    %c0_6 = arith.constant 0 : index
    %c0_7 = arith.constant 0 : index
    %11 = vector.load %arg8[%c0_6, %c0_7] : memref<26x2xf32, #tpu.memory_space<vmem>>, vector<26x1xf32>
    %c0_8 = arith.constant 0 : index
    %c1 = arith.constant 1 : index
    %12 = vector.load %arg8[%c0_8, %c1] : memref<26x2xf32, #tpu.memory_space<vmem>>, vector<26x1xf32>
    %cst_9 = arith.constant 0.000000e+00 : f32
    %13 = vector.broadcast %cst_9 : f32 to vector<1x1xf32>
    %cst_10 = arith.constant 0.000000e+00 : f32
    %14 = vector.broadcast %cst_10 : f32 to vector<1x1xf32>
    %15 = vector.extract_strided_slice %9 {offsets = [0, 0], sizes = [9, 32], strides = [1, 1]} : vector<26x32xf32> to vector<9x32xf32>
    %16 = vector.extract_strided_slice %9 {offsets = [9, 0], sizes = [17, 32], strides = [1, 1]} : vector<26x32xf32> to vector<17x32xf32>
    %17 = vector.extract_strided_slice %10 {offsets = [0, 0], sizes = [9, 32], strides = [1, 1]} : vector<26x32xf32> to vector<9x32xf32>
    %18 = vector.extract_strided_slice %10 {offsets = [9, 0], sizes = [17, 32], strides = [1, 1]} : vector<26x32xf32> to vector<17x32xf32>
    %c0_11 = arith.constant 0 : index
    %c0_12 = arith.constant 0 : index
    %19 = vector.load %arg4[%c0_11, %c0_12] : memref<9x17xbf16, #tpu.memory_space<vmem>>, vector<9x17xbf16>
    %20 = arith.truncf %16 : vector<17x32xf32> to vector<17x32xbf16>
    %cst_13 = arith.constant dense<0.000000e+00> : vector<9x32xf32>
    %21 = tpu.matmul %19, %20, %cst_13 {dimension_numbers = #tpu.dot_dimension_numbers<[1], [0], [0], [1], [0, 0, 1, 1], [], []>} : vector<9x17xbf16>, vector<17x32xbf16>, vector<9x32xf32> -> vector<9x32xf32>
    %22 = vector.extract_strided_slice %11 {offsets = [0, 0], sizes = [9, 1], strides = [1, 1]} : vector<26x1xf32> to vector<9x1xf32>
    %23 = vector.broadcast %22 : vector<9x1xf32> to vector<9x32xf32>
    %24 = arith.addf %21, %23 : vector<9x32xf32>
    %c0_14 = arith.constant 0 : index
    %c0_15 = arith.constant 0 : index
    %25 = vector.load %arg5[%c0_14, %c0_15] : memref<17x9xbf16, #tpu.memory_space<vmem>>, vector<17x9xbf16>
    %26 = arith.truncf %15 : vector<9x32xf32> to vector<9x32xbf16>
    %cst_16 = arith.constant dense<0.000000e+00> : vector<17x32xf32>
    %27 = tpu.matmul %25, %26, %cst_16 {dimension_numbers = #tpu.dot_dimension_numbers<[1], [0], [0], [1], [0, 0, 1, 1], [], []>} : vector<17x9xbf16>, vector<9x32xbf16>, vector<17x32xf32> -> vector<17x32xf32>
    %28 = vector.extract_strided_slice %11 {offsets = [9, 0], sizes = [17, 1], strides = [1, 1]} : vector<26x1xf32> to vector<17x1xf32>
    %29 = vector.broadcast %28 : vector<17x1xf32> to vector<17x32xf32>
    %30 = arith.addf %27, %29 : vector<17x32xf32>
    %c0_17 = arith.constant 0 : index
    %c0_18 = arith.constant 0 : index
    %31 = vector.load %arg6[%c0_17, %c0_18] : memref<9x17xbf16, #tpu.memory_space<vmem>>, vector<9x17xbf16>
    %32 = arith.truncf %18 : vector<17x32xf32> to vector<17x32xbf16>
    %cst_19 = arith.constant dense<0.000000e+00> : vector<9x32xf32>
    %33 = tpu.matmul %31, %32, %cst_19 {dimension_numbers = #tpu.dot_dimension_numbers<[1], [0], [0], [1], [0, 0, 1, 1], [], []>} : vector<9x17xbf16>, vector<17x32xbf16>, vector<9x32xf32> -> vector<9x32xf32>
    %34 = vector.extract_strided_slice %12 {offsets = [0, 0], sizes = [9, 1], strides = [1, 1]} : vector<26x1xf32> to vector<9x1xf32>
    %35 = vector.broadcast %34 : vector<9x1xf32> to vector<9x32xf32>
    %36 = arith.addf %33, %35 : vector<9x32xf32>
    %c0_20 = arith.constant 0 : index
    %c0_21 = arith.constant 0 : index
    %37 = vector.load %arg7[%c0_20, %c0_21] : memref<17x9xbf16, #tpu.memory_space<vmem>>, vector<17x9xbf16>
    %38 = arith.truncf %17 : vector<9x32xf32> to vector<9x32xbf16>
    %cst_22 = arith.constant dense<0.000000e+00> : vector<17x32xf32>
    %39 = tpu.matmul %37, %38, %cst_22 {dimension_numbers = #tpu.dot_dimension_numbers<[1], [0], [0], [1], [0, 0, 1, 1], [], []>} : vector<17x9xbf16>, vector<9x32xbf16>, vector<17x32xf32> -> vector<17x32xf32>
    %40 = vector.extract_strided_slice %12 {offsets = [9, 0], sizes = [17, 1], strides = [1, 1]} : vector<26x1xf32> to vector<17x1xf32>
    %41 = vector.broadcast %40 : vector<17x1xf32> to vector<17x32xf32>
    %42 = arith.addf %39, %41 : vector<17x32xf32>
    %43 = arith.subf %24, %15 : vector<9x32xf32>
    %44 = arith.subf %30, %16 : vector<17x32xf32>
    %45 = arith.subf %36, %17 : vector<9x32xf32>
    %46 = arith.subf %42, %18 : vector<17x32xf32>
    %47 = arith.mulf %43, %43 : vector<9x32xf32>
    %48 = vector.shape_cast %47 : vector<9x32xf32> to vector<1x9x32xf32>
    %cst_23 = arith.constant dense<0.000000e+00> : vector<1xf32>
    %49 = vector.multi_reduction <add>, %48, %cst_23 [1, 2] : vector<1x9x32xf32> to vector<1xf32>
    %50 = vector.shape_cast %49 : vector<1xf32> to vector<1x1x1xf32>
    %51 = vector.extract %50[0, 0, 0] : f32 from vector<1x1x1xf32>
    %52 = vector.broadcast %51 : f32 to vector<1x1xf32>
    %53 = arith.addf %13, %52 : vector<1x1xf32>
    %54 = arith.mulf %44, %44 : vector<17x32xf32>
    %55 = vector.shape_cast %54 : vector<17x32xf32> to vector<1x17x32xf32>
    %cst_24 = arith.constant dense<0.000000e+00> : vector<1xf32>
    %56 = vector.multi_reduction <add>, %55, %cst_24 [1, 2] : vector<1x17x32xf32> to vector<1xf32>
    %57 = vector.shape_cast %56 : vector<1xf32> to vector<1x1x1xf32>
    %58 = vector.extract %57[0, 0, 0] : f32 from vector<1x1x1xf32>
    %59 = vector.broadcast %58 : f32 to vector<1x1xf32>
    %60 = arith.addf %53, %59 : vector<1x1xf32>
    %61 = arith.mulf %45, %45 : vector<9x32xf32>
    %62 = vector.shape_cast %61 : vector<9x32xf32> to vector<1x9x32xf32>
    %cst_25 = arith.constant dense<0.000000e+00> : vector<1xf32>
    %63 = vector.multi_reduction <add>, %62, %cst_25 [1, 2] : vector<1x9x32xf32> to vector<1xf32>
    %64 = vector.shape_cast %63 : vector<1xf32> to vector<1x1x1xf32>
    %65 = vector.extract %64[0, 0, 0] : f32 from vector<1x1x1xf32>
    %66 = vector.broadcast %65 : f32 to vector<1x1xf32>
    %67 = arith.addf %14, %66 : vector<1x1xf32>
    %68 = arith.mulf %46, %46 : vector<17x32xf32>
    %69 = vector.shape_cast %68 : vector<17x32xf32> to vector<1x17x32xf32>
    %cst_26 = arith.constant dense<0.000000e+00> : vector<1xf32>
    %70 = vector.multi_reduction <add>, %69, %cst_26 [1, 2] : vector<1x17x32xf32> to vector<1xf32>
    %71 = vector.shape_cast %70 : vector<1xf32> to vector<1x1x1xf32>
    %72 = vector.extract %71[0, 0, 0] : f32 from vector<1x1x1xf32>
    %73 = vector.broadcast %72 : f32 to vector<1x1xf32>
    %74 = arith.addf %67, %73 : vector<1x1xf32>
    %75 = tpu.concatenate %24, %30 in 0 : vector<9x32xf32>, vector<17x32xf32> -> vector<26x32xf32>
    %76 = arith.truncf %75 : vector<26x32xf32> to vector<26x32xbf16>
    %77 = tpu.concatenate %36, %42 in 0 : vector<9x32xf32>, vector<17x32xf32> -> vector<26x32xf32>
    %78 = arith.truncf %77 : vector<26x32xf32> to vector<26x32xbf16>
    %79 = arith.truncf %8 : vector<26x32xf32> to vector<26x32xbf16>
    %80 = vector.extract_strided_slice %79 {offsets = [0, 0], sizes = [26, 8], strides = [1, 1]} : vector<26x32xbf16> to vector<26x8xbf16>
    %81 = vector.extract_strided_slice %76 {offsets = [0, 0], sizes = [26, 8], strides = [1, 1]} : vector<26x32xbf16> to vector<26x8xbf16>
    %82 = vector.extract_strided_slice %78 {offsets = [0, 0], sizes = [26, 8], strides = [1, 1]} : vector<26x32xbf16> to vector<26x8xbf16>
    %cst_27 = arith.constant dense<0.000000e+00> : vector<26x26xf32>
    %83 = tpu.matmul %80, %81, %cst_27 {dimension_numbers = #tpu.dot_dimension_numbers<[1], [1], [0], [0], [0, 0, 1, 0], [], []>} : vector<26x8xbf16>, vector<26x8xbf16>, vector<26x26xf32> -> vector<26x26xf32>
    %cst_28 = arith.constant dense<0xFF800000> : vector<26xf32>
    %84 = vector.multi_reduction <maximumf>, %83, %cst_28 [1] : vector<26x26xf32> to vector<26xf32>
    %85 = vector.shape_cast %84 : vector<26xf32> to vector<26x1xf32>
    %86 = vector.broadcast %85 : vector<26x1xf32> to vector<26x26xf32>
    %87 = arith.subf %83, %86 : vector<26x26xf32>
    %88 = math.exp %87 : vector<26x26xf32>
    %cst_29 = arith.constant dense<0.000000e+00> : vector<26xf32>
    %89 = vector.multi_reduction <add>, %88, %cst_29 [1] : vector<26x26xf32> to vector<26xf32>
    %90 = vector.shape_cast %89 : vector<26xf32> to vector<26x1xf32>
    %91 = tpu.reciprocal %90 {approx = true} : vector<26x1xf32> -> vector<26x1xf32>
    %92 = vector.broadcast %91 : vector<26x1xf32> to vector<26x26xf32>
    %93 = arith.mulf %88, %92 : vector<26x26xf32>
    %94 = arith.truncf %93 : vector<26x26xf32> to vector<26x26xbf16>
    %cst_30 = arith.constant dense<0.000000e+00> : vector<26x8xf32>
    %95 = tpu.matmul %94, %82, %cst_30 {dimension_numbers = #tpu.dot_dimension_numbers<[1], [0], [0], [1], [0, 0, 1, 1], [], []>} : vector<26x26xbf16>, vector<26x8xbf16>, vector<26x8xf32> -> vector<26x8xf32>
    %c0_31 = arith.constant 0 : index
    %c0_32 = arith.constant 0 : index
    %c0_33 = arith.constant 0 : index
    %96 = vector.load %arg9[%c0_31, %c0_32, %c0_33] : memref<1x26x32xf32, #tpu.memory_space<vmem>>, vector<1x26x8xf32>
    %97 = vector.shape_cast %96 : vector<1x26x8xf32> to vector<26x8xf32>
    %98 = vector.shape_cast %95 : vector<26x8xf32> to vector<1x26x8xf32>
    tpu.vector_store %arg9[%c0_31, %c0_32, %c0_33], %98 {strides = array<i32>} : memref<1x26x32xf32, #tpu.memory_space<vmem>>, vector<1x26x8xf32>,
    %99 = vector.extract_strided_slice %79 {offsets = [0, 8], sizes = [26, 8], strides = [1, 1]} : vector<26x32xbf16> to vector<26x8xbf16>
    %100 = vector.extract_strided_slice %76 {offsets = [0, 8], sizes = [26, 8], strides = [1, 1]} : vector<26x32xbf16> to vector<26x8xbf16>
    %101 = vector.extract_strided_slice %78 {offsets = [0, 8], sizes = [26, 8], strides = [1, 1]} : vector<26x32xbf16> to vector<26x8xbf16>
    %cst_34 = arith.constant dense<0.000000e+00> : vector<26x26xf32>
    %102 = tpu.matmul %99, %100, %cst_34 {dimension_numbers = #tpu.dot_dimension_numbers<[1], [1], [0], [0], [0, 0, 1, 0], [], []>} : vector<26x8xbf16>, vector<26x8xbf16>, vector<26x26xf32> -> vector<26x26xf32>
    %cst_35 = arith.constant dense<0xFF800000> : vector<26xf32>
    %103 = vector.multi_reduction <maximumf>, %102, %cst_35 [1] : vector<26x26xf32> to vector<26xf32>
    %104 = vector.shape_cast %103 : vector<26xf32> to vector<26x1xf32>
    %105 = vector.broadcast %104 : vector<26x1xf32> to vector<26x26xf32>
    %106 = arith.subf %102, %105 : vector<26x26xf32>
    %107 = math.exp %106 : vector<26x26xf32>
    %cst_36 = arith.constant dense<0.000000e+00> : vector<26xf32>
    %108 = vector.multi_reduction <add>, %107, %cst_36 [1] : vector<26x26xf32> to vector<26xf32>
    %109 = vector.shape_cast %108 : vector<26xf32> to vector<26x1xf32>
    %110 = tpu.reciprocal %109 {approx = true} : vector<26x1xf32> -> vector<26x1xf32>
    %111 = vector.broadcast %110 : vector<26x1xf32> to vector<26x26xf32>
    %112 = arith.mulf %107, %111 : vector<26x26xf32>
    %113 = arith.truncf %112 : vector<26x26xf32> to vector<26x26xbf16>
    %cst_37 = arith.constant dense<0.000000e+00> : vector<26x8xf32>
    %114 = tpu.matmul %113, %101, %cst_37 {dimension_numbers = #tpu.dot_dimension_numbers<[1], [0], [0], [1], [0, 0, 1, 1], [], []>} : vector<26x26xbf16>, vector<26x8xbf16>, vector<26x8xf32> -> vector<26x8xf32>
    %c0_38 = arith.constant 0 : index
    %c0_39 = arith.constant 0 : index
    %c8 = arith.constant 8 : index
    %115 = vector.load %arg9[%c0_38, %c0_39, %c8] : memref<1x26x32xf32, #tpu.memory_space<vmem>>, vector<1x26x8xf32>
    %116 = vector.shape_cast %115 : vector<1x26x8xf32> to vector<26x8xf32>
    %117 = vector.shape_cast %114 : vector<26x8xf32> to vector<1x26x8xf32>
    tpu.vector_store %arg9[%c0_38, %c0_39, %c8], %117 {strides = array<i32>} : memref<1x26x32xf32, #tpu.memory_space<vmem>>, vector<1x26x8xf32>,
    %118 = vector.extract_strided_slice %79 {offsets = [0, 16], sizes = [26, 8], strides = [1, 1]} : vector<26x32xbf16> to vector<26x8xbf16>
    %119 = vector.extract_strided_slice %76 {offsets = [0, 16], sizes = [26, 8], strides = [1, 1]} : vector<26x32xbf16> to vector<26x8xbf16>
    %120 = vector.extract_strided_slice %78 {offsets = [0, 16], sizes = [26, 8], strides = [1, 1]} : vector<26x32xbf16> to vector<26x8xbf16>
    %cst_40 = arith.constant dense<0.000000e+00> : vector<26x26xf32>
    %121 = tpu.matmul %118, %119, %cst_40 {dimension_numbers = #tpu.dot_dimension_numbers<[1], [1], [0], [0], [0, 0, 1, 0], [], []>} : vector<26x8xbf16>, vector<26x8xbf16>, vector<26x26xf32> -> vector<26x26xf32>
    %cst_41 = arith.constant dense<0xFF800000> : vector<26xf32>
    %122 = vector.multi_reduction <maximumf>, %121, %cst_41 [1] : vector<26x26xf32> to vector<26xf32>
    %123 = vector.shape_cast %122 : vector<26xf32> to vector<26x1xf32>
    %124 = vector.broadcast %123 : vector<26x1xf32> to vector<26x26xf32>
    %125 = arith.subf %121, %124 : vector<26x26xf32>
    %126 = math.exp %125 : vector<26x26xf32>
    %cst_42 = arith.constant dense<0.000000e+00> : vector<26xf32>
    %127 = vector.multi_reduction <add>, %126, %cst_42 [1] : vector<26x26xf32> to vector<26xf32>
    %128 = vector.shape_cast %127 : vector<26xf32> to vector<26x1xf32>
    %129 = tpu.reciprocal %128 {approx = true} : vector<26x1xf32> -> vector<26x1xf32>
    %130 = vector.broadcast %129 : vector<26x1xf32> to vector<26x26xf32>
    %131 = arith.mulf %126, %130 : vector<26x26xf32>
    %132 = arith.truncf %131 : vector<26x26xf32> to vector<26x26xbf16>
    %cst_43 = arith.constant dense<0.000000e+00> : vector<26x8xf32>
    %133 = tpu.matmul %132, %120, %cst_43 {dimension_numbers = #tpu.dot_dimension_numbers<[1], [0], [0], [1], [0, 0, 1, 1], [], []>} : vector<26x26xbf16>, vector<26x8xbf16>, vector<26x8xf32> -> vector<26x8xf32>
    %c0_44 = arith.constant 0 : index
    %c0_45 = arith.constant 0 : index
    %c16 = arith.constant 16 : index
    %134 = vector.load %arg9[%c0_44, %c0_45, %c16] : memref<1x26x32xf32, #tpu.memory_space<vmem>>, vector<1x26x8xf32>
    %135 = vector.shape_cast %134 : vector<1x26x8xf32> to vector<26x8xf32>
    %136 = vector.shape_cast %133 : vector<26x8xf32> to vector<1x26x8xf32>
    tpu.vector_store %arg9[%c0_44, %c0_45, %c16], %136 {strides = array<i32>} : memref<1x26x32xf32, #tpu.memory_space<vmem>>, vector<1x26x8xf32>,
    %137 = vector.extract_strided_slice %79 {offsets = [0, 24], sizes = [26, 8], strides = [1, 1]} : vector<26x32xbf16> to vector<26x8xbf16>
    %138 = vector.extract_strided_slice %76 {offsets = [0, 24], sizes = [26, 8], strides = [1, 1]} : vector<26x32xbf16> to vector<26x8xbf16>
    %139 = vector.extract_strided_slice %78 {offsets = [0, 24], sizes = [26, 8], strides = [1, 1]} : vector<26x32xbf16> to vector<26x8xbf16>
    %cst_46 = arith.constant dense<0.000000e+00> : vector<26x26xf32>
    %140 = tpu.matmul %137, %138, %cst_46 {dimension_numbers = #tpu.dot_dimension_numbers<[1], [1], [0], [0], [0, 0, 1, 0], [], []>} : vector<26x8xbf16>, vector<26x8xbf16>, vector<26x26xf32> -> vector<26x26xf32>
    %cst_47 = arith.constant dense<0xFF800000> : vector<26xf32>
    %141 = vector.multi_reduction <maximumf>, %140, %cst_47 [1] : vector<26x26xf32> to vector<26xf32>
    %142 = vector.shape_cast %141 : vector<26xf32> to vector<26x1xf32>
    %143 = vector.broadcast %142 : vector<26x1xf32> to vector<26x26xf32>
    %144 = arith.subf %140, %143 : vector<26x26xf32>
    %145 = math.exp %144 : vector<26x26xf32>
    %cst_48 = arith.constant dense<0.000000e+00> : vector<26xf32>
    %146 = vector.multi_reduction <add>, %145, %cst_48 [1] : vector<26x26xf32> to vector<26xf32>
    %147 = vector.shape_cast %146 : vector<26xf32> to vector<26x1xf32>
    %148 = tpu.reciprocal %147 {approx = true} : vector<26x1xf32> -> vector<26x1xf32>
    %149 = vector.broadcast %148 : vector<26x1xf32> to vector<26x26xf32>
    %150 = arith.mulf %145, %149 : vector<26x26xf32>
    %151 = arith.truncf %150 : vector<26x26xf32> to vector<26x26xbf16>
    %cst_49 = arith.constant dense<0.000000e+00> : vector<26x8xf32>
    %152 = tpu.matmul %151, %139, %cst_49 {dimension_numbers = #tpu.dot_dimension_numbers<[1], [0], [0], [1], [0, 0, 1, 1], [], []>} : vector<26x26xbf16>, vector<26x8xbf16>, vector<26x8xf32> -> vector<26x8xf32>
    %c0_50 = arith.constant 0 : index
    %c0_51 = arith.constant 0 : index
    %c24 = arith.constant 24 : index
    %153 = vector.load %arg9[%c0_50, %c0_51, %c24] : memref<1x26x32xf32, #tpu.memory_space<vmem>>, vector<1x26x8xf32>
    %154 = vector.shape_cast %153 : vector<1x26x8xf32> to vector<26x8xf32>
    %155 = vector.shape_cast %152 : vector<26x8xf32> to vector<1x26x8xf32>
    tpu.vector_store %arg9[%c0_50, %c0_51, %c24], %155 {strides = array<i32>} : memref<1x26x32xf32, #tpu.memory_space<vmem>>, vector<1x26x8xf32>,
    %c0_52 = arith.constant 0 : index
    %c0_53 = arith.constant 0 : index
    %c0_54 = arith.constant 0 : index
    %156 = vector.load %arg10[%c0_52, %c0_53, %c0_54] : memref<1x1x1xf32, #tpu.memory_space<vmem>>, vector<1x1x1xf32>
    %157 = vector.shape_cast %156 : vector<1x1x1xf32> to vector<1x1xf32>
    %158 = vector.shape_cast %60 : vector<1x1xf32> to vector<1x1x1xf32>
    tpu.vector_store %arg10[%c0_52, %c0_53, %c0_54], %158 {strides = array<i32>} : memref<1x1x1xf32, #tpu.memory_space<vmem>>, vector<1x1x1xf32>,
    %c0_55 = arith.constant 0 : index
    %c0_56 = arith.constant 0 : index
    %c0_57 = arith.constant 0 : index
    %159 = vector.load %arg11[%c0_55, %c0_56, %c0_57] : memref<1x1x1xf32, #tpu.memory_space<vmem>>, vector<1x1x1xf32>
    %160 = vector.shape_cast %159 : vector<1x1x1xf32> to vector<1x1xf32>
    %161 = vector.shape_cast %74 : vector<1x1xf32> to vector<1x1x1xf32>
    tpu.vector_store %arg11[%c0_55, %c0_56, %c0_57], %161 {strides = array<i32>} : memref<1x1x1xf32, #tpu.memory_space<vmem>>, vector<1x1x1xf32>,
    return
  }
  func.func @transform_0(%arg0: i32) -> (i32, i32, i32) {
    %c0_i32 = arith.constant 0 : i32
    %c0_i32_0 = arith.constant 0 : i32
    %c0_i32_1 = arith.constant 0 : i32
    return %arg0, %c0_i32, %c0_i32_0 : i32, i32, i32
  }
  func.func @transform_1(%arg0: i32) -> (i32, i32) {
    %c0_i32 = arith.constant 0 : i32
    %c0_i32_0 = arith.constant 0 : i32
    %c0_i32_1 = arith.constant 0 : i32
    return %c0_i32, %c0_i32_0 : i32, i32
  }
  func.func @transform_2(%arg0: i32) -> (i32, i32) {
    %c0_i32 = arith.constant 0 : i32
    %c0_i32_0 = arith.constant 0 : i32
    %c0_i32_1 = arith.constant 0 : i32
    return %c0_i32, %c0_i32_0 : i32, i32
  }
  func.func @transform_3(%arg0: i32) -> (i32, i32) {
    %c0_i32 = arith.constant 0 : i32
    %c0_i32_0 = arith.constant 0 : i32
    %c0_i32_1 = arith.constant 0 : i32
    return %c0_i32, %c0_i32_0 : i32, i32
  }
  func.func @transform_4(%arg0: i32) -> (i32, i32) {
    %c0_i32 = arith.constant 0 : i32
    %c0_i32_0 = arith.constant 0 : i32
    %c0_i32_1 = arith.constant 0 : i32
    return %c0_i32, %c0_i32_0 : i32, i32
  }
  func.func @transform_5(%arg0: i32) -> (i32, i32) {
    %c0_i32 = arith.constant 0 : i32
    %c0_i32_0 = arith.constant 0 : i32
    %c0_i32_1 = arith.constant 0 : i32
    return %c0_i32, %c0_i32_0 : i32, i32
  }
  func.func @transform_6(%arg0: i32) -> (i32, i32) {
    %c0_i32 = arith.constant 0 : i32
    %c0_i32_0 = arith.constant 0 : i32
    %c0_i32_1 = arith.constant 0 : i32
    return %c0_i32, %c0_i32_0 : i32, i32
  }
  func.func @transform_7(%arg0: i32) -> (i32, i32) {
    %c0_i32 = arith.constant 0 : i32
    %c0_i32_0 = arith.constant 0 : i32
    %c0_i32_1 = arith.constant 0 : i32
    return %c0_i32, %c0_i32_0 : i32, i32
  }
  func.func @transform_8(%arg0: i32) -> (i32, i32, i32) {
    %c0_i32 = arith.constant 0 : i32
    %c0_i32_0 = arith.constant 0 : i32
    %c0_i32_1 = arith.constant 0 : i32
    return %arg0, %c0_i32, %c0_i32_0 : i32, i32, i32
  }
  func.func @transform_9(%arg0: i32) -> (i32, i32, i32) {
    %c0_i32 = arith.constant 0 : i32
    %c0_i32_0 = arith.constant 0 : i32
    %c0_i32_1 = arith.constant 0 : i32
    return %arg0, %c0_i32, %c0_i32_0 : i32, i32, i32
  }
  func.func @transform_10(%arg0: i32) -> (i32, i32, i32) {
    %c0_i32 = arith.constant 0 : i32
    %c0_i32_0 = arith.constant 0 : i32
    %c0_i32_1 = arith.constant 0 : i32
    return %arg0, %c0_i32, %c0_i32_0 : i32, i32, i32
  }
}

</mosaic_0001>

<bundles_post_ra>
// kernel: tpu_custom_call.1
= control target key start
LH: loop header
LB: loop body
LE: loop exit
PB: predicated region body
PF: predicated region fallthrough
CT: control target
= control target key end

     0   :  { %s2224_s13 = smov 0   ;;  %s2625_s0 = inlined_call_operand.vmem [shape: f32[2,26,32], index: 0, kind: input, shape index: {}]   ;;  %s2626_s1 = inlined_call_operand.vmem [shape: bf16[32,96], index: 1, kind: input, shape index: {}]   ;;  %s2627_s2 = inlined_call_operand.vmem [shape: f32[1,96], index: 2, kind: input, shape index: {}]   ;;  %s2628_s3 = inlined_call_operand.vmem [shape: bf16[9,17], index: 3, kind: input, shape index: {}]   ;;  %s2629_s4 = inlined_call_operand.vmem [shape: bf16[17,9], index: 4, kind: input, shape index: {}]   ;;  %s2630_s5 = inlined_call_operand.vmem [shape: bf16[9,17], index: 5, kind: input, shape index: {}]   ;;  %s2631_s6 = inlined_call_operand.vmem [shape: bf16[17,9], index: 6, kind: input, shape index: {}]   ;;  %s2632_s7 = inlined_call_operand.vmem [shape: f32[26,2], index: 7, kind: input, shape index: {}]   ;;  %s2633_s8 = inlined_call_operand.vmem [shape: f32[2,26,32], index: 8, kind: output, shape index: {0}]   ;;  %s2634_s9 = inlined_call_operand.vmem [shape: f32[2,1,1], index: 9, kind: output, shape index: {1}]   ;;  %s2635_s10 = inlined_call_operand.vmem [shape: f32[2,1,1], index: 10, kind: output, shape index: {2}]  }
   0x1 LB: > { %s1837_s14 = sadd.s32 4294967295, %s2154_s13   ;;  %p1841_p0 = scmp.ge.s32.totalorder %s2154_s13, 1  ;;  %s2154_s13 = sphi %s2224_s13, %s21_s13  }
   0x2   : > { %p317_p1 = scmp.lt.s32.totalorder %s2154_s13, 3 }
   0x4   : > { %p318_p2 = pnand %p1841_p0, %p317_p1 }
   0x5   : > { %v2076_v0 = vld [vmem:[%s2626_s1] sm:$0xff] (!%p318_p2)   ;;  %p361_p3 = scmp.lt.s32.totalorder (!%p318_p2), %s1837_s14, 1  ;;  %v2077_v1 = vld [vmem:[%s2626_s1 + $0x8] sm:$0xff] (!%p318_p2)   ;;  %vm407_vm0 = vcmask (!%p318_p2), 261120   ;;  %v2156_v8 = vmov (!%p318_p2), 0   ;;  %v2157_v9 = vmov (!%p318_p2), 0.0  }
   0x6   : > { %321 = sbr.rel (%p318_p2) target bundleno = 3155 (0xc53), region = 52  ;;  %1931 = vmatprep.subr.bf16.mxu0 (!%p318_p2), %v2076_v0  ;;  %2072 = vset.pattern.permute.xlu1 (!%p318_p2), %v2156_v8  ;;  %v1846_v10 = vld [vmem:[%s2627_s2] ss:$0 sm:$0xff] (!%p318_p2)  ;;  %vm580_vm1 = vcmask (!%p318_p2), 1046528   ;;  %vm2158_vm2 = vmmov (!%p318_p2), 0   ;;  %s2159_s25 = smov (!%p318_p2), 96  }
   0x7   : > { %1932 = vmatpush3.bf16.msra.mxu0 (!%p318_p2), %v2076_v0  ;;  %2073 = vset.pattern.permute.xlu0 (!%p318_p2), %v2156_v8  ;;  %v2079_v27 = vld [vmem:[%s2629_s4] sm:$0xff] (!%p318_p2)   ;;  %vm589_vm3 = vcmask (!%p318_p2), 72704   ;;  %v2279_v28 = vld [vmem:[%s2632_s7 + $0x8] sm:$0xff] (!%p318_p2)  ;;  %vm486_vm4 = vsmask.f32 (!%p318_p2), 7424  ;;  %v2301_v37 = vld [vmem:[%s2632_s7 + $0x10] sm:$0xff] (!%p318_p2) }
   0x8   : > { %1933 = vmatprep.subr.bf16.mxu0 (!%p318_p2), %v2077_v1  ;;  %1939 = vmatprep.subr.bf16.mxu1 (!%p318_p2), %v2157_v9  ;;  %v2286_v34 = vld [vmem:[%s2632_s7] sm:$0xff] (!%p318_p2)  ;;  %s2160_s16 = smov (!%p318_p2), 64   ;;  %v2311_v38 = vld [vmem:[%s2632_s7 + $0x18] sm:$0x3] (!%p318_p2)  ;;  %vm596_vm5 = vcmask (!%p318_p2), 1043456   ;;  %vm510_vm6 = vcmask (!%p318_p2), 1040384  }
   0x9   : > { %1943 = vmatprep.mubr.msk.bf16.mxu1 (!%p318_p2), %vm2158_vm2, %v2157_v9  ;;  %vm597_vm7 = vcmask (!%p318_p2), 1044480   ;;  %v2161_v39 = vmov (!%p318_p2), 65535   ;;  %v512_v41 = vsel (!%p318_p2), %vm510_vm6, 65535, %v2156_v8  ;;  %v2078_v47 = vld [vmem:[%s2628_s3] sm:$0x1f] (!%p318_p2)   ;;  %vm506_vm8 = vcmask (!%p318_p2), 138240  }
   0xa   : > { %v598_v40 = vsel (!%p318_p2), %vm596_vm5, 4294967295, %v2161_v39  ;;  %v2080_v49 = vld [vmem:[%s2629_s4 + $0x8] ss:$0 sps:$4 sm:$0x11] (!%p318_p2)   ;;  %v2081_v56 = vld [vmem:[%s2630_s5] sm:$0x1f] (!%p318_p2)  }
   0xb   : > { %1934 = vmatpush3.bf16.msra.mxu0 (!%p318_p2), %v2077_v1  ;;  %v599_v44 = vsel (!%p318_p2), %vm597_vm7, %v598_v40, 0  ;;  %vm951_vm9 = vcmask (!%p318_p2), 64512   ;;  %v2082_v59 = vld [vmem:[%s2631_s6] sm:$0xff] (!%p318_p2)   ;;  %v2083_v60 = vld [vmem:[%s2631_s6 + $0x8] ss:$0 sps:$4 sm:$0x11] (!%p318_p2)  }
   0xc   : > { %vm1013_vm10 = vcmask (!%p318_p2), 211968   ;;  %vm1023_vm11 = vcmask (!%p318_p2), 205824   ;;  %s2163_s11 = smov (!%p318_p2), 120   ;;  %vm1122_vm12 = vcmask (!%p318_p2), 58368   ;;  %s2165_s18 = smov (!%p318_p2), 104   ;;  %vm854_vm13 = vcmask (!%p318_p2), 253952  }
   0xd   : > { %s2637_s14 = smov (!%p361_p3, %s1837_s14), 1  ;;  %vm1323_vm14 = vcmask 130112   ;;  %vm1327_vm15 = vcmask 123968   ;;  %s2168_s26 = smov 24  }
   0xe   : > { %s1881_s19 = sshll.u32 %s2637_s14, 5  ;;  %s373_s24 = scalar_lea.vmem %s2634_s9, %s2637_s14 }
   0xf   : > { %s365_s22 = scalar_lea.vmem %s2625_s0, %s1881_s19  ;;  %s2446_s17 = scalar_lea.vmem %s2633_s8, %s1881_s19 }
  0x10   : > { %v378_v2 = vld [vmem:[%s365_s22] sm:$0xff]  ;;  %v379_v3 = vld [vmem:[%s365_s22 + $0x8] sm:$0xff]  ;;  %v380_v4 = vld [vmem:[%s365_s22 + $0x10] sm:$0xff]  ;;  %s2164_s19 = smov 112  }
  0x11   : > { %v382_v5 = vpack.c.bf16 %v379_v3, %v378_v2  ;;  %v381_v6 = vld [vmem:[%s365_s22 + $0x18] sm:$0x3] }
  0x12   : > { %v383_v7 = vpack.c.bf16 %v381_v6, %v380_v4 }
  0x13   : > { %1935 = vmatprep.mubr.msk.bf16.mxu0 %vm407_vm0, %v382_v5 }
  0x14   : > { %1936 = vmatmul.mubr.msk.bf16.vlgmr.msra.gmra.mrb[0].mxu0 %vm407_vm0, %v383_v7 }
  0x15   : > { %1949 = vmatprep.mubr.msk.bf16.mxu0 %vm589_vm3, %v2079_v27 }
  0xe7   : > { %v1937_v11 = vpop.f32.mrb[0].mxu0 }
  0xe8   : > { %v2252_v12 = vadd.f32 %v1937_v11, %v1846_v10  ;;  %v448_v13 = vpop.f32.mrb[1].mxu0 }
  0xe9   : > { %v1938_v14 = vpop.f32.mrb[2].mxu0  ;;  %v2288_v35 = vadd.f32 %v1846_v10, %v448_v13 }
  0xea   : > { %v460_v15 = vadd.f32 %v1938_v14, %v1846_v10  ;;  %v451_v16 = vpop.f32.mrb[3].mxu0  ;;  %v815_v18 = vrot.slane %v2252_v12, 1 }
  0xeb   : > { %v2254_v17 = vadd.f32 %v1846_v10, %v451_v16 }
  0xec   : > { %v2257_v19 = vrot.slane %v460_v15, 1  ;;  %v2260_v20 = vpack.c.bf16 %v460_v15, %v2252_v12  ;;  %v470_v21 = vpack.c.bf16 %v460_v15, %v460_v15 }
  0xed   : > { %v469_v22 = vpack.c.bf16 %v2252_v12, %v2254_v17  ;;  %v2293_v36 = vpack.c.bf16 %v2254_v17, %v2288_v35 }
  0xee   : > { %v499_v23 = vshrl.u32 %v470_v21, 16  ;;  %v2270_v24 = vsel %vm580_vm1, %v815_v18, %v2257_v19  ;;  %v495_v26 = vshll.u32 %v470_v21, 16 }
  0xef   : > { %v490_v25 = vshll.u32 %v469_v22, 16  ;;  %v488_v29 = vshrl.u32 %v469_v22, 16 }
  0xf0   : > { %503 = vrot.lane.b32.xlu1 %v499_v23, %s2159_s25  ;;  %v497_v32 = vrot.slane %v495_v26, 1 }
  0xf1   : > { %v492_v30 = vrot.slane %v490_v25, 1 }
  0xf3   : > { %v493_v31 = vor.u32 %v492_v30, %v488_v29 }
  0xf4   : > { %478 = vperm.xlu1 %2072, %v2279_v28  }
  0xf5   : > { %v498_v33 = vsel %vm486_vm4, %v493_v31, %v497_v32  ;;  %vm1727_vm4 = vcmask 255168  }
  0xf6   : > { %501 = vrot.lane.b32.xlu0 %v498_v33, %s2159_s25 }
  0xf8   : > { %473 = vperm.xlu1 %2072, %v2286_v34  }
  0xfa   : > { %578 = vrot.lane.b32.xlu0 %v2293_v36, %s2159_s25 }
  0xfc   : > { %666 = vrot.lane.b32.xlu1 %v498_v33, %s2160_s16 }
  0xfe   : > { %563 = vperm.xlu0 %2073, %v2301_v37  }
 0x100   : > { %567 = vperm.xlu1 %2072, %v2311_v38  }
 0x102   : > { %668 = vrot.lane.b32.xlu0 %v499_v23, %s2160_s16 }
 0x106   : > { %735 = vrot.lane.b32.xlu0 %v2293_v36, %s2160_s16 }
 0x162   : > { %v504_v42 = vpop.permute.xlu1 %503 }
 0x163   : > { %v514_v45 = vand.u32 %v512_v41, %v504_v42  ;;  %v2162_v42 = vmov 1  }
 0x164   : > { %2075 = vset.pattern.permute.xlu1 %v2162_v42  ;;  %2074 = vset.pattern.permute.xlu0 %v2162_v42 }
 0x168   : > { %v502_v43 = vpop.permute.xlu0 %501 }
 0x169   : > { %1940 = vmatpush3.bf16.msra.mxu1 %v502_v43 }
 0x16a   : > { %1941 = vmatprep.subr.bf16.mxu1 %v2157_v9 }
 0x16c   : > { %v579_v46 = vpop.permute.xlu0 %578 }
 0x16d   : > { %v601_v48 = vand.u32 %v599_v44, %v579_v46  ;;  %1942 = vmatpush3.bf16.msra.mxu1 %v514_v45 }
 0x16e   : > { %1953 = vmatprep.subr.bf16.mxu1 %v2157_v9 }
 0x16f   : > { %1947 = vmatprep.subr.bf16.mxu0 %v601_v48 }
 0x170   : > { %1944 = vmatmul.mubr.msk.bf16.vlgmr.msra.gmra.mrb[0].mxu1 %vm506_vm8, %v2078_v47  ;;  %1948 = vmatpush3.bf16.msra.mxu0 %v601_v48 }
 0x171   : > { %1957 = vmatprep.mubr.msk.bf16.mxu1 %vm2158_vm2, %v2157_v9  ;;  %vm1729_vm2 = vcmask 0  }
 0x173   : > { %v479_v50 = vpop.permute.xlu1 %478  ;;  %1950 = vmatmul.mubr.msk.bf16.vlgmr.msra.gmra.mrb[4].mxu0 %vm589_vm3, %v2080_v49 }
 0x174   : > { %1963 = vmatprep.mubr.msk.bf16.mxu0 %vm589_vm3, %v2082_v59  ;;  %v581_v62 = vrot.slane %v479_v50, 1 }
 0x177   : > { %v474_v51 = vpop.permute.xlu1 %473 }
 0x17b   : > { %v667_v52 = vpop.permute.xlu1 %666 }
 0x17c   : > { %1954 = vmatpush3.bf16.msra.mxu1 %v667_v52 }
 0x17d   : > { %v564_v53 = vpop.permute.xlu0 %563  ;;  %1955 = vmatprep.subr.bf16.mxu1 %v2157_v9 }
 0x17e   : > { %v582_v63 = vrot.slane %v564_v53, 1 }
 0x17f   : > { %v568_v61 = vpop.permute.xlu1 %567 }
 0x180   : > { %v584_v2 = vrot.slane %v568_v61, 1  ;;  %v583_v6 = vsel %vm580_vm1, %v581_v62, %v582_v63 }
 0x181   : > { %v669_v54 = vpop.permute.xlu0 %668 }
 0x182   : > { %v675_v55 = vand.u32 %v669_v54, %v512_v41  ;;  %v585_v11 = vsel %vm580_vm1, %v582_v63, %v584_v2 }
 0x184   : > { %1956 = vmatpush3.bf16.msra.mxu1 %v675_v55 }
 0x185   : > { %v736_v57 = vpop.permute.xlu0 %735 }
 0x186   : > { %v752_v58 = vand.u32 %v736_v57, %v599_v44 }
 0x187   : > { %1958 = vmatmul.mubr.msk.bf16.vlgmr.msra.gmra.mrb[4].mxu1 %vm506_vm8, %v2081_v56 }
 0x188   : > { %1961 = vmatprep.subr.bf16.mxu0 %v752_v58  ;;  %1971 = vmatprep.mubr.msk.bf16.mxu1 %vm951_vm9, %v2293_v36 }
 0x189   : > { %1962 = vmatpush3.bf16.msra.mxu0 %v752_v58 }
 0x18c   : > { %1964 = vmatmul.mubr.msk.bf16.vlgmr.msra.gmra.mrb[8].mxu0 %vm589_vm3, %v2083_v60  ;;  %vm1723_vm3 = vcmask 261312  }
 0x243   : > { %v550_v0 = vpop.f32.mrb[0].mxu1 }
 0x244   : > { %v1945_v1 = vpop.f32.mrb[1].mxu1  ;;  %v2354_v21 = vadd.f32 %v550_v0, %v474_v51 }
 0x245   : > { %v553_v3 = vpop.f32.mrb[2].mxu1 }
 0x246   : > { %v1951_v4 = vpop.f32.mrb[4].mxu0  ;;  %v1946_v5 = vpop.f32.mrb[3].mxu1  ;;  %v2349_v14 = vadd.f32 %v553_v3, %v479_v50 }
 0x247   : > { %v637_v7 = vpop.f32.mrb[5].mxu0  ;;  %v2344_v8 = vadd.f32 %v1951_v4, %v584_v2 }
 0x248   : > { %v2346_v9 = vadd.f32 %v637_v7, %v583_v6  ;;  %v1952_v10 = vpop.f32.mrb[6].mxu0 }
 0x249   : > { %v640_v13 = vpop.f32.mrb[7].mxu0  ;;  %v928_v22 = vrot.slane %v2344_v8, 7 }
 0x24a   : > { %v925_v15 = vrot.slane %v2346_v9, 7  ;;  %v2352_v16 = vadd.f32 %v640_v13, %v585_v11 }
 0x24c   : > { %v933_v23 = vsel %vm510_vm6, %v2349_v14, %v925_v15  ;;  %v926_v25 = vrot.slane %v2352_v16, 7 }
 0x24d   : > { %v2361_v26 = vpack.c.bf16 %v933_v23, %v2354_v21 }
 0x24e   : > { %v927_v27 = vsel %vm510_vm6, %v925_v15, %v926_v25  ;;  %v929_v29 = vsel %vm510_vm6, %v926_v25, %v928_v22 }
 0x24f   : > { %v2365_v30 = vpack.c.bf16 %v929_v29, %v927_v27  ;;  %2031 = vmatprep.subr.msk.bf16.mxu1 %vm951_vm9, %v2361_v26  ;;  %v959_v31 = vsel %vm951_vm9, %v2361_v26, 0 }
 0x250   : > { %1968 = vmatpush3.bf16.xpose.msra.mxu1 %v959_v31 }
 0x251   : > { %2032 = vmatprep.subr.msk.bf16.mxu1 %vm951_vm9, %v2365_v30  ;;  %v962_v32 = vsel %vm951_vm9, %v2365_v30, 0 }
 0x258   : > { %1970 = vmatpush3.bf16.xpose.msra.mxu1 %v962_v32 }
 0x25a   : > { %v2375_v33 = vpop.f32.mrb[4].mxu1 }
 0x25b   : > { %v1959_v39 = vpop.f32.mrb[5].mxu1 }
 0x25c   : > { %v2377_v40 = vpop.f32.mrb[6].mxu1 }
 0x25d   : > { %v1960_v41 = vpop.f32.mrb[7].mxu1 }
 0x25f   : > { %1972 = vmatmul.mubr.msk.bf16.vlgmr.msra.gmra.mrb[8].mxu1 %vm951_vm9, %v2260_v20  ;;  %v1965_v51 = vpop.f32.mrb[8].mxu0 }
 0x260   : > { %v788_v52 = vpop.f32.mrb[9].mxu0 }
 0x261   : > { %v1966_v53 = vpop.f32.mrb[10].mxu0 }
 0x262   : > { %v791_v54 = vpop.f32.mrb[11].mxu0 }
 0x332   : > { %v1973_v43 = vpop.f32.mrb[8].mxu1 }
 0x333   : > { %v998_v44 = vpop.f32.mrb[9].mxu1  ;;  %v1020_v50 = vsel %vm1013_vm10, %v1973_v43, -inf }
 0x334   : > { %v1974_v45 = vpop.f32.mrb[10].mxu1  ;;  %v1014_v46 = vsel %vm1013_vm10, %v998_v44, -inf }
 0x335   : > { %1015 = vmax.xlane.f32.xlu1 %v1014_v46  ;;  %v1001_v47 = vpop.f32.mrb[11].mxu1  ;;  %v1024_v49 = vsel %vm1023_vm11, %v1974_v45, -inf }
 0x336   : > { %v1017_v48 = vsel %vm1013_vm10, %v1001_v47, -inf }
 0x337   : > { %1018 = vmax.xlane.f32.xlu0 %v1017_v48 }
 0x339   : > { %1025 = vmax.xlane.f32.xlu1 %v1024_v49 }
 0x33b   : > { %1021 = vmax.xlane.f32.xlu0 %v1020_v50 }
 0x34a   : > { %722 = vperm.xlu1 %2075, %v2301_v37  }
 0x34e   : > { %725 = vperm.xlu1 %2075, %v2311_v38  }
 0x351   : > { %658 = vperm.xlu0 %2074, %v2279_v28  }
 0x3c2   : > { %v1016_v55 = vpop.xlane.xlu1 %1015 }
 0x3c3   : > { %v1027_v58 = vsub.f32 %v998_v44, %v1016_v55 }
 0x3c4   : > { %v1019_v56 = vpop.xlane.xlu0 %1018 }
 0x3c5   : > { %v1028_v57 = vsub.f32 %v1001_v47, %v1019_v56  ;;  %v1031_v63 = vmul.f32 1.442695, %v1027_v58 }
 0x3c6   : > { %v1026_v60 = vpop.xlane.xlu1 %1025 }
 0x3c7   : > { %v1033_v59 = vmul.f32 1.442695, %v1028_v57  ;;  %v1030_v0 = vsub.f32 %v1974_v45, %v1026_v60 }
 0x3c8   : > { %v1022_v61 = vpop.xlane.xlu0 %1021 }
 0x3c9   : > { %2084 = vpow2.f32 %v1033_v59  ;;  %v1029_v62 = vsub.f32 %v1973_v43, %v1022_v61  ;;  %v1037_v38 = vmul.f32 1.442695, %v1030_v0 }
 0x3ca   : > { %v723_v10 = vpop.permute.xlu1 %722 }
 0x3cb   : > { %v1035_v37 = vmul.f32 1.442695, %v1029_v62  ;;  %v738_v15 = vrot.slane %v723_v10, 1 }
 0x3cd   : > { %2086 = vpow2.f32 %v1035_v37 }
 0x3ce   : > { %2088 = vpow2.f32 %v1031_v63  ;;  %v726_v13 = vpop.permute.xlu1 %725 }
 0x3cf   : > { %2090 = vpow2.f32 %v1037_v38  ;;  %v740_v23 = vrot.slane %v726_v13, 1 }
 0x3d0   : > { %v659_v11 = vpop.permute.xlu0 %658 }
 0x3d1   : > { %v737_v22 = vrot.slane %v659_v11, 1  ;;  %v741_v25 = vsel %vm580_vm1, %v738_v15, %v740_v23  ;;  %v2405_v29 = vadd.f32 %v1965_v51, %v740_v23  ;;  %v2413_v44 = vadd.f32 %v2377_v40, %v659_v11 }
 0x3d2   : > { %v2407_v31 = vadd.f32 %v791_v54, %v741_v25 }
 0x3d3   : > { %v2085_v28 = vpop.eup %2084  ;;  %v942_v42 = vrot.slane %v2405_v29, 7 }
 0x3d4   : > { %v1042_v1 = vsel %vm1013_vm10, %v2085_v28, 0.0  ;;  %v940_v43 = vrot.slane %v2407_v31, 7 }
 0x3d5   : > { %1043 = vadd.xlane.f32.xlu0 %v1042_v1 }
 0x3d6   : > { %v943_v49 = vsel %vm510_vm6, %v940_v43, %v942_v42 }
 0x3d7   : > { %v2087_v2 = vpop.eup %2086 }
 0x3d8   : > { %v1045_v3 = vsel %vm1013_vm10, %v2087_v2, 0.0  ;;  %v2089_v4 = vpop.eup %2088 }
 0x3d9   : > { %1046 = vadd.xlane.f32.xlu1 %v1045_v3  ;;  %v1039_v5 = vsel %vm1013_vm10, %v2089_v4, 0.0  ;;  %v2091_v6 = vpop.eup %2090 }
 0x3da   : > { %v1048_v7 = vsel %vm1023_vm11, %v2091_v6, 0.0 }
 0x3dd   : > { %1040 = vadd.xlane.f32.xlu1 %v1039_v5 }
 0x3e1   : > { %1049 = vadd.xlane.f32.xlu1 %v1048_v7 }
 0x3eb   : > { %654 = vperm.xlu0 %2074, %v2286_v34   ;;  %v739_v34 = vsel %vm580_vm1, %v737_v22, %v738_v15 }
 0x3ec   : > { %v2403_v27 = vadd.f32 %v788_v52, %v739_v34 }
 0x3ee   : > { %v939_v41 = vrot.slane %v2403_v27, 7 }
 0x3f0   : > { %v941_v48 = vsel %vm510_vm6, %v939_v41, %v940_v43  ;;  %v947_v50 = vsel %vm510_vm6, %v2413_v44, %v939_v41 }
 0x3f1   : > { %v2425_v40 = vpack.c.bf16 %v943_v49, %v941_v48 }
 0x3f2   : > { %1131 = vrot.lane.b32.xlu1 %v2361_v26, %s2163_s11 }
 0x3f3   : > { %v1068_v54 = vsel %vm597_vm7, %v2425_v40, 0 }
 0x3f6   : > { %1133 = vrot.lane.b32.xlu1 %v2365_v30, %s2163_s11 }
 0x3fa   : > { %1125 = vrot.lane.b32.xlu1 %v2293_v36, %s2163_s11 }
 0x3fe   : > { %1127 = vrot.lane.b32.xlu1 %v2260_v20, %s2163_s11 }
 0x462   : > { %v1044_v32 = vpop.xlane.xlu0 %1043 }
 0x463   : > { %2092 = vrcp.f32 %v1044_v32 }
 0x466   : > { %v1047_v39 = vpop.xlane.xlu1 %1046 }
 0x46a   : > { %v1041_v45 = vpop.xlane.xlu1 %1040  ;;  %v655_v46 = vpop.permute.xlu0 %654 }
 0x46b   : > { %2094 = vrcp.f32 %v1041_v45  ;;  %v2416_v47 = vadd.f32 %v2375_v33, %v655_v46 }
 0x46c   : > { %2096 = vrcp.f32 %v1047_v39 }
 0x46d   : > { %v2423_v51 = vpack.c.bf16 %v947_v50, %v2416_v47  ;;  %v2093_v53 = vpop.eup %2092 }
 0x46e   : > { %v1050_v52 = vpop.xlane.xlu1 %1049  ;;  %v1056_v57 = vmul.f32 %v2093_v53, %v2085_v28 }
 0x46f   : > { %2098 = vrcp.f32 %v1050_v52  ;;  %1975 = vmatprep.subr.bf16.mxu0 %v2423_v51 }
 0x470   : > { %1976 = vmatpush3.bf16.msra.mxu0 %v2423_v51 }
 0x471   : > { %2033 = vmatprep.subr.msk.bf16.mxu0 %vm597_vm7, %v2425_v40 }
 0x472   : > { %v1132_v33 = vpop.permute.xlu1 %1131 }
 0x473   : > { %v1142_v37 = vsel %vm951_vm9, %v1132_v33, 0 }
 0x474   : > { %1978 = vmatpush3.bf16.msra.mxu0 %v1068_v54 }
 0x475   : > { %v2095_v55 = vpop.eup %2094  ;;  %2034 = vmatprep.subr.msk.bf16.mxu0 %vm951_vm9, %v1132_v33 }
 0x476   : > { %v1055_v56 = vmul.f32 %v2095_v55, %v2089_v4  ;;  %v2097_v58 = vpop.eup %2096  ;;  %v1134_v59 = vpop.permute.xlu1 %1133 }
 0x477   : > { %v1057_v62 = vmul.f32 %v2097_v58, %v2087_v2  ;;  %v1145_v28 = vsel %vm951_vm9, %v1134_v59, 0 }
 0x478   : > { %v1059_v60 = vpack.c.bf16 %v1056_v57, %v1055_v56 }
 0x479   : > { %v2099_v61 = vpop.eup %2098 }
 0x47a   : > { %v1058_v63 = vmul.f32 %v2099_v61, %v2091_v6  ;;  %1979 = vmatprep.mubr.msk.bf16.mxu0 %vm1013_vm10, %v1059_v60  ;;  %v1126_v38 = vpop.permute.xlu1 %1125 }
 0x47c   : > { %v1060_v0 = vpack.c.bf16 %v1058_v63, %v1057_v62 }
 0x47e   : > { %1980 = vmatmul.mubr.msk.bf16.vlgmr.msra.gmra.mrb[12].mxu0 %vm1013_vm10, %v1060_v0  ;;  %v1128_v1 = vpop.permute.xlu1 %1127 }
 0x47f   : > { %1984 = vmatpush3.bf16.xpose.msra.mxu0 %v1142_v37  ;;  %1987 = vmatprep.mubr.msk.bf16.mxu0 %vm951_vm9, %v1126_v38 }
 0x480   : > { %2035 = vmatprep.subr.msk.bf16.mxu0 %vm951_vm9, %v1134_v59 }
 0x487   : > { %1986 = vmatpush3.bf16.xpose.msra.mxu0 %v1145_v28 }
 0x48e   : > { %1988 = vmatmul.mubr.msk.bf16.vlgmr.msra.gmra.mrb[16].mxu0 %vm951_vm9, %v1128_v1 }
 0x551   : > { %v1981_v2 = vpop.f32.mrb[12].mxu0 }
 0x552   : > { %1121 = vst.msk [vmem:[%s2446_s17 + $0x10] sm:$0xff] %vm951_vm9, %v1981_v2  ;;  %v1104_v3 = vpop.f32.mrb[13].mxu0 }
 0x553   : > { %1119 = vst.msk [vmem:[%s2446_s17] sm:$0xff] %vm951_vm9, %v1104_v3  ;;  %v1982_v4 = vpop.f32.mrb[14].mxu0 }
 0x554   : > { %1123 = vst.msk [vmem:[%s2446_s17 + $0x18] sm:$0x3] %vm1122_vm12, %v1982_v4  ;;  %v1107_v5 = vpop.f32.mrb[15].mxu0 }
 0x555   : > { %1120 = vst.msk [vmem:[%s2446_s17 + $0x8] sm:$0xff] %vm951_vm9, %v1107_v5 }
 0x561   : > { %v1989_v6 = vpop.f32.mrb[16].mxu0 }
 0x562   : > { %v1181_v7 = vpop.f32.mrb[17].mxu0  ;;  %v1202_v23 = vsel %vm1013_vm10, %v1989_v6, -inf }
 0x563   : > { %v1990_v10 = vpop.f32.mrb[18].mxu0  ;;  %v1196_v11 = vsel %vm1013_vm10, %v1181_v7, -inf }
 0x564   : > { %1197 = vmax.xlane.f32.xlu1 %v1196_v11  ;;  %v1184_v13 = vpop.f32.mrb[19].mxu0  ;;  %v1205_v22 = vsel %vm1023_vm11, %v1990_v10, -inf }
 0x565   : > { %v1199_v15 = vsel %vm1013_vm10, %v1184_v13, -inf }
 0x566   : > { %1200 = vmax.xlane.f32.xlu0 %v1199_v15 }
 0x568   : > { %1206 = vmax.xlane.f32.xlu1 %v1205_v22 }
 0x56a   : > { %1203 = vmax.xlane.f32.xlu0 %v1202_v23 }
 0x579   : > { %1246 = vrot.lane.b32.xlu1 %v2425_v40, %s2163_s11 }
 0x5f1   : > { %v1198_v34 = vpop.xlane.xlu1 %1197 }
 0x5f2   : > { %v1208_v41 = vsub.f32 %v1181_v7, %v1198_v34 }
 0x5f3   : > { %v1201_v25 = vpop.xlane.xlu0 %1200 }
 0x5f4   : > { %v1209_v32 = vsub.f32 %v1184_v13, %v1201_v25  ;;  %v1212_v49 = vmul.f32 1.442695, %v1208_v41 }
 0x5f5   : > { %v1207_v39 = vpop.xlane.xlu1 %1206 }
 0x5f6   : > { %v1211_v42 = vsub.f32 %v1990_v10, %v1207_v39  ;;  %v1214_v43 = vmul.f32 1.442695, %v1209_v32 }
 0x5f7   : > { %v1204_v45 = vpop.xlane.xlu0 %1203 }
 0x5f8   : > { %v1218_v46 = vmul.f32 1.442695, %v1211_v42  ;;  %v1210_v48 = vsub.f32 %v1989_v6, %v1204_v45 }
 0x5f9   : > { %v1247_v59 = vpop.permute.xlu1 %1246 }
 0x5fa   : > { %2100 = vpow2.f32 %v1218_v46  ;;  %v1216_v50 = vmul.f32 1.442695, %v1210_v48  ;;  %v1256_v28 = vsel %vm597_vm7, %v1247_v59, 0 }
 0x5fb   : > { %2102 = vpow2.f32 %v1214_v43 }
 0x5fc   : > { %2104 = vpow2.f32 %v1216_v50 }
 0x5fd   : > { %2106 = vpow2.f32 %v1212_v49 }
 0x604   : > { %v2101_v52 = vpop.eup %2100 }
 0x605   : > { %v2103_v33 = vpop.eup %2102  ;;  %v1229_v53 = vsel %vm1023_vm11, %v2101_v52, 0.0 }
 0x606   : > { %v2105_v54 = vpop.eup %2104  ;;  %1230 = vadd.xlane.f32.xlu1 %v1229_v53  ;;  %v1223_v57 = vsel %vm1013_vm10, %v2103_v33, 0.0 }
 0x607   : > { %v1226_v55 = vsel %vm1013_vm10, %v2105_v54, 0.0  ;;  %v2107_v56 = vpop.eup %2106 }
 0x608   : > { %1227 = vadd.xlane.f32.xlu0 %v1226_v55  ;;  %v1220_v58 = vsel %vm1013_vm10, %v2107_v56, 0.0 }
 0x60a   : > { %1224 = vadd.xlane.f32.xlu1 %v1223_v57 }
 0x60c   : > { %1221 = vadd.xlane.f32.xlu0 %v1220_v58 }
 0x61b   : > { %1333 = vrot.lane.b32.xlu1 %v2361_v26, %s2164_s19 }
 0x61f   : > { %1329 = vrot.lane.b32.xlu1 %v2293_v36, %s2164_s19 }
 0x622   : > { %1244 = vrot.lane.b32.xlu0 %v2423_v51, %s2163_s11  ;;  %s376_s11 = scalar_lea.vmem %s2635_s10, %s2637_s14 }
 0x626   : > { %1335 = vrot.lane.b32.xlu0 %v2365_v30, %s2164_s19 }
 0x62a   : > { %1331 = vrot.lane.b32.xlu0 %v2260_v20, %s2164_s19 }
 0x693   : > { %v1231_v60 = vpop.xlane.xlu1 %1230 }
 0x695   : > { %v1228_v61 = vpop.xlane.xlu0 %1227 }
 0x696   : > { %2108 = vrcp.f32 %v1228_v61 }
 0x697   : > { %v1225_v62 = vpop.xlane.xlu1 %1224 }
 0x698   : > { %2110 = vrcp.f32 %v1225_v62 }
 0x699   : > { %2112 = vrcp.f32 %v1231_v60  ;;  %v1222_v63 = vpop.xlane.xlu0 %1221 }
 0x69a   : > { %2114 = vrcp.f32 %v1222_v63 }
 0x69b   : > { %v1334_v2 = vpop.permute.xlu1 %1333 }
 0x69c   : > { %v1344_v15 = vsel %vm951_vm9, %v1334_v2, 0 }
 0x69d   : > { %v1245_v0 = vpop.permute.xlu0 %1244 }
 0x69e   : > { %1991 = vmatprep.subr.bf16.mxu1 %v1245_v0 }
 0x69f   : > { %1992 = vmatpush3.bf16.msra.mxu1 %v1245_v0  ;;  %v1330_v13 = vpop.permute.xlu1 %1329 }
 0x6a0   : > { %2036 = vmatprep.subr.msk.bf16.mxu1 %vm597_vm7, %v1247_v59  ;;  %v2109_v37 = vpop.eup %2108 }
 0x6a1   : > { %v1238_v4 = vmul.f32 %v2109_v37, %v2105_v54  ;;  %v1336_v22 = vpop.permute.xlu0 %1335 }
 0x6a2   : > { %v2111_v38 = vpop.eup %2110  ;;  %v1347_v23 = vsel %vm951_vm9, %v1336_v22, 0 }
 0x6a3   : > { %v2113_v1 = vpop.eup %2112  ;;  %1994 = vmatpush3.bf16.msra.mxu1 %v1256_v28  ;;  %v1237_v6 = vmul.f32 %v2111_v38, %v2103_v33 }
 0x6a4   : > { %v2115_v3 = vpop.eup %2114  ;;  %2037 = vmatprep.subr.msk.bf16.mxu1 %vm951_vm9, %v1334_v2  ;;  %v1239_v7 = vmul.f32 %v2113_v1, %v2101_v52 }
 0x6a5   : > { %v1236_v5 = vmul.f32 %v2115_v3, %v2107_v56  ;;  %v1332_v34 = vpop.permute.xlu0 %1331 }
 0x6a6   : > { %v1241_v11 = vpack.c.bf16 %v1239_v7, %v1238_v4 }
 0x6a7   : > { %v1240_v10 = vpack.c.bf16 %v1237_v6, %v1236_v5 }
 0x6a9   : > { %1995 = vmatprep.mubr.msk.bf16.mxu1 %vm1013_vm10, %v1240_v10 }
 0x6aa   : > { %1996 = vmatmul.mubr.msk.bf16.vlgmr.msra.gmra.mrb[12].mxu1 %vm1013_vm10, %v1241_v11 }
 0x6ab   : > { %2003 = vmatprep.mubr.msk.bf16.mxu1 %vm951_vm9, %v1330_v13 }
 0x6ac   : > { %2000 = vmatpush3.bf16.xpose.msra.mxu1 %v1344_v15 }
 0x6ad   : > { %2038 = vmatprep.subr.msk.bf16.mxu1 %vm951_vm9, %v1336_v22 }
 0x6b4   : > { %2002 = vmatpush3.bf16.xpose.msra.mxu1 %v1347_v23 }
 0x6bb   : > { %2004 = vmatmul.mubr.msk.bf16.vlgmr.msra.gmra.mrb[16].mxu1 %vm951_vm9, %v1332_v34 }
 0x77d   : > { %v2485_v25 = vpop.f32.mrb[12].mxu1 }
 0x77e   : > { %v2487_v32 = vpop.f32.mrb[13].mxu1 }
 0x77f   : > { %v2489_v39 = vpop.f32.mrb[14].mxu1 }
 0x780   : > { %v2491_v41 = vpop.f32.mrb[15].mxu1 }
 0x78e   : > { %v2005_v42 = vpop.f32.mrb[16].mxu1 }
 0x78f   : > { %v1383_v43 = vpop.f32.mrb[17].mxu1  ;;  %v1404_v52 = vsel %vm1013_vm10, %v2005_v42, -inf }
 0x790   : > { %v2006_v45 = vpop.f32.mrb[18].mxu1  ;;  %v1398_v46 = vsel %vm1013_vm10, %v1383_v43, -inf }
 0x791   : > { %1399 = vmax.xlane.f32.xlu1 %v1398_v46  ;;  %v1386_v48 = vpop.f32.mrb[19].mxu1  ;;  %v1407_v50 = vsel %vm1023_vm11, %v2006_v45, -inf }
 0x792   : > { %v1401_v49 = vsel %vm1013_vm10, %v1386_v48, -inf }
 0x793   : > { %1402 = vmax.xlane.f32.xlu0 %v1401_v49 }
 0x795   : > { %1408 = vmax.xlane.f32.xlu1 %v1407_v50 }
 0x797   : > { %1405 = vmax.xlane.f32.xlu0 %v1404_v52 }
 0x7a6   : > { %1446 = vrot.lane.b32.xlu1 %v2425_v40, %s2164_s19 }
 0x81e   : > { %v1400_v33 = vpop.xlane.xlu1 %1399 }
 0x81f   : > { %v1410_v56 = vsub.f32 %v1383_v43, %v1400_v33 }
 0x820   : > { %v1403_v53 = vpop.xlane.xlu0 %1402 }
 0x821   : > { %v1411_v54 = vsub.f32 %v1386_v48, %v1403_v53  ;;  %v1414_v62 = vmul.f32 1.442695, %v1410_v56 }
 0x822   : > { %v1409_v55 = vpop.xlane.xlu1 %1408 }
 0x823   : > { %v1413_v57 = vsub.f32 %v2006_v45, %v1409_v55  ;;  %v1416_v58 = vmul.f32 1.442695, %v1411_v54 }
 0x824   : > { %v1406_v59 = vpop.xlane.xlu0 %1405 }
 0x825   : > { %v1420_v60 = vmul.f32 1.442695, %v1413_v57  ;;  %v1412_v61 = vsub.f32 %v2005_v42, %v1406_v59 }
 0x826   : > { %v1447_v5 = vpop.permute.xlu1 %1446 }
 0x827   : > { %2116 = vpow2.f32 %v1420_v60  ;;  %v1418_v63 = vmul.f32 1.442695, %v1412_v61 }
 0x828   : > { %2118 = vpow2.f32 %v1416_v58 }
 0x829   : > { %2120 = vpow2.f32 %v1418_v63 }
 0x82a   : > { %2122 = vpow2.f32 %v1414_v62 }
 0x831   : > { %v2117_v0 = vpop.eup %2116 }
 0x832   : > { %v2119_v37 = vpop.eup %2118  ;;  %v1431_v38 = vsel %vm1023_vm11, %v2117_v0, 0.0 }
 0x833   : > { %v2121_v28 = vpop.eup %2120  ;;  %1432 = vadd.xlane.f32.xlu1 %v1431_v38  ;;  %v1425_v3 = vsel %vm1013_vm10, %v2119_v37, 0.0 }
 0x834   : > { %v1428_v1 = vsel %vm1013_vm10, %v2121_v28, 0.0  ;;  %v2123_v2 = vpop.eup %2122 }
 0x835   : > { %1429 = vadd.xlane.f32.xlu0 %v1428_v1  ;;  %v1422_v4 = vsel %vm1013_vm10, %v2123_v2, 0.0 }
 0x837   : > { %1426 = vadd.xlane.f32.xlu1 %v1425_v3 }
 0x839   : > { %1423 = vadd.xlane.f32.xlu0 %v1422_v4 }
 0x848   : > { %1533 = vrot.lane.b32.xlu1 %v2361_v26, %s2165_s18 }
 0x84c   : > { %1529 = vrot.lane.b32.xlu1 %v2293_v36, %s2165_s18 }
 0x84f   : > { %1444 = vrot.lane.b32.xlu0 %v2423_v51, %s2164_s19 }
 0x853   : > { %1535 = vrot.lane.b32.xlu0 %v2365_v30, %s2165_s18  ;;  %v1456_v30 = vsel %vm597_vm7, %v1447_v5, 0 }
 0x857   : > { %1531 = vrot.lane.b32.xlu0 %v2260_v20, %s2165_s18 }
 0x8c0   : > { %v1433_v6 = vpop.xlane.xlu1 %1432 }
 0x8c2   : > { %v1430_v7 = vpop.xlane.xlu0 %1429 }
 0x8c3   : > { %2124 = vrcp.f32 %v1430_v7 }
 0x8c4   : > { %v1427_v10 = vpop.xlane.xlu1 %1426 }
 0x8c5   : > { %2126 = vrcp.f32 %v1427_v10 }
 0x8c6   : > { %2128 = vrcp.f32 %v1433_v6  ;;  %v1424_v26 = vpop.xlane.xlu0 %1423 }
 0x8c7   : > { %2130 = vrcp.f32 %v1424_v26 }
 0x8c8   : > { %v1534_v20 = vpop.permute.xlu1 %1533 }
 0x8c9   : > { %v1544_v49 = vsel %vm951_vm9, %v1534_v20, 0 }
 0x8ca   : > { %v1445_v11 = vpop.permute.xlu0 %1444 }
 0x8cb   : > { %2007 = vmatprep.subr.bf16.mxu0 %v1445_v11 }
 0x8cc   : > { %2008 = vmatpush3.bf16.msra.mxu0 %v1445_v11  ;;  %v1530_v48 = vpop.permute.xlu1 %1529 }
 0x8cd   : > { %2039 = vmatprep.subr.msk.bf16.mxu0 %vm597_vm7, %v1447_v5  ;;  %v2125_v36 = vpop.eup %2124 }
 0x8ce   : > { %v1440_v23 = vmul.f32 %v2125_v36, %v2121_v28  ;;  %v1536_v50 = vpop.permute.xlu0 %1535 }
 0x8cf   : > { %v2127_v13 = vpop.eup %2126  ;;  %v1547_v52 = vsel %vm951_vm9, %v1536_v50, 0 }
 0x8d0   : > { %v2129_v15 = vpop.eup %2128  ;;  %2010 = vmatpush3.bf16.msra.mxu0 %v1456_v30  ;;  %v1439_v42 = vmul.f32 %v2127_v13, %v2119_v37 }
 0x8d1   : > { %v2131_v22 = vpop.eup %2130  ;;  %2040 = vmatprep.subr.msk.bf16.mxu0 %vm951_vm9, %v1534_v20  ;;  %v1441_v43 = vmul.f32 %v2129_v15, %v2117_v0 }
 0x8d2   : > { %v1438_v34 = vmul.f32 %v2131_v22, %v2123_v2  ;;  %v1532_v33 = vpop.permute.xlu0 %1531 }
 0x8d3   : > { %v1443_v46 = vpack.c.bf16 %v1441_v43, %v1440_v23 }
 0x8d4   : > { %v1442_v45 = vpack.c.bf16 %v1439_v42, %v1438_v34  ;;  %v814_v34 = vrot.slane %v2254_v17, 1 }
 0x8d6   : > { %2011 = vmatprep.mubr.msk.bf16.mxu0 %vm1013_vm10, %v1442_v45  ;;  %v816_v42 = vsel %vm580_vm1, %v814_v34, %v815_v18  ;;  %vm1527_vm1 = vcmask 189568  }
 0x8d7   : > { %2012 = vmatmul.mubr.msk.bf16.vlgmr.msra.gmra.mrb[20].mxu0 %vm1013_vm10, %v1443_v46 }
 0x8d8   : > { %2019 = vmatprep.mubr.msk.bf16.mxu0 %vm951_vm9, %v1530_v48 }
 0x8d9   : > { %2016 = vmatpush3.bf16.xpose.msra.mxu0 %v1544_v49 }
 0x8da   : > { %2041 = vmatprep.subr.msk.bf16.mxu0 %vm951_vm9, %v1536_v50 }
 0x8e1   : > { %2018 = vmatpush3.bf16.xpose.msra.mxu0 %v1547_v52 }
 0x8e8   : > { %2020 = vmatmul.mubr.msk.bf16.vlgmr.msra.gmra.mrb[24].mxu0 %vm951_vm9, %v1532_v33 }
 0x9aa   : > { %v2523_v53 = vpop.f32.mrb[20].mxu0 }
 0x9ab   : > { %v2525_v54 = vpop.f32.mrb[21].mxu0 }
 0x9ac   : > { %v2527_v55 = vpop.f32.mrb[22].mxu0 }
 0x9ad   : > { %v2529_v56 = vpop.f32.mrb[23].mxu0 }
 0x9bb   : > { %v2021_v57 = vpop.f32.mrb[24].mxu0 }
 0x9bc   : > { %v1583_v58 = vpop.f32.mrb[25].mxu0  ;;  %v1604_v0 = vsel %vm1013_vm10, %v2021_v57, -inf }
 0x9bd   : > { %v2022_v59 = vpop.f32.mrb[26].mxu0  ;;  %v1598_v60 = vsel %vm1013_vm10, %v1583_v58, -inf }
 0x9be   : > { %1599 = vmax.xlane.f32.xlu1 %v1598_v60  ;;  %v1586_v61 = vpop.f32.mrb[27].mxu0  ;;  %v1607_v63 = vsel %vm1023_vm11, %v2022_v59, -inf }
 0x9bf   : > { %v1601_v62 = vsel %vm1013_vm10, %v1586_v61, -inf }
 0x9c0   : > { %1602 = vmax.xlane.f32.xlu0 %v1601_v62 }
 0x9c2   : > { %1608 = vmax.xlane.f32.xlu1 %v1607_v63 }
 0x9c4   : > { %1605 = vmax.xlane.f32.xlu0 %v1604_v0 }
 0xa4b   : > { %v1600_v37 = vpop.xlane.xlu1 %1599 }
 0xa4c   : > { %v1610_v2 = vsub.f32 %v1583_v58, %v1600_v37 }
 0xa4d   : > { %v1603_v38 = vpop.xlane.xlu0 %1602 }
 0xa4e   : > { %v1611_v28 = vsub.f32 %v1586_v61, %v1603_v38  ;;  %v1614_v10 = vmul.f32 1.442695, %v1610_v2 }
 0xa4f   : > { %v1609_v1 = vpop.xlane.xlu1 %1608 }
 0xa50   : > { %v1613_v3 = vsub.f32 %v2022_v59, %v1609_v1  ;;  %v1616_v4 = vmul.f32 1.442695, %v1611_v28 }
 0xa51   : > { %v1606_v5 = vpop.xlane.xlu0 %1605 }
 0xa52   : > { %v1620_v6 = vmul.f32 1.442695, %v1613_v3  ;;  %v1612_v7 = vsub.f32 %v2021_v57, %v1606_v5 }
 0xa54   : > { %2132 = vpow2.f32 %v1620_v6  ;;  %v1618_v26 = vmul.f32 1.442695, %v1612_v7 }
 0xa55   : > { %2134 = vpow2.f32 %v1616_v4 }
 0xa56   : > { %2136 = vpow2.f32 %v1618_v26 }
 0xa57   : > { %2138 = vpow2.f32 %v1614_v10 }
 0xa5e   : > { %v2133_v11 = vpop.eup %2132 }
 0xa5f   : > { %v2135_v36 = vpop.eup %2134  ;;  %v1631_v13 = vsel %vm1023_vm11, %v2133_v11, 0.0 }
 0xa60   : > { %v2137_v30 = vpop.eup %2136  ;;  %1632 = vadd.xlane.f32.xlu1 %v1631_v13  ;;  %v1625_v22 = vsel %vm1013_vm10, %v2135_v36, 0.0 }
 0xa61   : > { %v1628_v15 = vsel %vm1013_vm10, %v2137_v30, 0.0  ;;  %v2139_v20 = vpop.eup %2138 }
 0xa62   : > { %1629 = vadd.xlane.f32.xlu0 %v1628_v15  ;;  %v1622_v23 = vsel %vm1013_vm10, %v2139_v20, 0.0 }
 0xa64   : > { %1626 = vadd.xlane.f32.xlu1 %v1625_v22 }
 0xa66   : > { %1623 = vadd.xlane.f32.xlu0 %v1622_v23 }
 0xa75   : > { %1646 = vrot.lane.b32.xlu1 %v2425_v40, %s2165_s18 }
 0xa79   : > { %819 = vrot.lane.b32.xlu1 %v816_v42, %s2159_s25 }
 0xa7c   : > { %1644 = vrot.lane.b32.xlu0 %v2423_v51, %s2165_s18 }
 0xa7d   : > { %839 = vrot.lane.b32.xlu1 %v816_v42, %s2160_s16 }
 0xa80   : > { %821 = vrot.lane.b32.xlu0 %v2270_v24, %s2159_s25 }
 0xa81   : > { %804 = vrot.lane.b32.xlu1 %v2288_v35, %s2159_s25 }
 0xa84   : > { %841 = vrot.lane.b32.xlu0 %v2270_v24, %s2160_s16 }
 0xa85   : > { %823 = vrot.lane.b32.xlu1 %v2257_v19, %s2159_s25 }
 0xa88   : > { %806 = vrot.lane.b32.xlu0 %v2254_v17, %s2159_s25  ;;  %s2166_s25 = smov 8  }
 0xa89   : > { %833 = vrot.lane.b32.xlu1 %v2254_v17, %s2160_s16 }
 0xa8c   : > { %831 = vrot.lane.b32.xlu0 %v2288_v35, %s2160_s16 }
 0xa90   : > { %843 = vrot.lane.b32.xlu0 %v2257_v19, %s2160_s16  ;;  %s2167_s16 = smov 16  }
 0xaed   : > { %v1633_v12 = vpop.xlane.xlu1 %1632 }
 0xaef   : > { %v1630_v18 = vpop.xlane.xlu0 %1629 }
 0xaf0   : > { %2140 = vrcp.f32 %v1630_v18 }
 0xaf1   : > { %v1627_v51 = vpop.xlane.xlu1 %1626 }
 0xaf2   : > { %2142 = vrcp.f32 %v1627_v51 }
 0xaf3   : > { %2144 = vrcp.f32 %v1633_v12  ;;  %v1624_v24 = vpop.xlane.xlu0 %1623 }
 0xaf4   : > { %2146 = vrcp.f32 %v1624_v24 }
 0xaf5   : > { %v1647_v40 = vpop.permute.xlu1 %1646 }
 0xaf6   : > { %v1656_v19 = vsel %vm597_vm7, %v1647_v40, 0 }
 0xaf7   : > { %v1645_v43 = vpop.permute.xlu0 %1644 }
 0xaf8   : > { %2023 = vmatprep.subr.bf16.mxu1 %v1645_v43 }
 0xaf9   : > { %v820_v45 = vpop.permute.xlu1 %819  ;;  %2024 = vmatpush3.bf16.msra.mxu1 %v1645_v43 }
 0xafa   : > { %2042 = vmatprep.subr.msk.bf16.mxu1 %vm597_vm7, %v1647_v40  ;;  %v2141_v17 = vpop.eup %2140  ;;  %v828_v57 = vsub.f32 %v2346_v9, %v820_v45 }
 0xafb   : > { %v822_v35 = vpop.permute.xlu0 %821  ;;  %v1640_v52 = vmul.f32 %v2141_v17, %v2137_v30 }
 0xafc   : > { %v2143_v46 = vpop.eup %2142  ;;  %v829_v33 = vsub.f32 %v2352_v16, %v822_v35  ;;  %v868_v28 = vmul.f32 %v828_v57, %v828_v57 }
 0xafd   : > { %v2145_v48 = vpop.eup %2144  ;;  %v840_v49 = vpop.permute.xlu1 %839  ;;  %2026 = vmatpush3.bf16.msra.mxu1 %v1656_v19  ;;  %v1639_v60 = vmul.f32 %v2143_v46, %v2135_v36 }
 0xafe   : > { %v2147_v50 = vpop.eup %2146  ;;  %v1641_v61 = vmul.f32 %v2145_v48, %v2133_v11  ;;  %v869_v0 = vmul.f32 %v829_v33, %v829_v33  ;;  %v848_v5 = vsub.f32 %v2403_v27, %v840_v49  ;;  %v871_v7 = vsel %vm407_vm0, %v868_v28, 0.0 }
 0xaff   : > { %v842_v58 = vpop.permute.xlu0 %841  ;;  %v1638_v59 = vmul.f32 %v2147_v50, %v2139_v20 }
 0xb00   : > { %v1643_v38 = vpack.c.bf16 %v1641_v61, %v1640_v52  ;;  %v849_v1 = vsub.f32 %v2407_v31, %v842_v58  ;;  %v872_v4 = vsel %vm407_vm0, %v869_v0, 0.0  ;;  %v903_v20 = vmul.f32 %v848_v5, %v848_v5 }
 0xb01   : > { %v805_v62 = vpop.permute.xlu1 %804  ;;  %v1642_v63 = vpack.c.bf16 %v1639_v60, %v1638_v59  ;;  %v873_v15 = vadd.f32 %v872_v4, %v871_v7 }
 0xb02   : > { %v810_v37 = vsub.f32 %v2354_v21, %v805_v62  ;;  %v904_v31 = vmul.f32 %v849_v1, %v849_v1  ;;  %v906_v18 = vsel %vm407_vm0, %v903_v20, 0.0 }
 0xb03   : > { %2027 = vmatprep.mubr.msk.bf16.mxu1 %vm1013_vm10, %v1642_v63  ;;  %v807_v2 = vpop.permute.xlu0 %806 }
 0xb04   : > { %v851_v3 = vmul.f32 %v810_v37, %v810_v37  ;;  %v811_v16 = vsub.f32 %v2349_v14, %v807_v2  ;;  %2028 = vmatmul.mubr.msk.bf16.vlgmr.msra.gmra.mrb[20].mxu1 %vm1013_vm10, %v1643_v38  ;;  %v907_v42 = vsel %vm407_vm0, %v904_v31, 0.0 }
 0xb05   : > { %v824_v9 = vpop.permute.xlu1 %823 }
 0xb06   : > { %v852_v6 = vmul.f32 %v811_v16, %v811_v16  ;;  %v830_v21 = vsub.f32 %v2344_v8, %v824_v9  ;;  %v853_v14 = vsel %vm407_vm0, %v851_v3, 0.0 }
 0xb07   : > { %v832_v10 = vpop.permute.xlu0 %831 }
 0xb08   : > { %v870_v26 = vmul.f32 %v830_v21, %v830_v21  ;;  %v837_v11 = vsub.f32 %v2416_v47, %v832_v10  ;;  %v855_v36 = vsel %vm854_vm13, %v852_v6, 0.0 }
 0xb09   : > { %v834_v13 = vpop.permute.xlu1 %833  ;;  %v856_v30 = vadd.f32 %v855_v36, %v853_v14 }
 0xb0a   : > { %v887_v22 = vmul.f32 %v837_v11, %v837_v11  ;;  %v838_v27 = vsub.f32 %v2413_v44, %v834_v13  ;;  %v874_v8 = vsel %vm854_vm13, %v870_v26, 0.0  ;;  %v908_v44 = vadd.f32 %v907_v42, %v906_v18 }
 0xb0b   : > { %857 = vadd.xlane.f32.xlu1 %v856_v30  ;;  %v844_v23 = vpop.permute.xlu0 %843  ;;  %v875_v34 = vadd.f32 %v874_v8, %v873_v15 }
 0xb0c   : > { %v888_v12 = vmul.f32 %v838_v27, %v838_v27  ;;  %v850_v47 = vsub.f32 %v2405_v29, %v844_v23  ;;  %v889_v24 = vsel %vm407_vm0, %v887_v22, 0.0  ;;  %vm1523_vm0 = vcmask 195712  }
 0xb0d   : > { %876 = vadd.xlane.f32.xlu0 %v875_v34 }
 0xb0e   : > { %v905_v51 = vmul.f32 %v850_v47, %v850_v47  ;;  %v890_v40 = vsel %vm854_vm13, %v888_v12, 0.0 }
 0xb0f   : > { %v891_v43 = vadd.f32 %v890_v40, %v889_v24 }
 0xb10   : > { %v909_v45 = vsel %vm854_vm13, %v905_v51, 0.0 }
 0xb11   : > { %892 = vadd.xlane.f32.xlu0 %v891_v43  ;;  %v910_v17 = vadd.f32 %v909_v45, %v908_v44 }
 0xb13   : > { %911 = vadd.xlane.f32.xlu1 %v910_v17 }
 0xb24   : > { %1313 = vrot.lane.b32.xlu1 %v2491_v41, %s2166_s25 }
 0xb27   : > { %1311 = vrot.lane.b32.xlu0 %v2487_v32, %s2166_s25 }
 0xb28   : > { %1315 = vrot.lane.b32.xlu1 %v2485_v25, %s2166_s25 }
 0xb2b   : > { %1317 = vrot.lane.b32.xlu0 %v2489_v39, %s2166_s25 }
 0xb2c   : > { %1511 = vrot.lane.b32.xlu1 %v2525_v54, %s2167_s16 }
 0xb2f   : > { %1513 = vrot.lane.b32.xlu0 %v2529_v56, %s2167_s16 }
 0xb30   : > { %1515 = vrot.lane.b32.xlu1 %v2523_v53, %s2167_s16 }
 0xb33   : > { %1517 = vrot.lane.b32.xlu0 %v2527_v55, %s2167_s16 }
 0xb98   : > { %v858_v29 = vpop.xlane.xlu1 %857 }
 0xb99   : > { %v859_v35 = vrot.slane %v858_v29, 4 }
 0xb9a   : > { %v877_v46 = vpop.xlane.xlu0 %876 }
 0xb9b   : > { %v860_v19 = vadd.f32 %v859_v35, %v858_v29  ;;  %v878_v41 = vrot.slane %v877_v46, 4 }
 0xb9d   : > { %v861_v32 = vrot.slane %v860_v19, 2  ;;  %v879_v48 = vadd.f32 %v878_v41, %v877_v46 }
 0xb9e   : > { %v893_v25 = vpop.xlane.xlu0 %892 }
 0xb9f   : > { %v880_v49 = vrot.slane %v879_v48, 2  ;;  %v894_v39 = vrot.slane %v893_v25, 4  ;;  %v862_v50 = vadd.f32 %v861_v32, %v860_v19 }
 0xba0   : > { %v912_v54 = vpop.xlane.xlu1 %911 }
 0xba1   : > { %v895_v56 = vadd.f32 %v894_v39, %v893_v25  ;;  %v913_v52 = vrot.slane %v912_v54, 4  ;;  %v863_v53 = vrot.slane %v862_v50, 1  ;;  %v881_v55 = vadd.f32 %v880_v49, %v879_v48 }
 0xba2   : > { %v1312_v33 = vpop.permute.xlu0 %1311 }
 0xba3   : > { %v896_v57 = vrot.slane %v895_v56, 2  ;;  %v914_v58 = vadd.f32 %v913_v52, %v912_v54  ;;  %1324 = vst.msk [vmem:[%s2446_s17] sm:$0xff] %vm1323_vm14, %v1312_v33  ;;  %v864_v59 = vadd.f32 %v863_v53, %v862_v50  ;;  %v882_v60 = vrot.slane %v881_v55, 1 }
 0xba4   : > { %v1314_v61 = vpop.permute.xlu1 %1313 }
 0xba5   : > { %v915_v62 = vrot.slane %v914_v58, 2  ;;  %1325 = vst.msk [vmem:[%s2446_s17 + $0x8] sm:$0xff] %vm1323_vm14, %v1314_v61  ;;  %v883_v63 = vadd.f32 %v882_v60, %v881_v55  ;;  %v897_v0 = vadd.f32 %v896_v57, %v895_v56 }
 0xba6   : > { %2043 = vpush %v864_v59  ;;  %v1318_v37 = vpop.permute.xlu0 %1317 }
 0xba7   : > { %1328 = vst.msk [vmem:[%s2446_s17 + $0x18] sm:$0x3] %vm1327_vm15, %v1318_v37  ;;  %v898_v38 = vrot.slane %v897_v0, 1  ;;  %v916_v28 = vadd.f32 %v915_v62, %v914_v58 }
 0xba8   : > { %2045 = vpush %v883_v63  ;;  %v1316_v1 = vpop.permute.xlu1 %1315 }
 0xba9   : > { %1326 = vst.msk [vmem:[%s2446_s17 + $0x10] sm:$0xff] %vm1323_vm14, %v1316_v1  ;;  %v899_v2 = vadd.f32 %v898_v38, %v897_v0  ;;  %v917_v3 = vrot.slane %v916_v28, 1 }
 0xbaa   : > { %v1514_v16 = vpop.permute.xlu0 %1513 }
 0xbab   : > { %1525 = vst.msk [vmem:[%s2446_s17 + $0x8] sm:$0xff] %vm1523_vm0, %v1514_v16  ;;  %v918_v9 = vadd.f32 %v917_v3, %v916_v28 }
 0xbac   : > { %2047 = vpush %v899_v2  ;;  %v1512_v4 = vpop.permute.xlu1 %1511 }
 0xbad   : > { %1524 = vst.msk [vmem:[%s2446_s17] sm:$0xff] %vm1523_vm0, %v1512_v4 }
 0xbae   : > { %2049 = vpush %v918_v9  ;;  %v1518_v5 = vpop.permute.xlu0 %1517 }
 0xbaf   : > { %1528 = vst.msk [vmem:[%s2446_s17 + $0x18] sm:$0x3] %vm1527_vm1, %v1518_v5 }
 0xbb0   : > { %v1516_v6 = vpop.permute.xlu1 %1515 }
 0xbb1   : > { %1526 = vst.msk [vmem:[%s2446_s17 + $0x10] sm:$0xff] %vm1523_vm0, %v1516_v6 }
 0xbd7   : > { %s2044_s20 = spop %2043  ;;  %v2029_v21 = vpop.f32.mrb[20].mxu1 }
 0xbd8   : > { %v1692_v7 = vpop.f32.mrb[21].mxu1  ;;  %v866_v31 = vstv %s2044_s20 }
 0xbd9   : > { %s2046_s21 = spop %2045  ;;  %v2030_v26 = vpop.f32.mrb[22].mxu1  ;;  %1711 = vrot.lane.b32.xlu1 %v1692_v7, %s2168_s26 }
 0xbda   : > { %v885_v10 = vstv %s2046_s21  ;;  %v1695_v14 = vpop.f32.mrb[23].mxu1 }
 0xbdb   : > { %v886_v11 = vadd.f32 %v885_v10, %v866_v31  ;;  %1713 = vrot.lane.b32.xlu0 %v1695_v14, %s2168_s26 }
 0xbdd   : > { %1730 = vst.msk [vmem:[%s373_s24] sm:$0x1] %vm1729_vm2, %v886_v11  ;;  %s2048_s27 = spop %2047  ;;  %1715 = vrot.lane.b32.xlu1 %v2029_v21, %s2168_s26 }
 0xbde   : > { %v901_v36 = vstv %s2048_s27 }
 0xbdf   : > { %s2050_s28 = spop %2049  ;;  %1717 = vrot.lane.b32.xlu0 %v2030_v26, %s2168_s26 }
 0xbe0   : > { %v920_v13 = vstv %s2050_s28 }
 0xbe1   : > { %v921_v30 = vadd.f32 %v920_v13, %v901_v36 }
 0xbe3   : > { %1731 = vst.msk [vmem:[%s376_s11] sm:$0x1] %vm1729_vm2, %v921_v30 }
 0xc4b   : > { %v1712_v15 = vpop.permute.xlu1 %1711 }
 0xc4c   : > { %1724 = vst.msk [vmem:[%s2446_s17] sm:$0xff] %vm1723_vm3, %v1712_v15 }
 0xc4d   : > { %v1714_v20 = vpop.permute.xlu0 %1713 }
 0xc4e   : > { %1725 = vst.msk [vmem:[%s2446_s17 + $0x8] sm:$0xff] %vm1723_vm3, %v1714_v20 }
 0xc4f   : > { %v1716_v22 = vpop.permute.xlu1 %1715 }
 0xc50   : > { %1726 = vst.msk [vmem:[%s2446_s17 + $0x10] sm:$0xff] %vm1723_vm3, %v1716_v22 }
 0xc51   : > { %v1718_v27 = vpop.permute.xlu0 %1717 }
 0xc52   : > { %1728 = vst.msk [vmem:[%s2446_s17 + $0x18] sm:$0x3] %vm1727_vm4, %v1718_v27 }
 0xc53 PF: > { %s21_s13 = sadd.s32 1, %s2154_s13  }
 0xc54   : > { %p18_p4 = scmp.ge.s32.totalorder %s21_s13, 4  }
 0xc56   :  { %20 = sbr.rel (!%p18_p4) target bundleno = 1 (0x1), region = 106 }

// kernel: tpu_custom_call.1
= control target key start
LH: loop header
LB: loop body
LE: loop exit
PB: predicated region body
PF: predicated region fallthrough
CT: control target
= control target key end

     0   :  { %s2224_s13 = smov 0   ;;  %s2625_s0 = inlined_call_operand.vmem [shape: f32[2,26,32], index: 0, kind: input, shape index: {}]   ;;  %s2626_s1 = inlined_call_operand.vmem [shape: bf16[32,96], index: 1, kind: input, shape index: {}]   ;;  %s2627_s2 = inlined_call_operand.vmem [shape: f32[1,96], index: 2, kind: input, shape index: {}]   ;;  %s2628_s3 = inlined_call_operand.vmem [shape: bf16[9,17], index: 3, kind: input, shape index: {}]   ;;  %s2629_s4 = inlined_call_operand.vmem [shape: bf16[17,9], index: 4, kind: input, shape index: {}]   ;;  %s2630_s5 = inlined_call_operand.vmem [shape: bf16[9,17], index: 5, kind: input, shape index: {}]   ;;  %s2631_s6 = inlined_call_operand.vmem [shape: bf16[17,9], index: 6, kind: input, shape index: {}]   ;;  %s2632_s7 = inlined_call_operand.vmem [shape: f32[26,2], index: 7, kind: input, shape index: {}]   ;;  %s2633_s8 = inlined_call_operand.vmem [shape: f32[2,26,32], index: 8, kind: output, shape index: {0}]   ;;  %s2634_s9 = inlined_call_operand.vmem [shape: f32[2,1,1], index: 9, kind: output, shape index: {1}]   ;;  %s2635_s10 = inlined_call_operand.vmem [shape: f32[2,1,1], index: 10, kind: output, shape index: {2}]  }
   0x1 LB: > { %s1837_s14 = sadd.s32 4294967295, %s2154_s13   ;;  %p1841_p0 = scmp.ge.s32.totalorder %s2154_s13, 1  ;;  %s2154_s13 = sphi %s2224_s13, %s21_s13  }
   0x2   : > { %p317_p1 = scmp.lt.s32.totalorder %s2154_s13, 3 }
   0x4   : > { %p318_p2 = pnand %p1841_p0, %p317_p1 }
   0x5   : > { %v2076_v0 = vld [vmem:[%s2626_s1] sm:$0xff] (!%p318_p2)   ;;  %p361_p3 = scmp.lt.s32.totalorder (!%p318_p2), %s1837_s14, 1  ;;  %v2077_v1 = vld [vmem:[%s2626_s1 + $0x8] sm:$0xff] (!%p318_p2)   ;;  %vm407_vm0 = vcmask (!%p318_p2), 261120   ;;  %v2156_v8 = vmov (!%p318_p2), 0   ;;  %v2157_v9 = vmov (!%p318_p2), 0.0  }
   0x6   : > { %321 = sbr.rel (%p318_p2) target bundleno = 3155 (0xc53), region = 52  ;;  %1931 = vmatprep.subr.bf16.mxu0 (!%p318_p2), %v2076_v0  ;;  %2072 = vset.pattern.permute.xlu1 (!%p318_p2), %v2156_v8  ;;  %v1846_v10 = vld [vmem:[%s2627_s2] ss:$0 sm:$0xff] (!%p318_p2)  ;;  %vm580_vm1 = vcmask (!%p318_p2), 1046528   ;;  %vm2158_vm2 = vmmov (!%p318_p2), 0   ;;  %s2159_s25 = smov (!%p318_p2), 96  }
   0x7   : > { %1932 = vmatpush3.bf16.msra.mxu0 (!%p318_p2), %v2076_v0  ;;  %2073 = vset.pattern.permute.xlu0 (!%p318_p2), %v2156_v8  ;;  %v2079_v27 = vld [vmem:[%s2629_s4] sm:$0xff] (!%p318_p2)   ;;  %vm589_vm3 = vcmask (!%p318_p2), 72704   ;;  %v2279_v28 = vld [vmem:[%s2632_s7 + $0x8] sm:$0xff] (!%p318_p2)  ;;  %vm486_vm4 = vsmask.f32 (!%p318_p2), 7424  ;;  %v2301_v37 = vld [vmem:[%s2632_s7 + $0x10] sm:$0xff] (!%p318_p2) }
   0x8   : > { %1933 = vmatprep.subr.bf16.mxu0 (!%p318_p2), %v2077_v1  ;;  %1939 = vmatprep.subr.bf16.mxu1 (!%p318_p2), %v2157_v9  ;;  %v2286_v34 = vld [vmem:[%s2632_s7] sm:$0xff] (!%p318_p2)  ;;  %s2160_s16 = smov (!%p318_p2), 64   ;;  %v2311_v38 = vld [vmem:[%s2632_s7 + $0x18] sm:$0x3] (!%p318_p2)  ;;  %vm596_vm5 = vcmask (!%p318_p2), 1043456   ;;  %vm510_vm6 = vcmask (!%p318_p2), 1040384  }
   0x9   : > { %1943 = vmatprep.mubr.msk.bf16.mxu1 (!%p318_p2), %vm2158_vm2, %v2157_v9  ;;  %vm597_vm7 = vcmask (!%p318_p2), 1044480   ;;  %v2161_v39 = vmov (!%p318_p2), 65535   ;;  %v512_v41 = vsel (!%p318_p2), %vm510_vm6, 65535, %v2156_v8  ;;  %v2078_v47 = vld [vmem:[%s2628_s3] sm:$0x1f] (!%p318_p2)   ;;  %vm506_vm8 = vcmask (!%p318_p2), 138240  }
   0xa   : > { %v598_v40 = vsel (!%p318_p2), %vm596_vm5, 4294967295, %v2161_v39  ;;  %v2080_v49 = vld [vmem:[%s2629_s4 + $0x8] ss:$0 sps:$4 sm:$0x11] (!%p318_p2)   ;;  %v2081_v56 = vld [vmem:[%s2630_s5] sm:$0x1f] (!%p318_p2)  }
   0xb   : > { %1934 = vmatpush3.bf16.msra.mxu0 (!%p318_p2), %v2077_v1  ;;  %v599_v44 = vsel (!%p318_p2), %vm597_vm7, %v598_v40, 0  ;;  %vm951_vm9 = vcmask (!%p318_p2), 64512   ;;  %v2082_v59 = vld [vmem:[%s2631_s6] sm:$0xff] (!%p318_p2)   ;;  %v2083_v60 = vld [vmem:[%s2631_s6 + $0x8] ss:$0 sps:$4 sm:$0x11] (!%p318_p2)  }
   0xc   : > { %vm1013_vm10 = vcmask (!%p318_p2), 211968   ;;  %vm1023_vm11 = vcmask (!%p318_p2), 205824   ;;  %s2163_s11 = smov (!%p318_p2), 120   ;;  %vm1122_vm12 = vcmask (!%p318_p2), 58368   ;;  %s2165_s18 = smov (!%p318_p2), 104   ;;  %vm854_vm13 = vcmask (!%p318_p2), 253952  }
   0xd   : > { %s2637_s14 = smov (!%p361_p3, %s1837_s14), 1  ;;  %vm1323_vm14 = vcmask 130112   ;;  %vm1327_vm15 = vcmask 123968   ;;  %s2168_s26 = smov 24  }
   0xe   : > { %s1881_s19 = sshll.u32 %s2637_s14, 5  ;;  %s373_s24 = scalar_lea.vmem %s2634_s9, %s2637_s14 }
   0xf   : > { %s365_s22 = scalar_lea.vmem %s2625_s0, %s1881_s19  ;;  %s2446_s17 = scalar_lea.vmem %s2633_s8, %s1881_s19 }
  0x10   : > { %v378_v2 = vld [vmem:[%s365_s22] sm:$0xff]  ;;  %v379_v3 = vld [vmem:[%s365_s22 + $0x8] sm:$0xff]  ;;  %v380_v4 = vld [vmem:[%s365_s22 + $0x10] sm:$0xff]  ;;  %s2164_s19 = smov 112  }
  0x11   : > { %v382_v5 = vpack.c.bf16 %v379_v3, %v378_v2  ;;  %v381_v6 = vld [vmem:[%s365_s22 + $0x18] sm:$0x3] }
  0x12   : > { %v383_v7 = vpack.c.bf16 %v381_v6, %v380_v4 }
  0x13   : > { %1935 = vmatprep.mubr.msk.bf16.mxu0 %vm407_vm0, %v382_v5 }
  0x14   : > { %1936 = vmatmul.mubr.msk.bf16.vlgmr.msra.gmra.mrb[0].mxu0 %vm407_vm0, %v383_v7 }
  0x15   : > { %1949 = vmatprep.mubr.msk.bf16.mxu0 %vm589_vm3, %v2079_v27 }
  0xe7   : > { %v1937_v11 = vpop.f32.mrb[0].mxu0 }
  0xe8   : > { %v2252_v12 = vadd.f32 %v1937_v11, %v1846_v10  ;;  %v448_v13 = vpop.f32.mrb[1].mxu0 }
  0xe9   : > { %v1938_v14 = vpop.f32.mrb[2].mxu0  ;;  %v2288_v35 = vadd.f32 %v1846_v10, %v448_v13 }
  0xea   : > { %v460_v15 = vadd.f32 %v1938_v14, %v1846_v10  ;;  %v451_v16 = vpop.f32.mrb[3].mxu0  ;;  %v815_v18 = vrot.slane %v2252_v12, 1 }
  0xeb   : > { %v2254_v17 = vadd.f32 %v1846_v10, %v451_v16 }
  0xec   : > { %v2257_v19 = vrot.slane %v460_v15, 1  ;;  %v2260_v20 = vpack.c.bf16 %v460_v15, %v2252_v12  ;;  %v470_v21 = vpack.c.bf16 %v460_v15, %v460_v15 }
  0xed   : > { %v469_v22 = vpack.c.bf16 %v2252_v12, %v2254_v17  ;;  %v2293_v36 = vpack.c.bf16 %v2254_v17, %v2288_v35 }
  0xee   : > { %v499_v23 = vshrl.u32 %v470_v21, 16  ;;  %v2270_v24 = vsel %vm580_vm1, %v815_v18, %v2257_v19  ;;  %v495_v26 = vshll.u32 %v470_v21, 16 }
  0xef   : > { %v490_v25 = vshll.u32 %v469_v22, 16  ;;  %v488_v29 = vshrl.u32 %v469_v22, 16 }
  0xf0   : > { %503 = vrot.lane.b32.xlu1 %v499_v23, %s2159_s25  ;;  %v497_v32 = vrot.slane %v495_v26, 1 }
  0xf1   : > { %v492_v30 = vrot.slane %v490_v25, 1 }
  0xf3   : > { %v493_v31 = vor.u32 %v492_v30, %v488_v29 }
  0xf4   : > { %478 = vperm.xlu1 %2072, %v2279_v28  }
  0xf5   : > { %v498_v33 = vsel %vm486_vm4, %v493_v31, %v497_v32  ;;  %vm1727_vm4 = vcmask 255168  }
  0xf6   : > { %501 = vrot.lane.b32.xlu0 %v498_v33, %s2159_s25 }
  0xf8   : > { %473 = vperm.xlu1 %2072, %v2286_v34  }
  0xfa   : > { %578 = vrot.lane.b32.xlu0 %v2293_v36, %s2159_s25 }
  0xfc   : > { %666 = vrot.lane.b32.xlu1 %v498_v33, %s2160_s16 }
  0xfe   : > { %563 = vperm.xlu0 %2073, %v2301_v37  }
 0x100   : > { %567 = vperm.xlu1 %2072, %v2311_v38  }
 0x102   : > { %668 = vrot.lane.b32.xlu0 %v499_v23, %s2160_s16 }
 0x106   : > { %735 = vrot.lane.b32.xlu0 %v2293_v36, %s2160_s16 }
 0x162   : > { %v504_v42 = vpop.permute.xlu1 %503 }
 0x163   : > { %v514_v45 = vand.u32 %v512_v41, %v504_v42  ;;  %v2162_v42 = vmov 1  }
 0x164   : > { %2075 = vset.pattern.permute.xlu1 %v2162_v42  ;;  %2074 = vset.pattern.permute.xlu0 %v2162_v42 }
 0x168   : > { %v502_v43 = vpop.permute.xlu0 %501 }
 0x169   : > { %1940 = vmatpush3.bf16.msra.mxu1 %v502_v43 }
 0x16a   : > { %1941 = vmatprep.subr.bf16.mxu1 %v2157_v9 }
 0x16c   : > { %v579_v46 = vpop.permute.xlu0 %578 }
 0x16d   : > { %v601_v48 = vand.u32 %v599_v44, %v579_v46  ;;  %1942 = vmatpush3.bf16.msra.mxu1 %v514_v45 }
 0x16e   : > { %1953 = vmatprep.subr.bf16.mxu1 %v2157_v9 }
 0x16f   : > { %1947 = vmatprep.subr.bf16.mxu0 %v601_v48 }
 0x170   : > { %1944 = vmatmul.mubr.msk.bf16.vlgmr.msra.gmra.mrb[0].mxu1 %vm506_vm8, %v2078_v47  ;;  %1948 = vmatpush3.bf16.msra.mxu0 %v601_v48 }
 0x171   : > { %1957 = vmatprep.mubr.msk.bf16.mxu1 %vm2158_vm2, %v2157_v9  ;;  %vm1729_vm2 = vcmask 0  }
 0x173   : > { %v479_v50 = vpop.permute.xlu1 %478  ;;  %1950 = vmatmul.mubr.msk.bf16.vlgmr.msra.gmra.mrb[4].mxu0 %vm589_vm3, %v2080_v49 }
 0x174   : > { %1963 = vmatprep.mubr.msk.bf16.mxu0 %vm589_vm3, %v2082_v59  ;;  %v581_v62 = vrot.slane %v479_v50, 1 }
 0x177   : > { %v474_v51 = vpop.permute.xlu1 %473 }
 0x17b   : > { %v667_v52 = vpop.permute.xlu1 %666 }
 0x17c   : > { %1954 = vmatpush3.bf16.msra.mxu1 %v667_v52 }
 0x17d   : > { %v564_v53 = vpop.permute.xlu0 %563  ;;  %1955 = vmatprep.subr.bf16.mxu1 %v2157_v9 }
 0x17e   : > { %v582_v63 = vrot.slane %v564_v53, 1 }
 0x17f   : > { %v568_v61 = vpop.permute.xlu1 %567 }
 0x180   : > { %v584_v2 = vrot.slane %v568_v61, 1  ;;  %v583_v6 = vsel %vm580_vm1, %v581_v62, %v582_v63 }
 0x181   : > { %v669_v54 = vpop.permute.xlu0 %668 }
 0x182   : > { %v675_v55 = vand.u32 %v669_v54, %v512_v41  ;;  %v585_v11 = vsel %vm580_vm1, %v582_v63, %v584_v2 }
 0x184   : > { %1956 = vmatpush3.bf16.msra.mxu1 %v675_v55 }
 0x185   : > { %v736_v57 = vpop.permute.xlu0 %735 }
 0x186   : > { %v752_v58 = vand.u32 %v736_v57, %v599_v44 }
 0x187   : > { %1958 = vmatmul.mubr.msk.bf16.vlgmr.msra.gmra.mrb[4].mxu1 %vm506_vm8, %v2081_v56 }
 0x188   : > { %1961 = vmatprep.subr.bf16.mxu0 %v752_v58  ;;  %1971 = vmatprep.mubr.msk.bf16.mxu1 %vm951_vm9, %v2293_v36 }
 0x189   : > { %1962 = vmatpush3.bf16.msra.mxu0 %v752_v58 }
 0x18c   : > { %1964 = vmatmul.mubr.msk.bf16.vlgmr.msra.gmra.mrb[8].mxu0 %vm589_vm3, %v2083_v60  ;;  %vm1723_vm3 = vcmask 261312  }
 0x243   : > { %v550_v0 = vpop.f32.mrb[0].mxu1 }
 0x244   : > { %v1945_v1 = vpop.f32.mrb[1].mxu1  ;;  %v2354_v21 = vadd.f32 %v550_v0, %v474_v51 }
 0x245   : > { %v553_v3 = vpop.f32.mrb[2].mxu1 }
 0x246   : > { %v1951_v4 = vpop.f32.mrb[4].mxu0  ;;  %v1946_v5 = vpop.f32.mrb[3].mxu1  ;;  %v2349_v14 = vadd.f32 %v553_v3, %v479_v50 }
 0x247   : > { %v637_v7 = vpop.f32.mrb[5].mxu0  ;;  %v2344_v8 = vadd.f32 %v1951_v4, %v584_v2 }
 0x248   : > { %v2346_v9 = vadd.f32 %v637_v7, %v583_v6  ;;  %v1952_v10 = vpop.f32.mrb[6].mxu0 }
 0x249   : > { %v640_v13 = vpop.f32.mrb[7].mxu0  ;;  %v928_v22 = vrot.slane %v2344_v8, 7 }
 0x24a   : > { %v925_v15 = vrot.slane %v2346_v9, 7  ;;  %v2352_v16 = vadd.f32 %v640_v13, %v585_v11 }
 0x24c   : > { %v933_v23 = vsel %vm510_vm6, %v2349_v14, %v925_v15  ;;  %v926_v25 = vrot.slane %v2352_v16, 7 }
 0x24d   : > { %v2361_v26 = vpack.c.bf16 %v933_v23, %v2354_v21 }
 0x24e   : > { %v927_v27 = vsel %vm510_vm6, %v925_v15, %v926_v25  ;;  %v929_v29 = vsel %vm510_vm6, %v926_v25, %v928_v22 }
 0x24f   : > { %v2365_v30 = vpack.c.bf16 %v929_v29, %v927_v27  ;;  %2031 = vmatprep.subr.msk.bf16.mxu1 %vm951_vm9, %v2361_v26  ;;  %v959_v31 = vsel %vm951_vm9, %v2361_v26, 0 }
 0x250   : > { %1968 = vmatpush3.bf16.xpose.msra.mxu1 %v959_v31 }
 0x251   : > { %2032 = vmatprep.subr.msk.bf16.mxu1 %vm951_vm9, %v2365_v30  ;;  %v962_v32 = vsel %vm951_vm9, %v2365_v30, 0 }
 0x258   : > { %1970 = vmatpush3.bf16.xpose.msra.mxu1 %v962_v32 }
 0x25a   : > { %v2375_v33 = vpop.f32.mrb[4].mxu1 }
 0x25b   : > { %v1959_v39 = vpop.f32.mrb[5].mxu1 }
 0x25c   : > { %v2377_v40 = vpop.f32.mrb[6].mxu1 }
 0x25d   : > { %v1960_v41 = vpop.f32.mrb[7].mxu1 }
 0x25f   : > { %1972 = vmatmul.mubr.msk.bf16.vlgmr.msra.gmra.mrb[8].mxu1 %vm951_vm9, %v2260_v20  ;;  %v1965_v51 = vpop.f32.mrb[8].mxu0 }
 0x260   : > { %v788_v52 = vpop.f32.mrb[9].mxu0 }
 0x261   : > { %v1966_v53 = vpop.f32.mrb[10].mxu0 }
 0x262   : > { %v791_v54 = vpop.f32.mrb[11].mxu0 }
 0x332   : > { %v1973_v43 = vpop.f32.mrb[8].mxu1 }
 0x333   : > { %v998_v44 = vpop.f32.mrb[9].mxu1  ;;  %v1020_v50 = vsel %vm1013_vm10, %v1973_v43, -inf }
 0x334   : > { %v1974_v45 = vpop.f32.mrb[10].mxu1  ;;  %v1014_v46 = vsel %vm1013_vm10, %v998_v44, -inf }
 0x335   : > { %1015 = vmax.xlane.f32.xlu1 %v1014_v46  ;;  %v1001_v47 = vpop.f32.mrb[11].mxu1  ;;  %v1024_v49 = vsel %vm1023_vm11, %v1974_v45, -inf }
 0x336   : > { %v1017_v48 = vsel %vm1013_vm10, %v1001_v47, -inf }
 0x337   : > { %1018 = vmax.xlane.f32.xlu0 %v1017_v48 }
 0x339   : > { %1025 = vmax.xlane.f32.xlu1 %v1024_v49 }
 0x33b   : > { %1021 = vmax.xlane.f32.xlu0 %v1020_v50 }
 0x34a   : > { %722 = vperm.xlu1 %2075, %v2301_v37  }
 0x34e   : > { %725 = vperm.xlu1 %2075, %v2311_v38  }
 0x351   : > { %658 = vperm.xlu0 %2074, %v2279_v28  }
 0x3c2   : > { %v1016_v55 = vpop.xlane.xlu1 %1015 }
 0x3c3   : > { %v1027_v58 = vsub.f32 %v998_v44, %v1016_v55 }
 0x3c4   : > { %v1019_v56 = vpop.xlane.xlu0 %1018 }
 0x3c5   : > { %v1028_v57 = vsub.f32 %v1001_v47, %v1019_v56  ;;  %v1031_v63 = vmul.f32 1.442695, %v1027_v58 }
 0x3c6   : > { %v1026_v60 = vpop.xlane.xlu1 %1025 }
 0x3c7   : > { %v1033_v59 = vmul.f32 1.442695, %v1028_v57  ;;  %v1030_v0 = vsub.f32 %v1974_v45, %v1026_v60 }
 0x3c8   : > { %v1022_v61 = vpop.xlane.xlu0 %1021 }
 0x3c9   : > { %2084 = vpow2.f32 %v1033_v59  ;;  %v1029_v62 = vsub.f32 %v1973_v43, %v1022_v61  ;;  %v1037_v38 = vmul.f32 1.442695, %v1030_v0 }
 0x3ca   : > { %v723_v10 = vpop.permute.xlu1 %722 }
 0x3cb   : > { %v1035_v37 = vmul.f32 1.442695, %v1029_v62  ;;  %v738_v15 = vrot.slane %v723_v10, 1 }
 0x3cd   : > { %2086 = vpow2.f32 %v1035_v37 }
 0x3ce   : > { %2088 = vpow2.f32 %v1031_v63  ;;  %v726_v13 = vpop.permute.xlu1 %725 }
 0x3cf   : > { %2090 = vpow2.f32 %v1037_v38  ;;  %v740_v23 = vrot.slane %v726_v13, 1 }
 0x3d0   : > { %v659_v11 = vpop.permute.xlu0 %658 }
 0x3d1   : > { %v737_v22 = vrot.slane %v659_v11, 1  ;;  %v741_v25 = vsel %vm580_vm1, %v738_v15, %v740_v23  ;;  %v2405_v29 = vadd.f32 %v1965_v51, %v740_v23  ;;  %v2413_v44 = vadd.f32 %v2377_v40, %v659_v11 }
 0x3d2   : > { %v2407_v31 = vadd.f32 %v791_v54, %v741_v25 }
 0x3d3   : > { %v2085_v28 = vpop.eup %2084  ;;  %v942_v42 = vrot.slane %v2405_v29, 7 }
 0x3d4   : > { %v1042_v1 = vsel %vm1013_vm10, %v2085_v28, 0.0  ;;  %v940_v43 = vrot.slane %v2407_v31, 7 }
 0x3d5   : > { %1043 = vadd.xlane.f32.xlu0 %v1042_v1 }
 0x3d6   : > { %v943_v49 = vsel %vm510_vm6, %v940_v43, %v942_v42 }
 0x3d7   : > { %v2087_v2 = vpop.eup %2086 }
 0x3d8   : > { %v1045_v3 = vsel %vm1013_vm10, %v2087_v2, 0.0  ;;  %v2089_v4 = vpop.eup %2088 }
 0x3d9   : > { %1046 = vadd.xlane.f32.xlu1 %v1045_v3  ;;  %v1039_v5 = vsel %vm1013_vm10, %v2089_v4, 0.0  ;;  %v2091_v6 = vpop.eup %2090 }
 0x3da   : > { %v1048_v7 = vsel %vm1023_vm11, %v2091_v6, 0.0 }
 0x3dd   : > { %1040 = vadd.xlane.f32.xlu1 %v1039_v5 }
 0x3e1   : > { %1049 = vadd.xlane.f32.xlu1 %v1048_v7 }
 0x3eb   : > { %654 = vperm.xlu0 %2074, %v2286_v34   ;;  %v739_v34 = vsel %vm580_vm1, %v737_v22, %v738_v15 }
 0x3ec   : > { %v2403_v27 = vadd.f32 %v788_v52, %v739_v34 }
 0x3ee   : > { %v939_v41 = vrot.slane %v2403_v27, 7 }
 0x3f0   : > { %v941_v48 = vsel %vm510_vm6, %v939_v41, %v940_v43  ;;  %v947_v50 = vsel %vm510_vm6, %v2413_v44, %v939_v41 }
 0x3f1   : > { %v2425_v40 = vpack.c.bf16 %v943_v49, %v941_v48 }
 0x3f2   : > { %1131 = vrot.lane.b32.xlu1 %v2361_v26, %s2163_s11 }
 0x3f3   : > { %v1068_v54 = vsel %vm597_vm7, %v2425_v40, 0 }
 0x3f6   : > { %1133 = vrot.lane.b32.xlu1 %v2365_v30, %s2163_s11 }
 0x3fa   : > { %1125 = vrot.lane.b32.xlu1 %v2293_v36, %s2163_s11 }
 0x3fe   : > { %1127 = vrot.lane.b32.xlu1 %v2260_v20, %s2163_s11 }
 0x462   : > { %v1044_v32 = vpop.xlane.xlu0 %1043 }
 0x463   : > { %2092 = vrcp.f32 %v1044_v32 }
 0x466   : > { %v1047_v39 = vpop.xlane.xlu1 %1046 }
 0x46a   : > { %v1041_v45 = vpop.xlane.xlu1 %1040  ;;  %v655_v46 = vpop.permute.xlu0 %654 }
 0x46b   : > { %2094 = vrcp.f32 %v1041_v45  ;;  %v2416_v47 = vadd.f32 %v2375_v33, %v655_v46 }
 0x46c   : > { %2096 = vrcp.f32 %v1047_v39 }
 0x46d   : > { %v2423_v51 = vpack.c.bf16 %v947_v50, %v2416_v47  ;;  %v2093_v53 = vpop.eup %2092 }
 0x46e   : > { %v1050_v52 = vpop.xlane.xlu1 %1049  ;;  %v1056_v57 = vmul.f32 %v2093_v53, %v2085_v28 }
 0x46f   : > { %2098 = vrcp.f32 %v1050_v52  ;;  %1975 = vmatprep.subr.bf16.mxu0 %v2423_v51 }
 0x470   : > { %1976 = vmatpush3.bf16.msra.mxu0 %v2423_v51 }
 0x471   : > { %2033 = vmatprep.subr.msk.bf16.mxu0 %vm597_vm7, %v2425_v40 }
 0x472   : > { %v1132_v33 = vpop.permute.xlu1 %1131 }
 0x473   : > { %v1142_v37 = vsel %vm951_vm9, %v1132_v33, 0 }
 0x474   : > { %1978 = vmatpush3.bf16.msra.mxu0 %v1068_v54 }
 0x475   : > { %v2095_v55 = vpop.eup %2094  ;;  %2034 = vmatprep.subr.msk.bf16.mxu0 %vm951_vm9, %v1132_v33 }
 0x476   : > { %v1055_v56 = vmul.f32 %v2095_v55, %v2089_v4  ;;  %v2097_v58 = vpop.eup %2096  ;;  %v1134_v59 = vpop.permute.xlu1 %1133 }
 0x477   : > { %v1057_v62 = vmul.f32 %v2097_v58, %v2087_v2  ;;  %v1145_v28 = vsel %vm951_vm9, %v1134_v59, 0 }
 0x478   : > { %v1059_v60 = vpack.c.bf16 %v1056_v57, %v1055_v56 }
 0x479   : > { %v2099_v61 = vpop.eup %2098 }
 0x47a   : > { %v1058_v63 = vmul.f32 %v2099_v61, %v2091_v6  ;;  %1979 = vmatprep.mubr.msk.bf16.mxu0 %vm1013_vm10, %v1059_v60  ;;  %v1126_v38 = vpop.permute.xlu1 %1125 }
 0x47c   : > { %v1060_v0 = vpack.c.bf16 %v1058_v63, %v1057_v62 }
 0x47e   : > { %1980 = vmatmul.mubr.msk.bf16.vlgmr.msra.gmra.mrb[12].mxu0 %vm1013_vm10, %v1060_v0  ;;  %v1128_v1 = vpop.permute.xlu1 %1127 }
 0x47f   : > { %1984 = vmatpush3.bf16.xpose.msra.mxu0 %v1142_v37  ;;  %1987 = vmatprep.mubr.msk.bf16.mxu0 %vm951_vm9, %v1126_v38 }
 0x480   : > { %2035 = vmatprep.subr.msk.bf16.mxu0 %vm951_vm9, %v1134_v59 }
 0x487   : > { %1986 = vmatpush3.bf16.xpose.msra.mxu0 %v1145_v28 }
 0x48e   : > { %1988 = vmatmul.mubr.msk.bf16.vlgmr.msra.gmra.mrb[16].mxu0 %vm951_vm9, %v1128_v1 }
 0x551   : > { %v1981_v2 = vpop.f32.mrb[12].mxu0 }
 0x552   : > { %1121 = vst.msk [vmem:[%s2446_s17 + $0x10] sm:$0xff] %vm951_vm9, %v1981_v2  ;;  %v1104_v3 = vpop.f32.mrb[13].mxu0 }
 0x553   : > { %1119 = vst.msk [vmem:[%s2446_s17] sm:$0xff] %vm951_vm9, %v1104_v3  ;;  %v1982_v4 = vpop.f32.mrb[14].mxu0 }
 0x554   : > { %1123 = vst.msk [vmem:[%s2446_s17 + $0x18] sm:$0x3] %vm1122_vm12, %v1982_v4  ;;  %v1107_v5 = vpop.f32.mrb[15].mxu0 }
 0x555   : > { %1120 = vst.msk [vmem:[%s2446_s17 + $0x8] sm:$0xff] %vm951_vm9, %v1107_v5 }
 0x561   : > { %v1989_v6 = vpop.f32.mrb[16].mxu0 }
 0x562   : > { %v1181_v7 = vpop.f32.mrb[17].mxu0  ;;  %v1202_v23 = vsel %vm1013_vm10, %v1989_v6, -inf }
 0x563   : > { %v1990_v10 = vpop.f32.mrb[18].mxu0  ;;  %v1196_v11 = vsel %vm1013_vm10, %v1181_v7, -inf }
 0x564   : > { %1197 = vmax.xlane.f32.xlu1 %v1196_v11  ;;  %v1184_v13 = vpop.f32.mrb[19].mxu0  ;;  %v1205_v22 = vsel %vm1023_vm11, %v1990_v10, -inf }
 0x565   : > { %v1199_v15 = vsel %vm1013_vm10, %v1184_v13, -inf }
 0x566   : > { %1200 = vmax.xlane.f32.xlu0 %v1199_v15 }
 0x568   : > { %1206 = vmax.xlane.f32.xlu1 %v1205_v22 }
 0x56a   : > { %1203 = vmax.xlane.f32.xlu0 %v1202_v23 }
 0x579   : > { %1246 = vrot.lane.b32.xlu1 %v2425_v40, %s2163_s11 }
 0x5f1   : > { %v1198_v34 = vpop.xlane.xlu1 %1197 }
 0x5f2   : > { %v1208_v41 = vsub.f32 %v1181_v7, %v1198_v34 }
 0x5f3   : > { %v1201_v25 = vpop.xlane.xlu0 %1200 }
 0x5f4   : > { %v1209_v32 = vsub.f32 %v1184_v13, %v1201_v25  ;;  %v1212_v49 = vmul.f32 1.442695, %v1208_v41 }
 0x5f5   : > { %v1207_v39 = vpop.xlane.xlu1 %1206 }
 0x5f6   : > { %v1211_v42 = vsub.f32 %v1990_v10, %v1207_v39  ;;  %v1214_v43 = vmul.f32 1.442695, %v1209_v32 }
 0x5f7   : > { %v1204_v45 = vpop.xlane.xlu0 %1203 }
 0x5f8   : > { %v1218_v46 = vmul.f32 1.442695, %v1211_v42  ;;  %v1210_v48 = vsub.f32 %v1989_v6, %v1204_v45 }
 0x5f9   : > { %v1247_v59 = vpop.permute.xlu1 %1246 }
 0x5fa   : > { %2100 = vpow2.f32 %v1218_v46  ;;  %v1216_v50 = vmul.f32 1.442695, %v1210_v48  ;;  %v1256_v28 = vsel %vm597_vm7, %v1247_v59, 0 }
 0x5fb   : > { %2102 = vpow2.f32 %v1214_v43 }
 0x5fc   : > { %2104 = vpow2.f32 %v1216_v50 }
 0x5fd   : > { %2106 = vpow2.f32 %v1212_v49 }
 0x604   : > { %v2101_v52 = vpop.eup %2100 }
 0x605   : > { %v2103_v33 = vpop.eup %2102  ;;  %v1229_v53 = vsel %vm1023_vm11, %v2101_v52, 0.0 }
 0x606   : > { %v2105_v54 = vpop.eup %2104  ;;  %1230 = vadd.xlane.f32.xlu1 %v1229_v53  ;;  %v1223_v57 = vsel %vm1013_vm10, %v2103_v33, 0.0 }
 0x607   : > { %v1226_v55 = vsel %vm1013_vm10, %v2105_v54, 0.0  ;;  %v2107_v56 = vpop.eup %2106 }
 0x608   : > { %1227 = vadd.xlane.f32.xlu0 %v1226_v55  ;;  %v1220_v58 = vsel %vm1013_vm10, %v2107_v56, 0.0 }
 0x60a   : > { %1224 = vadd.xlane.f32.xlu1 %v1223_v57 }
 0x60c   : > { %1221 = vadd.xlane.f32.xlu0 %v1220_v58 }
 0x61b   : > { %1333 = vrot.lane.b32.xlu1 %v2361_v26, %s2164_s19 }
 0x61f   : > { %1329 = vrot.lane.b32.xlu1 %v2293_v36, %s2164_s19 }
 0x622   : > { %1244 = vrot.lane.b32.xlu0 %v2423_v51, %s2163_s11  ;;  %s376_s11 = scalar_lea.vmem %s2635_s10, %s2637_s14 }
 0x626   : > { %1335 = vrot.lane.b32.xlu0 %v2365_v30, %s2164_s19 }
 0x62a   : > { %1331 = vrot.lane.b32.xlu0 %v2260_v20, %s2164_s19 }
 0x693   : > { %v1231_v60 = vpop.xlane.xlu1 %1230 }
 0x695   : > { %v1228_v61 = vpop.xlane.xlu0 %1227 }
 0x696   : > { %2108 = vrcp.f32 %v1228_v61 }
 0x697   : > { %v1225_v62 = vpop.xlane.xlu1 %1224 }
 0x698   : > { %2110 = vrcp.f32 %v1225_v62 }
 0x699   : > { %2112 = vrcp.f32 %v1231_v60  ;;  %v1222_v63 = vpop.xlane.xlu0 %1221 }
 0x69a   : > { %2114 = vrcp.f32 %v1222_v63 }
 0x69b   : > { %v1334_v2 = vpop.permute.xlu1 %1333 }
 0x69c   : > { %v1344_v15 = vsel %vm951_vm9, %v1334_v2, 0 }
 0x69d   : > { %v1245_v0 = vpop.permute.xlu0 %1244 }
 0x69e   : > { %1991 = vmatprep.subr.bf16.mxu1 %v1245_v0 }
 0x69f   : > { %1992 = vmatpush3.bf16.msra.mxu1 %v1245_v0  ;;  %v1330_v13 = vpop.permute.xlu1 %1329 }
 0x6a0   : > { %2036 = vmatprep.subr.msk.bf16.mxu1 %vm597_vm7, %v1247_v59  ;;  %v2109_v37 = vpop.eup %2108 }
 0x6a1   : > { %v1238_v4 = vmul.f32 %v2109_v37, %v2105_v54  ;;  %v1336_v22 = vpop.permute.xlu0 %1335 }
 0x6a2   : > { %v2111_v38 = vpop.eup %2110  ;;  %v1347_v23 = vsel %vm951_vm9, %v1336_v22, 0 }
 0x6a3   : > { %v2113_v1 = vpop.eup %2112  ;;  %1994 = vmatpush3.bf16.msra.mxu1 %v1256_v28  ;;  %v1237_v6 = vmul.f32 %v2111_v38, %v2103_v33 }
 0x6a4   : > { %v2115_v3 = vpop.eup %2114  ;;  %2037 = vmatprep.subr.msk.bf16.mxu1 %vm951_vm9, %v1334_v2  ;;  %v1239_v7 = vmul.f32 %v2113_v1, %v2101_v52 }
 0x6a5   : > { %v1236_v5 = vmul.f32 %v2115_v3, %v2107_v56  ;;  %v1332_v34 = vpop.permute.xlu0 %1331 }
 0x6a6   : > { %v1241_v11 = vpack.c.bf16 %v1239_v7, %v1238_v4 }
 0x6a7   : > { %v1240_v10 = vpack.c.bf16 %v1237_v6, %v1236_v5 }
 0x6a9   : > { %1995 = vmatprep.mubr.msk.bf16.mxu1 %vm1013_vm10, %v1240_v10 }
 0x6aa   : > { %1996 = vmatmul.mubr.msk.bf16.vlgmr.msra.gmra.mrb[12].mxu1 %vm1013_vm10, %v1241_v11 }
 0x6ab   : > { %2003 = vmatprep.mubr.msk.bf16.mxu1 %vm951_vm9, %v1330_v13 }
 0x6ac   : > { %2000 = vmatpush3.bf16.xpose.msra.mxu1 %v1344_v15 }
 0x6ad   : > { %2038 = vmatprep.subr.msk.bf16.mxu1 %vm951_vm9, %v1336_v22 }
 0x6b4   : > { %2002 = vmatpush3.bf16.xpose.msra.mxu1 %v1347_v23 }
 0x6bb   : > { %2004 = vmatmul.mubr.msk.bf16.vlgmr.msra.gmra.mrb[16].mxu1 %vm951_vm9, %v1332_v34 }
 0x77d   : > { %v2485_v25 = vpop.f32.mrb[12].mxu1 }
 0x77e   : > { %v2487_v32 = vpop.f32.mrb[13].mxu1 }
 0x77f   : > { %v2489_v39 = vpop.f32.mrb[14].mxu1 }
 0x780   : > { %v2491_v41 = vpop.f32.mrb[15].mxu1 }
 0x78e   : > { %v2005_v42 = vpop.f32.mrb[16].mxu1 }
 0x78f   : > { %v1383_v43 = vpop.f32.mrb[17].mxu1  ;;  %v1404_v52 = vsel %vm1013_vm10, %v2005_v42, -inf }
 0x790   : > { %v2006_v45 = vpop.f32.mrb[18].mxu1  ;;  %v1398_v46 = vsel %vm1013_vm10, %v1383_v43, -inf }
 0x791   : > { %1399 = vmax.xlane.f32.xlu1 %v1398_v46  ;;  %v1386_v48 = vpop.f32.mrb[19].mxu1  ;;  %v1407_v50 = vsel %vm1023_vm11, %v2006_v45, -inf }
 0x792   : > { %v1401_v49 = vsel %vm1013_vm10, %v1386_v48, -inf }
 0x793   : > { %1402 = vmax.xlane.f32.xlu0 %v1401_v49 }
 0x795   : > { %1408 = vmax.xlane.f32.xlu1 %v1407_v50 }
 0x797   : > { %1405 = vmax.xlane.f32.xlu0 %v1404_v52 }
 0x7a6   : > { %1446 = vrot.lane.b32.xlu1 %v2425_v40, %s2164_s19 }
 0x81e   : > { %v1400_v33 = vpop.xlane.xlu1 %1399 }
 0x81f   : > { %v1410_v56 = vsub.f32 %v1383_v43, %v1400_v33 }
 0x820   : > { %v1403_v53 = vpop.xlane.xlu0 %1402 }
 0x821   : > { %v1411_v54 = vsub.f32 %v1386_v48, %v1403_v53  ;;  %v1414_v62 = vmul.f32 1.442695, %v1410_v56 }
 0x822   : > { %v1409_v55 = vpop.xlane.xlu1 %1408 }
 0x823   : > { %v1413_v57 = vsub.f32 %v2006_v45, %v1409_v55  ;;  %v1416_v58 = vmul.f32 1.442695, %v1411_v54 }
 0x824   : > { %v1406_v59 = vpop.xlane.xlu0 %1405 }
 0x825   : > { %v1420_v60 = vmul.f32 1.442695, %v1413_v57  ;;  %v1412_v61 = vsub.f32 %v2005_v42, %v1406_v59 }
 0x826   : > { %v1447_v5 = vpop.permute.xlu1 %1446 }
 0x827   : > { %2116 = vpow2.f32 %v1420_v60  ;;  %v1418_v63 = vmul.f32 1.442695, %v1412_v61 }
 0x828   : > { %2118 = vpow2.f32 %v1416_v58 }
 0x829   : > { %2120 = vpow2.f32 %v1418_v63 }
 0x82a   : > { %2122 = vpow2.f32 %v1414_v62 }
 0x831   : > { %v2117_v0 = vpop.eup %2116 }
 0x832   : > { %v2119_v37 = vpop.eup %2118  ;;  %v1431_v38 = vsel %vm1023_vm11, %v2117_v0, 0.0 }
 0x833   : > { %v2121_v28 = vpop.eup %2120  ;;  %1432 = vadd.xlane.f32.xlu1 %v1431_v38  ;;  %v1425_v3 = vsel %vm1013_vm10, %v2119_v37, 0.0 }
 0x834   : > { %v1428_v1 = vsel %vm1013_vm10, %v2121_v28, 0.0  ;;  %v2123_v2 = vpop.eup %2122 }
 0x835   : > { %1429 = vadd.xlane.f32.xlu0 %v1428_v1  ;;  %v1422_v4 = vsel %vm1013_vm10, %v2123_v2, 0.0 }
 0x837   : > { %1426 = vadd.xlane.f32.xlu1 %v1425_v3 }
 0x839   : > { %1423 = vadd.xlane.f32.xlu0 %v1422_v4 }
 0x848   : > { %1533 = vrot.lane.b32.xlu1 %v2361_v26, %s2165_s18 }
 0x84c   : > { %1529 = vrot.lane.b32.xlu1 %v2293_v36, %s2165_s18 }
 0x84f   : > { %1444 = vrot.lane.b32.xlu0 %v2423_v51, %s2164_s19 }
 0x853   : > { %1535 = vrot.lane.b32.xlu0 %v2365_v30, %s2165_s18  ;;  %v1456_v30 = vsel %vm597_vm7, %v1447_v5, 0 }
 0x857   : > { %1531 = vrot.lane.b32.xlu0 %v2260_v20, %s2165_s18 }
 0x8c0   : > { %v1433_v6 = vpop.xlane.xlu1 %1432 }
 0x8c2   : > { %v1430_v7 = vpop.xlane.xlu0 %1429 }
 0x8c3   : > { %2124 = vrcp.f32 %v1430_v7 }
 0x8c4   : > { %v1427_v10 = vpop.xlane.xlu1 %1426 }
 0x8c5   : > { %2126 = vrcp.f32 %v1427_v10 }
 0x8c6   : > { %2128 = vrcp.f32 %v1433_v6  ;;  %v1424_v26 = vpop.xlane.xlu0 %1423 }
 0x8c7   : > { %2130 = vrcp.f32 %v1424_v26 }
 0x8c8   : > { %v1534_v20 = vpop.permute.xlu1 %1533 }
 0x8c9   : > { %v1544_v49 = vsel %vm951_vm9, %v1534_v20, 0 }
 0x8ca   : > { %v1445_v11 = vpop.permute.xlu0 %1444 }
 0x8cb   : > { %2007 = vmatprep.subr.bf16.mxu0 %v1445_v11 }
 0x8cc   : > { %2008 = vmatpush3.bf16.msra.mxu0 %v1445_v11  ;;  %v1530_v48 = vpop.permute.xlu1 %1529 }
 0x8cd   : > { %2039 = vmatprep.subr.msk.bf16.mxu0 %vm597_vm7, %v1447_v5  ;;  %v2125_v36 = vpop.eup %2124 }
 0x8ce   : > { %v1440_v23 = vmul.f32 %v2125_v36, %v2121_v28  ;;  %v1536_v50 = vpop.permute.xlu0 %1535 }
 0x8cf   : > { %v2127_v13 = vpop.eup %2126  ;;  %v1547_v52 = vsel %vm951_vm9, %v1536_v50, 0 }
 0x8d0   : > { %v2129_v15 = vpop.eup %2128  ;;  %2010 = vmatpush3.bf16.msra.mxu0 %v1456_v30  ;;  %v1439_v42 = vmul.f32 %v2127_v13, %v2119_v37 }
 0x8d1   : > { %v2131_v22 = vpop.eup %2130  ;;  %2040 = vmatprep.subr.msk.bf16.mxu0 %vm951_vm9, %v1534_v20  ;;  %v1441_v43 = vmul.f32 %v2129_v15, %v2117_v0 }
 0x8d2   : > { %v1438_v34 = vmul.f32 %v2131_v22, %v2123_v2  ;;  %v1532_v33 = vpop.permute.xlu0 %1531 }
 0x8d3   : > { %v1443_v46 = vpack.c.bf16 %v1441_v43, %v1440_v23 }
 0x8d4   : > { %v1442_v45 = vpack.c.bf16 %v1439_v42, %v1438_v34  ;;  %v814_v34 = vrot.slane %v2254_v17, 1 }
 0x8d6   : > { %2011 = vmatprep.mubr.msk.bf16.mxu0 %vm1013_vm10, %v1442_v45  ;;  %v816_v42 = vsel %vm580_vm1, %v814_v34, %v815_v18  ;;  %vm1527_vm1 = vcmask 189568  }
 0x8d7   : > { %2012 = vmatmul.mubr.msk.bf16.vlgmr.msra.gmra.mrb[20].mxu0 %vm1013_vm10, %v1443_v46 }
 0x8d8   : > { %2019 = vmatprep.mubr.msk.bf16.mxu0 %vm951_vm9, %v1530_v48 }
 0x8d9   : > { %2016 = vmatpush3.bf16.xpose.msra.mxu0 %v1544_v49 }
 0x8da   : > { %2041 = vmatprep.subr.msk.bf16.mxu0 %vm951_vm9, %v1536_v50 }
 0x8e1   : > { %2018 = vmatpush3.bf16.xpose.msra.mxu0 %v1547_v52 }
 0x8e8   : > { %2020 = vmatmul.mubr.msk.bf16.vlgmr.msra.gmra.mrb[24].mxu0 %vm951_vm9, %v1532_v33 }
 0x9aa   : > { %v2523_v53 = vpop.f32.mrb[20].mxu0 }
 0x9ab   : > { %v2525_v54 = vpop.f32.mrb[21].mxu0 }
 0x9ac   : > { %v2527_v55 = vpop.f32.mrb[22].mxu0 }
 0x9ad   : > { %v2529_v56 = vpop.f32.mrb[23].mxu0 }
 0x9bb   : > { %v2021_v57 = vpop.f32.mrb[24].mxu0 }
 0x9bc   : > { %v1583_v58 = vpop.f32.mrb[25].mxu0  ;;  %v1604_v0 = vsel %vm1013_vm10, %v2021_v57, -inf }
 0x9bd   : > { %v2022_v59 = vpop.f32.mrb[26].mxu0  ;;  %v1598_v60 = vsel %vm1013_vm10, %v1583_v58, -inf }
 0x9be   : > { %1599 = vmax.xlane.f32.xlu1 %v1598_v60  ;;  %v1586_v61 = vpop.f32.mrb[27].mxu0  ;;  %v1607_v63 = vsel %vm1023_vm11, %v2022_v59, -inf }
 0x9bf   : > { %v1601_v62 = vsel %vm1013_vm10, %v1586_v61, -inf }
 0x9c0   : > { %1602 = vmax.xlane.f32.xlu0 %v1601_v62 }
 0x9c2   : > { %1608 = vmax.xlane.f32.xlu1 %v1607_v63 }
 0x9c4   : > { %1605 = vmax.xlane.f32.xlu0 %v1604_v0 }
 0xa4b   : > { %v1600_v37 = vpop.xlane.xlu1 %1599 }
 0xa4c   : > { %v1610_v2 = vsub.f32 %v1583_v58, %v1600_v37 }
 0xa4d   : > { %v1603_v38 = vpop.xlane.xlu0 %1602 }
 0xa4e   : > { %v1611_v28 = vsub.f32 %v1586_v61, %v1603_v38  ;;  %v1614_v10 = vmul.f32 1.442695, %v1610_v2 }
 0xa4f   : > { %v1609_v1 = vpop.xlane.xlu1 %1608 }
 0xa50   : > { %v1613_v3 = vsub.f32 %v2022_v59, %v1609_v1  ;;  %v1616_v4 = vmul.f32 1.442695, %v1611_v28 }
 0xa51   : > { %v1606_v5 = vpop.xlane.xlu0 %1605 }
 0xa52   : > { %v1620_v6 = vmul.f32 1.442695, %v1613_v3  ;;  %v1612_v7 = vsub.f32 %v2021_v57, %v1606_v5 }
 0xa54   : > { %2132 = vpow2.f32 %v1620_v6  ;;  %v1618_v26 = vmul.f32 1.442695, %v1612_v7 }
 0xa55   : > { %2134 = vpow2.f32 %v1616_v4 }
 0xa56   : > { %2136 = vpow2.f32 %v1618_v26 }
 0xa57   : > { %2138 = vpow2.f32 %v1614_v10 }
 0xa5e   : > { %v2133_v11 = vpop.eup %2132 }
 0xa5f   : > { %v2135_v36 = vpop.eup %2134  ;;  %v1631_v13 = vsel %vm1023_vm11, %v2133_v11, 0.0 }
 0xa60   : > { %v2137_v30 = vpop.eup %2136  ;;  %1632 = vadd.xlane.f32.xlu1 %v1631_v13  ;;  %v1625_v22 = vsel %vm1013_vm10, %v2135_v36, 0.0 }
 0xa61   : > { %v1628_v15 = vsel %vm1013_vm10, %v2137_v30, 0.0  ;;  %v2139_v20 = vpop.eup %2138 }
 0xa62   : > { %1629 = vadd.xlane.f32.xlu0 %v1628_v15  ;;  %v1622_v23 = vsel %vm1013_vm10, %v2139_v20, 0.0 }
 0xa64   : > { %1626 = vadd.xlane.f32.xlu1 %v1625_v22 }
 0xa66   : > { %1623 = vadd.xlane.f32.xlu0 %v1622_v23 }
 0xa75   : > { %1646 = vrot.lane.b32.xlu1 %v2425_v40, %s2165_s18 }
 0xa79   : > { %819 = vrot.lane.b32.xlu1 %v816_v42, %s2159_s25 }
 0xa7c   : > { %1644 = vrot.lane.b32.xlu0 %v2423_v51, %s2165_s18 }
 0xa7d   : > { %839 = vrot.lane.b32.xlu1 %v816_v42, %s2160_s16 }
 0xa80   : > { %821 = vrot.lane.b32.xlu0 %v2270_v24, %s2159_s25 }
 0xa81   : > { %804 = vrot.lane.b32.xlu1 %v2288_v35, %s2159_s25 }
 0xa84   : > { %841 = vrot.lane.b32.xlu0 %v2270_v24, %s2160_s16 }
 0xa85   : > { %823 = vrot.lane.b32.xlu1 %v2257_v19, %s2159_s25 }
 0xa88   : > { %806 = vrot.lane.b32.xlu0 %v2254_v17, %s2159_s25  ;;  %s2166_s25 = smov 8  }
 0xa89   : > { %833 = vrot.lane.b32.xlu1 %v2254_v17, %s2160_s16 }
 0xa8c   : > { %831 = vrot.lane.b32.xlu0 %v2288_v35, %s2160_s16 }
 0xa90   : > { %843 = vrot.lane.b32.xlu0 %v2257_v19, %s2160_s16  ;;  %s2167_s16 = smov 16  }
 0xaed   : > { %v1633_v12 = vpop.xlane.xlu1 %1632 }
 0xaef   : > { %v1630_v18 = vpop.xlane.xlu0 %1629 }
 0xaf0   : > { %2140 = vrcp.f32 %v1630_v18 }
 0xaf1   : > { %v1627_v51 = vpop.xlane.xlu1 %1626 }
 0xaf2   : > { %2142 = vrcp.f32 %v1627_v51 }
 0xaf3   : > { %2144 = vrcp.f32 %v1633_v12  ;;  %v1624_v24 = vpop.xlane.xlu0 %1623 }
 0xaf4   : > { %2146 = vrcp.f32 %v1624_v24 }
 0xaf5   : > { %v1647_v40 = vpop.permute.xlu1 %1646 }
 0xaf6   : > { %v1656_v19 = vsel %vm597_vm7, %v1647_v40, 0 }
 0xaf7   : > { %v1645_v43 = vpop.permute.xlu0 %1644 }
 0xaf8   : > { %2023 = vmatprep.subr.bf16.mxu1 %v1645_v43 }
 0xaf9   : > { %v820_v45 = vpop.permute.xlu1 %819  ;;  %2024 = vmatpush3.bf16.msra.mxu1 %v1645_v43 }
 0xafa   : > { %2042 = vmatprep.subr.msk.bf16.mxu1 %vm597_vm7, %v1647_v40  ;;  %v2141_v17 = vpop.eup %2140  ;;  %v828_v57 = vsub.f32 %v2346_v9, %v820_v45 }
 0xafb   : > { %v822_v35 = vpop.permute.xlu0 %821  ;;  %v1640_v52 = vmul.f32 %v2141_v17, %v2137_v30 }
 0xafc   : > { %v2143_v46 = vpop.eup %2142  ;;  %v829_v33 = vsub.f32 %v2352_v16, %v822_v35  ;;  %v868_v28 = vmul.f32 %v828_v57, %v828_v57 }
 0xafd   : > { %v2145_v48 = vpop.eup %2144  ;;  %v840_v49 = vpop.permute.xlu1 %839  ;;  %2026 = vmatpush3.bf16.msra.mxu1 %v1656_v19  ;;  %v1639_v60 = vmul.f32 %v2143_v46, %v2135_v36 }
 0xafe   : > { %v2147_v50 = vpop.eup %2146  ;;  %v1641_v61 = vmul.f32 %v2145_v48, %v2133_v11  ;;  %v869_v0 = vmul.f32 %v829_v33, %v829_v33  ;;  %v848_v5 = vsub.f32 %v2403_v27, %v840_v49  ;;  %v871_v7 = vsel %vm407_vm0, %v868_v28, 0.0 }
 0xaff   : > { %v842_v58 = vpop.permute.xlu0 %841  ;;  %v1638_v59 = vmul.f32 %v2147_v50, %v2139_v20 }
 0xb00   : > { %v1643_v38 = vpack.c.bf16 %v1641_v61, %v1640_v52  ;;  %v849_v1 = vsub.f32 %v2407_v31, %v842_v58  ;;  %v872_v4 = vsel %vm407_vm0, %v869_v0, 0.0  ;;  %v903_v20 = vmul.f32 %v848_v5, %v848_v5 }
 0xb01   : > { %v805_v62 = vpop.permute.xlu1 %804  ;;  %v1642_v63 = vpack.c.bf16 %v1639_v60, %v1638_v59  ;;  %v873_v15 = vadd.f32 %v872_v4, %v871_v7 }
 0xb02   : > { %v810_v37 = vsub.f32 %v2354_v21, %v805_v62  ;;  %v904_v31 = vmul.f32 %v849_v1, %v849_v1  ;;  %v906_v18 = vsel %vm407_vm0, %v903_v20, 0.0 }
 0xb03   : > { %2027 = vmatprep.mubr.msk.bf16.mxu1 %vm1013_vm10, %v1642_v63  ;;  %v807_v2 = vpop.permute.xlu0 %806 }
 0xb04   : > { %v851_v3 = vmul.f32 %v810_v37, %v810_v37  ;;  %v811_v16 = vsub.f32 %v2349_v14, %v807_v2  ;;  %2028 = vmatmul.mubr.msk.bf16.vlgmr.msra.gmra.mrb[20].mxu1 %vm1013_vm10, %v1643_v38  ;;  %v907_v42 = vsel %vm407_vm0, %v904_v31, 0.0 }
 0xb05   : > { %v824_v9 = vpop.permute.xlu1 %823 }
 0xb06   : > { %v852_v6 = vmul.f32 %v811_v16, %v811_v16  ;;  %v830_v21 = vsub.f32 %v2344_v8, %v824_v9  ;;  %v853_v14 = vsel %vm407_vm0, %v851_v3, 0.0 }
 0xb07   : > { %v832_v10 = vpop.permute.xlu0 %831 }
 0xb08   : > { %v870_v26 = vmul.f32 %v830_v21, %v830_v21  ;;  %v837_v11 = vsub.f32 %v2416_v47, %v832_v10  ;;  %v855_v36 = vsel %vm854_vm13, %v852_v6, 0.0 }
 0xb09   : > { %v834_v13 = vpop.permute.xlu1 %833  ;;  %v856_v30 = vadd.f32 %v855_v36, %v853_v14 }
 0xb0a   : > { %v887_v22 = vmul.f32 %v837_v11, %v837_v11  ;;  %v838_v27 = vsub.f32 %v2413_v44, %v834_v13  ;;  %v874_v8 = vsel %vm854_vm13, %v870_v26, 0.0  ;;  %v908_v44 = vadd.f32 %v907_v42, %v906_v18 }
 0xb0b   : > { %857 = vadd.xlane.f32.xlu1 %v856_v30  ;;  %v844_v23 = vpop.permute.xlu0 %843  ;;  %v875_v34 = vadd.f32 %v874_v8, %v873_v15 }
 0xb0c   : > { %v888_v12 = vmul.f32 %v838_v27, %v838_v27  ;;  %v850_v47 = vsub.f32 %v2405_v29, %v844_v23  ;;  %v889_v24 = vsel %vm407_vm0, %v887_v22, 0.0  ;;  %vm1523_vm0 = vcmask 195712  }
 0xb0d   : > { %876 = vadd.xlane.f32.xlu0 %v875_v34 }
 0xb0e   : > { %v905_v51 = vmul.f32 %v850_v47, %v850_v47  ;;  %v890_v40 = vsel %vm854_vm13, %v888_v12, 0.0 }
 0xb0f   : > { %v891_v43 = vadd.f32 %v890_v40, %v889_v24 }
 0xb10   : > { %v909_v45 = vsel %vm854_vm13, %v905_v51, 0.0 }
 0xb11   : > { %892 = vadd.xlane.f32.xlu0 %v891_v43  ;;  %v910_v17 = vadd.f32 %v909_v45, %v908_v44 }
 0xb13   : > { %911 = vadd.xlane.f32.xlu1 %v910_v17 }
 0xb24   : > { %1313 = vrot.lane.b32.xlu1 %v2491_v41, %s2166_s25 }
 0xb27   : > { %1311 = vrot.lane.b32.xlu0 %v2487_v32, %s2166_s25 }
 0xb28   : > { %1315 = vrot.lane.b32.xlu1 %v2485_v25, %s2166_s25 }
 0xb2b   : > { %1317 = vrot.lane.b32.xlu0 %v2489_v39, %s2166_s25 }
 0xb2c   : > { %1511 = vrot.lane.b32.xlu1 %v2525_v54, %s2167_s16 }
 0xb2f   : > { %1513 = vrot.lane.b32.xlu0 %v2529_v56, %s2167_s16 }
 0xb30   : > { %1515 = vrot.lane.b32.xlu1 %v2523_v53, %s2167_s16 }
 0xb33   : > { %1517 = vrot.lane.b32.xlu0 %v2527_v55, %s2167_s16 }
 0xb98   : > { %v858_v29 = vpop.xlane.xlu1 %857 }
 0xb99   : > { %v859_v35 = vrot.slane %v858_v29, 4 }
 0xb9a   : > { %v877_v46 = vpop.xlane.xlu0 %876 }
 0xb9b   : > { %v860_v19 = vadd.f32 %v859_v35, %v858_v29  ;;  %v878_v41 = vrot.slane %v877_v46, 4 }
 0xb9d   : > { %v861_v32 = vrot.slane %v860_v19, 2  ;;  %v879_v48 = vadd.f32 %v878_v41, %v877_v46 }
 0xb9e   : > { %v893_v25 = vpop.xlane.xlu0 %892 }
 0xb9f   : > { %v880_v49 = vrot.slane %v879_v48, 2  ;;  %v894_v39 = vrot.slane %v893_v25, 4  ;;  %v862_v50 = vadd.f32 %v861_v32, %v860_v19 }
 0xba0   : > { %v912_v54 = vpop.xlane.xlu1 %911 }
 0xba1   : > { %v895_v56 = vadd.f32 %v894_v39, %v893_v25  ;;  %v913_v52 = vrot.slane %v912_v54, 4  ;;  %v863_v53 = vrot.slane %v862_v50, 1  ;;  %v881_v55 = vadd.f32 %v880_v49, %v879_v48 }
 0xba2   : > { %v1312_v33 = vpop.permute.xlu0 %1311 }
 0xba3   : > { %v896_v57 = vrot.slane %v895_v56, 2  ;;  %v914_v58 = vadd.f32 %v913_v52, %v912_v54  ;;  %1324 = vst.msk [vmem:[%s2446_s17] sm:$0xff] %vm1323_vm14, %v1312_v33  ;;  %v864_v59 = vadd.f32 %v863_v53, %v862_v50  ;;  %v882_v60 = vrot.slane %v881_v55, 1 }
 0xba4   : > { %v1314_v61 = vpop.permute.xlu1 %1313 }
 0xba5   : > { %v915_v62 = vrot.slane %v914_v58, 2  ;;  %1325 = vst.msk [vmem:[%s2446_s17 + $0x8] sm:$0xff] %vm1323_vm14, %v1314_v61  ;;  %v883_v63 = vadd.f32 %v882_v60, %v881_v55  ;;  %v897_v0 = vadd.f32 %v896_v57, %v895_v56 }
 0xba6   : > { %2043 = vpush %v864_v59  ;;  %v1318_v37 = vpop.permute.xlu0 %1317 }
 0xba7   : > { %1328 = vst.msk [vmem:[%s2446_s17 + $0x18] sm:$0x3] %vm1327_vm15, %v1318_v37  ;;  %v898_v38 = vrot.slane %v897_v0, 1  ;;  %v916_v28 = vadd.f32 %v915_v62, %v914_v58 }
 0xba8   : > { %2045 = vpush %v883_v63  ;;  %v1316_v1 = vpop.permute.xlu1 %1315 }
 0xba9   : > { %1326 = vst.msk [vmem:[%s2446_s17 + $0x10] sm:$0xff] %vm1323_vm14, %v1316_v1  ;;  %v899_v2 = vadd.f32 %v898_v38, %v897_v0  ;;  %v917_v3 = vrot.slane %v916_v28, 1 }
 0xbaa   : > { %v1514_v16 = vpop.permute.xlu0 %1513 }
 0xbab   : > { %1525 = vst.msk [vmem:[%s2446_s17 + $0x8] sm:$0xff] %vm1523_vm0, %v1514_v16  ;;  %v918_v9 = vadd.f32 %v917_v3, %v916_v28 }
 0xbac   : > { %2047 = vpush %v899_v2  ;;  %v1512_v4 = vpop.permute.xlu1 %1511 }
 0xbad   : > { %1524 = vst.msk [vmem:[%s2446_s17] sm:$0xff] %vm1523_vm0, %v1512_v4 }
 0xbae   : > { %2049 = vpush %v918_v9  ;;  %v1518_v5 = vpop.permute.xlu0 %1517 }
 0xbaf   : > { %1528 = vst.msk [vmem:[%s2446_s17 + $0x18] sm:$0x3] %vm1527_vm1, %v1518_v5 }
 0xbb0   : > { %v1516_v6 = vpop.permute.xlu1 %1515 }
 0xbb1   : > { %1526 = vst.msk [vmem:[%s2446_s17 + $0x10] sm:$0xff] %vm1523_vm0, %v1516_v6 }
 0xbd7   : > { %s2044_s20 = spop %2043  ;;  %v2029_v21 = vpop.f32.mrb[20].mxu1 }
 0xbd8   : > { %v1692_v7 = vpop.f32.mrb[21].mxu1  ;;  %v866_v31 = vstv %s2044_s20 }
 0xbd9   : > { %s2046_s21 = spop %2045  ;;  %v2030_v26 = vpop.f32.mrb[22].mxu1  ;;  %1711 = vrot.lane.b32.xlu1 %v1692_v7, %s2168_s26 }
 0xbda   : > { %v885_v10 = vstv %s2046_s21  ;;  %v1695_v14 = vpop.f32.mrb[23].mxu1 }
 0xbdb   : > { %v886_v11 = vadd.f32 %v885_v10, %v866_v31  ;;  %1713 = vrot.lane.b32.xlu0 %v1695_v14, %s2168_s26 }
 0xbdd   : > { %1730 = vst.msk [vmem:[%s373_s24] sm:$0x1] %vm1729_vm2, %v886_v11  ;;  %s2048_s27 = spop %2047  ;;  %1715 = vrot.lane.b32.xlu1 %v2029_v21, %s2168_s26 }
 0xbde   : > { %v901_v36 = vstv %s2048_s27 }
 0xbdf   : > { %s2050_s28 = spop %2049  ;;  %1717 = vrot.lane.b32.xlu0 %v2030_v26, %s2168_s26 }
 0xbe0   : > { %v920_v13 = vstv %s2050_s28 }
 0xbe1   : > { %v921_v30 = vadd.f32 %v920_v13, %v901_v36 }
 0xbe3   : > { %1731 = vst.msk [vmem:[%s376_s11] sm:$0x1] %vm1729_vm2, %v921_v30 }
 0xc4b   : > { %v1712_v15 = vpop.permute.xlu1 %1711 }
 0xc4c   : > { %1724 = vst.msk [vmem:[%s2446_s17] sm:$0xff] %vm1723_vm3, %v1712_v15 }
 0xc4d   : > { %v1714_v20 = vpop.permute.xlu0 %1713 }
 0xc4e   : > { %1725 = vst.msk [vmem:[%s2446_s17 + $0x8] sm:$0xff] %vm1723_vm3, %v1714_v20 }
 0xc4f   : > { %v1716_v22 = vpop.permute.xlu1 %1715 }
 0xc50   : > { %1726 = vst.msk [vmem:[%s2446_s17 + $0x10] sm:$0xff] %vm1723_vm3, %v1716_v22 }
 0xc51   : > { %v1718_v27 = vpop.permute.xlu0 %1717 }
 0xc52   : > { %1728 = vst.msk [vmem:[%s2446_s17 + $0x18] sm:$0x3] %vm1727_vm4, %v1718_v27 }
 0xc53 PF: > { %s21_s13 = sadd.s32 1, %s2154_s13  }
 0xc54   : > { %p18_p4 = scmp.ge.s32.totalorder %s21_s13, 4  }
 0xc56   :  { %20 = sbr.rel (!%p18_p4) target bundleno = 1 (0x1), region = 106 }

</bundles_post_ra>
